<compile_context>
chip_gen: v6e
topology: v6e:2x2x1
jax: 0.10.0
libtpu: 0.0.40
codegen_flags: <defaults>
</compile_context>

<pallas_src>
import functools

import jax
import jax.numpy as jnp
from jax import lax
from jax.experimental import pallas as pl
from jax.experimental.pallas import tpu as pltpu


def _round_up(x, m):
    return (x + m - 1) // m * m


# ----------------------------------------------------------------------------
# Fused kernel: all layers + final Linear, time loop inside.
# Gate order matches PyTorch nn.LSTM: i, f, g, o.
# ----------------------------------------------------------------------------
def _char_rnn_kernel(x_ref, wih_ref, whh_ref, b_ref, h0_ref, c0_ref,
                     wlin_ref, blin_ref,
                     out_ref, hn_ref, cn_ref,
                     act_sc, xproj_sc, h_sc, c_sc):
    S, B, Hp = act_sc.shape          # static
    G4 = xproj_sc.shape[-1]          # 4 * Hp
    L = wih_ref.shape[0]
    unroll = S <= 16                 # short fixed trip-count -> unroll

    # Embedding activations (already padded to Hp lanes) into resident scratch.
    act_sc[...] = x_ref[...]

    for l in range(L):               # static unrolled layer loop
        # Hoisted input projection for the WHOLE sequence: one big MXU matmul.
        x_flat = act_sc[...].reshape(S * B, Hp)
        xproj = jnp.dot(x_flat, wih_ref[l],
                        preferred_element_type=jnp.float32) + b_ref[l]
        xproj_sc[...] = xproj.reshape(S, B, G4)

        h_sc[...] = h0_ref[l]
        c_sc[...] = c0_ref[l]

        def _step(t, carry, _l=l):
            h = h_sc[...]
            c = c_sc[...]
            # Only the recurrent matmul stays on the serial critical path.
            gates = xproj_sc[t] + jnp.dot(h, whh_ref[_l],
                                          preferred_element_type=jnp.float32)
            # Lane-aligned 128-wide gate slices (Hp is a multiple of 128).
            i_g = jax.nn.sigmoid(gates[:, 0 * Hp:1 * Hp])
            f_g = jax.nn.sigmoid(gates[:, 1 * Hp:2 * Hp])
            g_g = jnp.tanh(gates[:, 2 * Hp:3 * Hp])
            o_g = jax.nn.sigmoid(gates[:, 3 * Hp:4 * Hp])
            c_new = f_g * c + i_g * g_g
            h_new = o_g * jnp.tanh(c_new)
            h_sc[...] = h_new
            c_sc[...] = c_new
            act_sc[t] = h_new        # layer output, reused as next layer input
            return carry

        lax.fori_loop(0, S, _step, 0, unroll=unroll)

        # Final hidden/cell written once per layer (not every timestep).
        hn_ref[l] = h_sc[...]
        cn_ref[l] = c_sc[...]

    # Final Linear fused in: (S*B, Hp) @ (Hp, Vp) + b, lane-dense Vp output.
    y = act_sc[...].reshape(S * B, Hp)
    out_ref[...] = (jnp.dot(y, wlin_ref[...],
                            preferred_element_type=jnp.float32)
                    + blin_ref[...])


def _char_rnn_pallas(x_p, wih_s, whh_s, b_s, h0_p, c0_p, wlin_p, blin_p):
    S, B, Hp = x_p.shape
    L, _, G4 = wih_s.shape
    Vp = wlin_p.shape[1]
    return pl.pallas_call(
        _char_rnn_kernel,
        out_shape=(jax.ShapeDtypeStruct((S * B, Vp), jnp.float32),
                   jax.ShapeDtypeStruct((L, B, Hp), jnp.float32),
                   jax.ShapeDtypeStruct((L, B, Hp), jnp.float32)),
        grid_spec=pltpu.PrefetchScalarGridSpec(
            num_scalar_prefetch=0,
            grid=(1,),
            in_specs=[
                pl.BlockSpec((S, B, Hp), lambda i: (0, 0, 0)),   # embeddings
                pl.BlockSpec((L, Hp, G4), lambda i: (0, 0, 0)),  # W_ih stack
                pl.BlockSpec((L, Hp, G4), lambda i: (0, 0, 0)),  # W_hh stack
                pl.BlockSpec((L, 1, G4), lambda i: (0, 0, 0)),   # bias stack
                pl.BlockSpec((L, B, Hp), lambda i: (0, 0, 0)),   # h0
                pl.BlockSpec((L, B, Hp), lambda i: (0, 0, 0)),   # c0
                pl.BlockSpec((Hp, Vp), lambda i: (0, 0)),        # W_lin
                pl.BlockSpec((1, Vp), lambda i: (0, 0)),         # b_lin
            ],
            out_specs=(pl.BlockSpec((S * B, Vp), lambda i: (0, 0)),
                       pl.BlockSpec((L, B, Hp), lambda i: (0, 0, 0)),
                       pl.BlockSpec((L, B, Hp), lambda i: (0, 0, 0))),
            scratch_shapes=[pltpu.VMEM((S, B, Hp), jnp.float32),   # activations
                            pltpu.VMEM((S, B, G4), jnp.float32),   # x projections
                            pltpu.VMEM((B, Hp), jnp.float32),      # h state
                            pltpu.VMEM((B, Hp), jnp.float32)]),    # c state
        compiler_params=pltpu.CompilerParams(
            dimension_semantics=("arbitrary",)),   # sequential recurrence
    )(x_p, wih_s, whh_s, b_s, h0_p, c0_p, wlin_p, blin_p)


# ----------------------------------------------------------------------------
# Weight padding glue: each gate block is padded to Hp lanes (zeros), so gate
# slices are lane-aligned and padded h/c columns stay exactly zero.
# ----------------------------------------------------------------------------
def _pad_gate_weight(w, in_pad, H, Hp):
    """w: (4H, in_dim) PyTorch layout -> (in_pad, 4*Hp) with zero padding."""
    in_dim = w.shape[1]
    w_t = jnp.transpose(w).reshape(in_dim, 4, H)
    w_t = jnp.pad(w_t, ((0, in_pad - in_dim), (0, 0), (0, Hp - H)))
    return w_t.reshape(in_pad, 4 * Hp)


def _pad_gate_bias(b, H, Hp):
    """b: (4H,) -> (1, 4*Hp) with zero padding per gate block."""
    b4 = jnp.pad(b.reshape(4, H), ((0, 0), (0, Hp - H)))
    return b4.reshape(1, 4 * Hp)


# ----------------------------------------------------------------------------
# CharRnn forward (matches the PyTorch module semantics)
# ----------------------------------------------------------------------------
def make_params(key, vocab_size, embedding_dim, hidden_dim, num_layers):
    params = {}
    k = key
    k, sub = jax.random.split(k)
    params["embedding"] = jax.random.normal(
        sub, (vocab_size, embedding_dim), jnp.float32)
    bound = 1.0 / jnp.sqrt(hidden_dim)
    for l in range(num_layers):
        in_dim = embedding_dim if l == 0 else hidden_dim
        k, k1, k2, k3, k4 = jax.random.split(k, 5)
        params[f"w_ih_{l}"] = jax.random.uniform(
            k1, (4 * hidden_dim, in_dim), jnp.float32, -bound, bound)
        params[f"w_hh_{l}"] = jax.random.uniform(
            k2, (4 * hidden_dim, hidden_dim), jnp.float32, -bound, bound)
        params[f"b_ih_{l}"] = jax.random.uniform(
            k3, (4 * hidden_dim,), jnp.float32, -bound, bound)
        params[f"b_hh_{l}"] = jax.random.uniform(
            k4, (4 * hidden_dim,), jnp.float32, -bound, bound)
    k, k1, k2 = jax.random.split(k, 3)
    params["w_lin"] = jax.random.uniform(
        k1, (vocab_size, hidden_dim), jnp.float32, -bound, bound)
    params["b_lin"] = jax.random.uniform(
        k2, (vocab_size,), jnp.float32, -bound, bound)
    return params


@functools.partial(jax.jit, static_argnames=("num_layers", "hidden_dim"))
def char_rnn_forward(params, input_ids, num_layers, hidden_dim, hidden=None):
    num_seq, n_step = input_ids.shape
    E = params["embedding"].shape[1]
    V = params["w_lin"].shape[0]
    H = hidden_dim
    Hp = _round_up(max(H, E), 128)     # lane-aligned feature/hidden width
    Vp = _round_up(V, 128)             # lane-dense logits width

    if hidden is None:
        h_0 = jnp.zeros((num_layers, n_step, H), jnp.float32)
        c_0 = jnp.zeros((num_layers, n_step, H), jnp.float32)
    else:
        h_0, c_0 = hidden

    # Embedding lookup (gather) -- plain-JAX glue.
    x = jnp.take(params["embedding"], input_ids, axis=0)     # (S, B, E)
    x_p = jnp.pad(x, ((0, 0), (0, 0), (0, Hp - E)))

    # Pad & stack LSTM weights so every layer has identical (Hp, 4Hp) shape.
    wih_list, whh_list, b_list = [], [], []
    for l in range(num_layers):
        wih_list.append(_pad_gate_weight(params[f"w_ih_{l}"], Hp, H, Hp))
        whh_list.append(_pad_gate_weight(params[f"w_hh_{l}"], Hp, H, Hp))
        b_list.append(_pad_gate_bias(params[f"b_ih_{l}"] + params[f"b_hh_{l}"],
                                     H, Hp))
    wih_s = jnp.stack(wih_list)        # (L, Hp, 4Hp)
    whh_s = jnp.stack(whh_list)        # (L, Hp, 4Hp)
    b_s = jnp.stack(b_list)            # (L, 1, 4Hp)

    h0_p = jnp.pad(h_0, ((0, 0), (0, 0), (0, Hp - H)))
    c0_p = jnp.pad(c_0, ((0, 0), (0, 0), (0, Hp - H)))

    wlin_p = jnp.pad(jnp.transpose(params["w_lin"]),
                     ((0, Hp - H), (0, Vp - V)))              # (Hp, Vp)
    blin_p = jnp.pad(params["b_lin"], (0, Vp - V)).reshape(1, Vp)

    # TODO(synk): nn.LSTM inter-layer dropout is training-time-only; not
    # applied here (eval semantics).
    out_p, hn_p, cn_p = _char_rnn_pallas(
        x_p, wih_s, whh_s, b_s, h0_p, c0_p, wlin_p, blin_p)

    out = out_p[:, :V]                 # (S*B, vocab)
    h_n = hn_p[:, :, :H]               # (L, B, H)
    c_n = cn_p[:, :, :H]
    return out, (h_n, c_n)


# ----------------------------------------------------------------------------
# Pure-JAX reference (for correctness check only)
# ----------------------------------------------------------------------------
def _ref_forward(params, input_ids, num_layers, hidden_dim):
    S, B = input_ids.shape
    H = hidden_dim
    x = jnp.take(params["embedding"], input_ids, axis=0)
    hs, cs = [], []
    for l in range(num_layers):
        w_ih = params[f"w_ih_{l}"]
        w_hh = params[f"w_hh_{l}"]
        b = params[f"b_ih_{l}"] + params[f"b_hh_{l}"]
        h_l = jnp.zeros((B, H), jnp.float32)
        c_l = jnp.zeros((B, H), jnp.float32)
        outs = []
        for t in range(S):
            gates = x[t] @ w_ih.T + h_l @ w_hh.T + b
            i_g = jax.nn.sigmoid(gates[:, 0 * H:1 * H])
            f_g = jax.nn.sigmoid(gates[:, 1 * H:2 * H])
            g_g = jnp.tanh(gates[:, 2 * H:3 * H])
            o_g = jax.nn.sigmoid(gates[:, 3 * H:4 * H])
            c_l = f_g * c_l + i_g * g_g
            h_l = o_g * jnp.tanh(c_l)
            outs.append(h_l)
        x = jnp.stack(outs)
        hs.append(h_l)
        cs.append(c_l)
    out = x.reshape(S * B, H) @ params["w_lin"].T + params["b_lin"]
    return out, (jnp.stack(hs), jnp.stack(cs))


if __name__ == "__main__":
    vocab_size = 32
    embedding_dim = 16
    hidden_dim = 32
    num_layers = 2
    num_seq = 8     # time axis
    n_step = 8      # batch axis (PyTorch module's naming)

    key = jax.random.PRNGKey(0)
    k_params, k_ids = jax.random.split(key)
    params = make_params(k_params, vocab_size, embedding_dim, hidden_dim,
                         num_layers)
    input_ids = jax.random.randint(k_ids, (num_seq, n_step), 0, vocab_size,
                                   dtype=jnp.int32)

    logits, (h_n, c_n) = char_rnn_forward(params, input_ids,
                                          num_layers, hidden_dim)
    jax.block_until_ready((logits, h_n, c_n))

    assert logits.shape == (num_seq * n_step, vocab_size)
    assert h_n.shape == (num_layers, n_step, hidden_dim)
    assert c_n.shape == (num_layers, n_step, hidden_dim)

    # Correctness check against a pure-JAX reference of the same math.
    ref_out, (ref_h, ref_c) = _ref_forward(params, input_ids,
                                           num_layers, hidden_dim)
    assert bool(jnp.allclose(logits, ref_out, atol=1e-3, rtol=1e-3))
    assert bool(jnp.allclose(h_n, ref_h, atol=1e-3, rtol=1e-3))
    assert bool(jnp.allclose(c_n, ref_c, atol=1e-3, rtol=1e-3))

    print("KERNEL_OK")
</pallas_src>

<mosaic_0001>
module attributes {stable_mosaic.version = 11 : i64} {
  func.func @_char_rnn_kernel(%arg0: i32, %arg1: memref<8x8x128xf32, #tpu.memory_space<vmem>>, %arg2: memref<2x128x512xf32, #tpu.memory_space<vmem>>, %arg3: memref<2x128x512xf32, #tpu.memory_space<vmem>>, %arg4: memref<2x1x512xf32, #tpu.memory_space<vmem>>, %arg5: memref<2x8x128xf32, #tpu.memory_space<vmem>>, %arg6: memref<2x8x128xf32, #tpu.memory_space<vmem>>, %arg7: memref<128x128xf32, #tpu.memory_space<vmem>>, %arg8: memref<1x128xf32, #tpu.memory_space<vmem>>, %arg9: memref<64x128xf32, #tpu.memory_space<vmem>>, %arg10: memref<2x8x128xf32, #tpu.memory_space<vmem>>, %arg11: memref<2x8x128xf32, #tpu.memory_space<vmem>>, %arg12: memref<8x8x128xf32, #tpu.memory_space<vmem>>, %arg13: memref<8x8x512xf32, #tpu.memory_space<vmem>>, %arg14: memref<8x128xf32, #tpu.memory_space<vmem>>, %arg15: memref<8x128xf32, #tpu.memory_space<vmem>>) attributes {dimension_semantics = [#tpu.dimension_semantics<arbitrary>], iteration_bounds = array<i64: 1>, scalar_prefetch = 0 : i64, scratch_operands = 4 : i64, tpu.core_type = #tpu.core_type<tc>, window_params = [{pipeline_mode = #tpu.pipeline_mode<synchronous>, transform_indices = @transform_0, window_bounds = array<i64: 8, 8, 128>}, {pipeline_mode = #tpu.pipeline_mode<synchronous>, transform_indices = @transform_1, window_bounds = array<i64: 2, 128, 512>}, {pipeline_mode = #tpu.pipeline_mode<synchronous>, transform_indices = @transform_2, window_bounds = array<i64: 2, 128, 512>}, {pipeline_mode = #tpu.pipeline_mode<synchronous>, transform_indices = @transform_3, window_bounds = array<i64: 2, 1, 512>}, {pipeline_mode = #tpu.pipeline_mode<synchronous>, transform_indices = @transform_4, window_bounds = array<i64: 2, 8, 128>}, {pipeline_mode = #tpu.pipeline_mode<synchronous>, transform_indices = @transform_5, window_bounds = array<i64: 2, 8, 128>}, {pipeline_mode = #tpu.pipeline_mode<synchronous>, transform_indices = @transform_6, window_bounds = array<i64: 128, 128>}, {pipeline_mode = #tpu.pipeline_mode<synchronous>, transform_indices = @transform_7, window_bounds = array<i64: 1, 128>}, {pipeline_mode = #tpu.pipeline_mode<synchronous>, transform_indices = @transform_8, window_bounds = array<i64: 64, 128>}, {pipeline_mode = #tpu.pipeline_mode<synchronous>, transform_indices = @transform_9, window_bounds = array<i64: 2, 8, 128>}, {pipeline_mode = #tpu.pipeline_mode<synchronous>, transform_indices = @transform_10, window_bounds = array<i64: 2, 8, 128>}]} {
    %c0 = arith.constant 0 : index
    %c0_0 = arith.constant 0 : index
    %c0_1 = arith.constant 0 : index
    %0 = vector.load %arg1[%c0, %c0_0, %c0_1] : memref<8x8x128xf32, #tpu.memory_space<vmem>>, vector<8x8x128xf32>
    %c0_2 = arith.constant 0 : index
    %c0_3 = arith.constant 0 : index
    %c0_4 = arith.constant 0 : index
    %1 = vector.load %arg12[%c0_2, %c0_3, %c0_4] : memref<8x8x128xf32, #tpu.memory_space<vmem>>, vector<8x8x128xf32>
    tpu.vector_store %arg12[%c0_2, %c0_3, %c0_4], %0 {strides = array<i32>} : memref<8x8x128xf32, #tpu.memory_space<vmem>>, vector<8x8x128xf32>,
    %c0_5 = arith.constant 0 : index
    %c0_6 = arith.constant 0 : index
    %c0_7 = arith.constant 0 : index
    %2 = vector.load %arg12[%c0_5, %c0_6, %c0_7] : memref<8x8x128xf32, #tpu.memory_space<vmem>>, vector<8x8x128xf32>
    %3 = vector.shape_cast %2 : vector<8x8x128xf32> to vector<64x128xf32>
    %c0_8 = arith.constant 0 : index
    %c0_9 = arith.constant 0 : index
    %c0_10 = arith.constant 0 : index
    %4 = vector.load %arg2[%c0_8, %c0_9, %c0_10] : memref<2x128x512xf32, #tpu.memory_space<vmem>>, vector<1x128x512xf32>
    %5 = vector.shape_cast %4 : vector<1x128x512xf32> to vector<128x512xf32>
    %cst = arith.constant dense<0.000000e+00> : vector<64x512xf32>
    %6 = tpu.matmul %3, %5, %cst {dimension_numbers = #tpu.dot_dimension_numbers<[1], [0], [0], [1], [0, 0, 1, 1], [], []>} : vector<64x128xf32>, vector<128x512xf32>, vector<64x512xf32> -> vector<64x512xf32>
    %c0_11 = arith.constant 0 : index
    %c0_12 = arith.constant 0 : index
    %c0_13 = arith.constant 0 : index
    %7 = vector.load %arg4[%c0_11, %c0_12, %c0_13] : memref<2x1x512xf32, #tpu.memory_space<vmem>>, vector<1x1x512xf32>
    %8 = vector.shape_cast %7 : vector<1x1x512xf32> to vector<1x512xf32>
    %9 = vector.broadcast %8 : vector<1x512xf32> to vector<64x512xf32>
    %10 = arith.addf %6, %9 : vector<64x512xf32>
    %11 = vector.shape_cast %10 : vector<64x512xf32> to vector<8x8x512xf32>
    %c0_14 = arith.constant 0 : index
    %c0_15 = arith.constant 0 : index
    %c0_16 = arith.constant 0 : index
    %12 = vector.load %arg13[%c0_14, %c0_15, %c0_16] : memref<8x8x512xf32, #tpu.memory_space<vmem>>, vector<8x8x512xf32>
    tpu.vector_store %arg13[%c0_14, %c0_15, %c0_16], %11 {strides = array<i32>} : memref<8x8x512xf32, #tpu.memory_space<vmem>>, vector<8x8x512xf32>,
    %c0_17 = arith.constant 0 : index
    %c0_18 = arith.constant 0 : index
    %c0_19 = arith.constant 0 : index
    %13 = vector.load %arg5[%c0_17, %c0_18, %c0_19] : memref<2x8x128xf32, #tpu.memory_space<vmem>>, vector<1x8x128xf32>
    %14 = vector.shape_cast %13 : vector<1x8x128xf32> to vector<8x128xf32>
    %c0_20 = arith.constant 0 : index
    %c0_21 = arith.constant 0 : index
    %15 = vector.load %arg14[%c0_20, %c0_21] : memref<8x128xf32, #tpu.memory_space<vmem>>, vector<8x128xf32>
    tpu.vector_store %arg14[%c0_20, %c0_21], %14 {strides = array<i32>} : memref<8x128xf32, #tpu.memory_space<vmem>>, vector<8x128xf32>,
    %c0_22 = arith.constant 0 : index
    %c0_23 = arith.constant 0 : index
    %c0_24 = arith.constant 0 : index
    %16 = vector.load %arg6[%c0_22, %c0_23, %c0_24] : memref<2x8x128xf32, #tpu.memory_space<vmem>>, vector<1x8x128xf32>
    %17 = vector.shape_cast %16 : vector<1x8x128xf32> to vector<8x128xf32>
    %c0_25 = arith.constant 0 : index
    %c0_26 = arith.constant 0 : index
    %18 = vector.load %arg15[%c0_25, %c0_26] : memref<8x128xf32, #tpu.memory_space<vmem>>, vector<8x128xf32>
    tpu.vector_store %arg15[%c0_25, %c0_26], %17 {strides = array<i32>} : memref<8x128xf32, #tpu.memory_space<vmem>>, vector<8x128xf32>,
    %c0_i32 = arith.constant 0 : i32
    %c0_27 = arith.constant 0 : index
    %c0_28 = arith.constant 0 : index
    %19 = vector.load %arg14[%c0_27, %c0_28] : memref<8x128xf32, #tpu.memory_space<vmem>>, vector<8x128xf32>
    %c0_29 = arith.constant 0 : index
    %c0_30 = arith.constant 0 : index
    %20 = vector.load %arg15[%c0_29, %c0_30] : memref<8x128xf32, #tpu.memory_space<vmem>>, vector<8x128xf32>
    %21 = arith.index_cast %c0_i32 : i32 to index
    %c0_31 = arith.constant 0 : index
    %c0_32 = arith.constant 0 : index
    %22 = vector.load %arg13[%21, %c0_31, %c0_32] : memref<8x8x512xf32, #tpu.memory_space<vmem>>, vector<1x8x512xf32>
    %23 = vector.shape_cast %22 : vector<1x8x512xf32> to vector<8x512xf32>
    %c0_33 = arith.constant 0 : index
    %c0_34 = arith.constant 0 : index
    %c0_35 = arith.constant 0 : index
    %24 = vector.load %arg3[%c0_33, %c0_34, %c0_35] : memref<2x128x512xf32, #tpu.memory_space<vmem>>, vector<1x128x512xf32>
    %25 = vector.shape_cast %24 : vector<1x128x512xf32> to vector<128x512xf32>
    %cst_36 = arith.constant dense<0.000000e+00> : vector<8x512xf32>
    %26 = tpu.matmul %19, %25, %cst_36 {dimension_numbers = #tpu.dot_dimension_numbers<[1], [0], [0], [1], [0, 0, 1, 1], [], []>} : vector<8x128xf32>, vector<128x512xf32>, vector<8x512xf32> -> vector<8x512xf32>
    %27 = arith.addf %23, %26 : vector<8x512xf32>
    %28 = vector.extract_strided_slice %27 {offsets = [0, 0], sizes = [8, 128], strides = [1, 1]} : vector<8x512xf32> to vector<8x128xf32>
    %29 = arith.negf %28 : vector<8x128xf32>
    %30 = math.exp %29 : vector<8x128xf32>
    %cst_37 = arith.constant 1.000000e+00 : f32
    %31 = vector.broadcast %cst_37 : f32 to vector<8x128xf32>
    %32 = arith.addf %31, %30 : vector<8x128xf32>
    %33 = arith.divf %31, %32 : vector<8x128xf32>
    %34 = vector.extract_strided_slice %27 {offsets = [0, 128], sizes = [8, 128], strides = [1, 1]} : vector<8x512xf32> to vector<8x128xf32>
    %35 = arith.negf %34 : vector<8x128xf32>
    %36 = math.exp %35 : vector<8x128xf32>
    %cst_38 = arith.constant 1.000000e+00 : f32
    %37 = vector.broadcast %cst_38 : f32 to vector<8x128xf32>
    %38 = arith.addf %37, %36 : vector<8x128xf32>
    %39 = arith.divf %37, %38 : vector<8x128xf32>
    %40 = vector.extract_strided_slice %27 {offsets = [0, 256], sizes = [8, 128], strides = [1, 1]} : vector<8x512xf32> to vector<8x128xf32>
    %41 = math.tanh %40 : vector<8x128xf32>
    %42 = vector.extract_strided_slice %27 {offsets = [0, 384], sizes = [8, 128], strides = [1, 1]} : vector<8x512xf32> to vector<8x128xf32>
    %43 = arith.negf %42 : vector<8x128xf32>
    %44 = math.exp %43 : vector<8x128xf32>
    %cst_39 = arith.constant 1.000000e+00 : f32
    %45 = vector.broadcast %cst_39 : f32 to vector<8x128xf32>
    %46 = arith.addf %45, %44 : vector<8x128xf32>
    %47 = arith.divf %45, %46 : vector<8x128xf32>
    %48 = arith.mulf %39, %20 : vector<8x128xf32>
    %49 = arith.mulf %33, %41 : vector<8x128xf32>
    %50 = arith.addf %48, %49 : vector<8x128xf32>
    %51 = math.tanh %50 : vector<8x128xf32>
    %52 = arith.mulf %47, %51 : vector<8x128xf32>
    %c0_40 = arith.constant 0 : index
    %c0_41 = arith.constant 0 : index
    %53 = vector.load %arg14[%c0_40, %c0_41] : memref<8x128xf32, #tpu.memory_space<vmem>>, vector<8x128xf32>
    tpu.vector_store %arg14[%c0_40, %c0_41], %52 {strides = array<i32>} : memref<8x128xf32, #tpu.memory_space<vmem>>, vector<8x128xf32>,
    %c0_42 = arith.constant 0 : index
    %c0_43 = arith.constant 0 : index
    %54 = vector.load %arg15[%c0_42, %c0_43] : memref<8x128xf32, #tpu.memory_space<vmem>>, vector<8x128xf32>
    tpu.vector_store %arg15[%c0_42, %c0_43], %50 {strides = array<i32>} : memref<8x128xf32, #tpu.memory_space<vmem>>, vector<8x128xf32>,
    %55 = arith.index_cast %c0_i32 : i32 to index
    %c0_44 = arith.constant 0 : index
    %c0_45 = arith.constant 0 : index
    %56 = vector.load %arg12[%55, %c0_44, %c0_45] : memref<8x8x128xf32, #tpu.memory_space<vmem>>, vector<1x8x128xf32>
    %57 = vector.shape_cast %56 : vector<1x8x128xf32> to vector<8x128xf32>
    %58 = vector.shape_cast %52 : vector<8x128xf32> to vector<1x8x128xf32>
    tpu.vector_store %arg12[%55, %c0_44, %c0_45], %58 {strides = array<i32>} : memref<8x8x128xf32, #tpu.memory_space<vmem>>, vector<1x8x128xf32>,
    %c1_i32 = arith.constant 1 : i32
    %c0_46 = arith.constant 0 : index
    %c0_47 = arith.constant 0 : index
    %59 = vector.load %arg14[%c0_46, %c0_47] : memref<8x128xf32, #tpu.memory_space<vmem>>, vector<8x128xf32>
    %c0_48 = arith.constant 0 : index
    %c0_49 = arith.constant 0 : index
    %60 = vector.load %arg15[%c0_48, %c0_49] : memref<8x128xf32, #tpu.memory_space<vmem>>, vector<8x128xf32>
    %61 = arith.index_cast %c1_i32 : i32 to index
    %c0_50 = arith.constant 0 : index
    %c0_51 = arith.constant 0 : index
    %62 = vector.load %arg13[%61, %c0_50, %c0_51] : memref<8x8x512xf32, #tpu.memory_space<vmem>>, vector<1x8x512xf32>
    %63 = vector.shape_cast %62 : vector<1x8x512xf32> to vector<8x512xf32>
    %c0_52 = arith.constant 0 : index
    %c0_53 = arith.constant 0 : index
    %c0_54 = arith.constant 0 : index
    %64 = vector.load %arg3[%c0_52, %c0_53, %c0_54] : memref<2x128x512xf32, #tpu.memory_space<vmem>>, vector<1x128x512xf32>
    %65 = vector.shape_cast %64 : vector<1x128x512xf32> to vector<128x512xf32>
    %cst_55 = arith.constant dense<0.000000e+00> : vector<8x512xf32>
    %66 = tpu.matmul %59, %65, %cst_55 {dimension_numbers = #tpu.dot_dimension_numbers<[1], [0], [0], [1], [0, 0, 1, 1], [], []>} : vector<8x128xf32>, vector<128x512xf32>, vector<8x512xf32> -> vector<8x512xf32>
    %67 = arith.addf %63, %66 : vector<8x512xf32>
    %68 = vector.extract_strided_slice %67 {offsets = [0, 0], sizes = [8, 128], strides = [1, 1]} : vector<8x512xf32> to vector<8x128xf32>
    %69 = arith.negf %68 : vector<8x128xf32>
    %70 = math.exp %69 : vector<8x128xf32>
    %cst_56 = arith.constant 1.000000e+00 : f32
    %71 = vector.broadcast %cst_56 : f32 to vector<8x128xf32>
    %72 = arith.addf %71, %70 : vector<8x128xf32>
    %73 = arith.divf %71, %72 : vector<8x128xf32>
    %74 = vector.extract_strided_slice %67 {offsets = [0, 128], sizes = [8, 128], strides = [1, 1]} : vector<8x512xf32> to vector<8x128xf32>
    %75 = arith.negf %74 : vector<8x128xf32>
    %76 = math.exp %75 : vector<8x128xf32>
    %cst_57 = arith.constant 1.000000e+00 : f32
    %77 = vector.broadcast %cst_57 : f32 to vector<8x128xf32>
    %78 = arith.addf %77, %76 : vector<8x128xf32>
    %79 = arith.divf %77, %78 : vector<8x128xf32>
    %80 = vector.extract_strided_slice %67 {offsets = [0, 256], sizes = [8, 128], strides = [1, 1]} : vector<8x512xf32> to vector<8x128xf32>
    %81 = math.tanh %80 : vector<8x128xf32>
    %82 = vector.extract_strided_slice %67 {offsets = [0, 384], sizes = [8, 128], strides = [1, 1]} : vector<8x512xf32> to vector<8x128xf32>
    %83 = arith.negf %82 : vector<8x128xf32>
    %84 = math.exp %83 : vector<8x128xf32>
    %cst_58 = arith.constant 1.000000e+00 : f32
    %85 = vector.broadcast %cst_58 : f32 to vector<8x128xf32>
    %86 = arith.addf %85, %84 : vector<8x128xf32>
    %87 = arith.divf %85, %86 : vector<8x128xf32>
    %88 = arith.mulf %79, %60 : vector<8x128xf32>
    %89 = arith.mulf %73, %81 : vector<8x128xf32>
    %90 = arith.addf %88, %89 : vector<8x128xf32>
    %91 = math.tanh %90 : vector<8x128xf32>
    %92 = arith.mulf %87, %91 : vector<8x128xf32>
    %c0_59 = arith.constant 0 : index
    %c0_60 = arith.constant 0 : index
    %93 = vector.load %arg14[%c0_59, %c0_60] : memref<8x128xf32, #tpu.memory_space<vmem>>, vector<8x128xf32>
    tpu.vector_store %arg14[%c0_59, %c0_60], %92 {strides = array<i32>} : memref<8x128xf32, #tpu.memory_space<vmem>>, vector<8x128xf32>,
    %c0_61 = arith.constant 0 : index
    %c0_62 = arith.constant 0 : index
    %94 = vector.load %arg15[%c0_61, %c0_62] : memref<8x128xf32, #tpu.memory_space<vmem>>, vector<8x128xf32>
    tpu.vector_store %arg15[%c0_61, %c0_62], %90 {strides = array<i32>} : memref<8x128xf32, #tpu.memory_space<vmem>>, vector<8x128xf32>,
    %95 = arith.index_cast %c1_i32 : i32 to index
    %c0_63 = arith.constant 0 : index
    %c0_64 = arith.constant 0 : index
    %96 = vector.load %arg12[%95, %c0_63, %c0_64] : memref<8x8x128xf32, #tpu.memory_space<vmem>>, vector<1x8x128xf32>
    %97 = vector.shape_cast %96 : vector<1x8x128xf32> to vector<8x128xf32>
    %98 = vector.shape_cast %92 : vector<8x128xf32> to vector<1x8x128xf32>
    tpu.vector_store %arg12[%95, %c0_63, %c0_64], %98 {strides = array<i32>} : memref<8x8x128xf32, #tpu.memory_space<vmem>>, vector<1x8x128xf32>,
    %c2_i32 = arith.constant 2 : i32
    %c0_65 = arith.constant 0 : index
    %c0_66 = arith.constant 0 : index
    %99 = vector.load %arg14[%c0_65, %c0_66] : memref<8x128xf32, #tpu.memory_space<vmem>>, vector<8x128xf32>
    %c0_67 = arith.constant 0 : index
    %c0_68 = arith.constant 0 : index
    %100 = vector.load %arg15[%c0_67, %c0_68] : memref<8x128xf32, #tpu.memory_space<vmem>>, vector<8x128xf32>
    %101 = arith.index_cast %c2_i32 : i32 to index
    %c0_69 = arith.constant 0 : index
    %c0_70 = arith.constant 0 : index
    %102 = vector.load %arg13[%101, %c0_69, %c0_70] : memref<8x8x512xf32, #tpu.memory_space<vmem>>, vector<1x8x512xf32>
    %103 = vector.shape_cast %102 : vector<1x8x512xf32> to vector<8x512xf32>
    %c0_71 = arith.constant 0 : index
    %c0_72 = arith.constant 0 : index
    %c0_73 = arith.constant 0 : index
    %104 = vector.load %arg3[%c0_71, %c0_72, %c0_73] : memref<2x128x512xf32, #tpu.memory_space<vmem>>, vector<1x128x512xf32>
    %105 = vector.shape_cast %104 : vector<1x128x512xf32> to vector<128x512xf32>
    %cst_74 = arith.constant dense<0.000000e+00> : vector<8x512xf32>
    %106 = tpu.matmul %99, %105, %cst_74 {dimension_numbers = #tpu.dot_dimension_numbers<[1], [0], [0], [1], [0, 0, 1, 1], [], []>} : vector<8x128xf32>, vector<128x512xf32>, vector<8x512xf32> -> vector<8x512xf32>
    %107 = arith.addf %103, %106 : vector<8x512xf32>
    %108 = vector.extract_strided_slice %107 {offsets = [0, 0], sizes = [8, 128], strides = [1, 1]} : vector<8x512xf32> to vector<8x128xf32>
    %109 = arith.negf %108 : vector<8x128xf32>
    %110 = math.exp %109 : vector<8x128xf32>
    %cst_75 = arith.constant 1.000000e+00 : f32
    %111 = vector.broadcast %cst_75 : f32 to vector<8x128xf32>
    %112 = arith.addf %111, %110 : vector<8x128xf32>
    %113 = arith.divf %111, %112 : vector<8x128xf32>
    %114 = vector.extract_strided_slice %107 {offsets = [0, 128], sizes = [8, 128], strides = [1, 1]} : vector<8x512xf32> to vector<8x128xf32>
    %115 = arith.negf %114 : vector<8x128xf32>
    %116 = math.exp %115 : vector<8x128xf32>
    %cst_76 = arith.constant 1.000000e+00 : f32
    %117 = vector.broadcast %cst_76 : f32 to vector<8x128xf32>
    %118 = arith.addf %117, %116 : vector<8x128xf32>
    %119 = arith.divf %117, %118 : vector<8x128xf32>
    %120 = vector.extract_strided_slice %107 {offsets = [0, 256], sizes = [8, 128], strides = [1, 1]} : vector<8x512xf32> to vector<8x128xf32>
    %121 = math.tanh %120 : vector<8x128xf32>
    %122 = vector.extract_strided_slice %107 {offsets = [0, 384], sizes = [8, 128], strides = [1, 1]} : vector<8x512xf32> to vector<8x128xf32>
    %123 = arith.negf %122 : vector<8x128xf32>
    %124 = math.exp %123 : vector<8x128xf32>
    %cst_77 = arith.constant 1.000000e+00 : f32
    %125 = vector.broadcast %cst_77 : f32 to vector<8x128xf32>
    %126 = arith.addf %125, %124 : vector<8x128xf32>
    %127 = arith.divf %125, %126 : vector<8x128xf32>
    %128 = arith.mulf %119, %100 : vector<8x128xf32>
    %129 = arith.mulf %113, %121 : vector<8x128xf32>
    %130 = arith.addf %128, %129 : vector<8x128xf32>
    %131 = math.tanh %130 : vector<8x128xf32>
    %132 = arith.mulf %127, %131 : vector<8x128xf32>
    %c0_78 = arith.constant 0 : index
    %c0_79 = arith.constant 0 : index
    %133 = vector.load %arg14[%c0_78, %c0_79] : memref<8x128xf32, #tpu.memory_space<vmem>>, vector<8x128xf32>
    tpu.vector_store %arg14[%c0_78, %c0_79], %132 {strides = array<i32>} : memref<8x128xf32, #tpu.memory_space<vmem>>, vector<8x128xf32>,
    %c0_80 = arith.constant 0 : index
    %c0_81 = arith.constant 0 : index
    %134 = vector.load %arg15[%c0_80, %c0_81] : memref<8x128xf32, #tpu.memory_space<vmem>>, vector<8x128xf32>
    tpu.vector_store %arg15[%c0_80, %c0_81], %130 {strides = array<i32>} : memref<8x128xf32, #tpu.memory_space<vmem>>, vector<8x128xf32>,
    %135 = arith.index_cast %c2_i32 : i32 to index
    %c0_82 = arith.constant 0 : index
    %c0_83 = arith.constant 0 : index
    %136 = vector.load %arg12[%135, %c0_82, %c0_83] : memref<8x8x128xf32, #tpu.memory_space<vmem>>, vector<1x8x128xf32>
    %137 = vector.shape_cast %136 : vector<1x8x128xf32> to vector<8x128xf32>
    %138 = vector.shape_cast %132 : vector<8x128xf32> to vector<1x8x128xf32>
    tpu.vector_store %arg12[%135, %c0_82, %c0_83], %138 {strides = array<i32>} : memref<8x8x128xf32, #tpu.memory_space<vmem>>, vector<1x8x128xf32>,
    %c3_i32 = arith.constant 3 : i32
    %c0_84 = arith.constant 0 : index
    %c0_85 = arith.constant 0 : index
    %139 = vector.load %arg14[%c0_84, %c0_85] : memref<8x128xf32, #tpu.memory_space<vmem>>, vector<8x128xf32>
    %c0_86 = arith.constant 0 : index
    %c0_87 = arith.constant 0 : index
    %140 = vector.load %arg15[%c0_86, %c0_87] : memref<8x128xf32, #tpu.memory_space<vmem>>, vector<8x128xf32>
    %141 = arith.index_cast %c3_i32 : i32 to index
    %c0_88 = arith.constant 0 : index
    %c0_89 = arith.constant 0 : index
    %142 = vector.load %arg13[%141, %c0_88, %c0_89] : memref<8x8x512xf32, #tpu.memory_space<vmem>>, vector<1x8x512xf32>
    %143 = vector.shape_cast %142 : vector<1x8x512xf32> to vector<8x512xf32>
    %c0_90 = arith.constant 0 : index
    %c0_91 = arith.constant 0 : index
    %c0_92 = arith.constant 0 : index
    %144 = vector.load %arg3[%c0_90, %c0_91, %c0_92] : memref<2x128x512xf32, #tpu.memory_space<vmem>>, vector<1x128x512xf32>
    %145 = vector.shape_cast %144 : vector<1x128x512xf32> to vector<128x512xf32>
    %cst_93 = arith.constant dense<0.000000e+00> : vector<8x512xf32>
    %146 = tpu.matmul %139, %145, %cst_93 {dimension_numbers = #tpu.dot_dimension_numbers<[1], [0], [0], [1], [0, 0, 1, 1], [], []>} : vector<8x128xf32>, vector<128x512xf32>, vector<8x512xf32> -> vector<8x512xf32>
    %147 = arith.addf %143, %146 : vector<8x512xf32>
    %148 = vector.extract_strided_slice %147 {offsets = [0, 0], sizes = [8, 128], strides = [1, 1]} : vector<8x512xf32> to vector<8x128xf32>
    %149 = arith.negf %148 : vector<8x128xf32>
    %150 = math.exp %149 : vector<8x128xf32>
    %cst_94 = arith.constant 1.000000e+00 : f32
    %151 = vector.broadcast %cst_94 : f32 to vector<8x128xf32>
    %152 = arith.addf %151, %150 : vector<8x128xf32>
    %153 = arith.divf %151, %152 : vector<8x128xf32>
    %154 = vector.extract_strided_slice %147 {offsets = [0, 128], sizes = [8, 128], strides = [1, 1]} : vector<8x512xf32> to vector<8x128xf32>
    %155 = arith.negf %154 : vector<8x128xf32>
    %156 = math.exp %155 : vector<8x128xf32>
    %cst_95 = arith.constant 1.000000e+00 : f32
    %157 = vector.broadcast %cst_95 : f32 to vector<8x128xf32>
    %158 = arith.addf %157, %156 : vector<8x128xf32>
    %159 = arith.divf %157, %158 : vector<8x128xf32>
    %160 = vector.extract_strided_slice %147 {offsets = [0, 256], sizes = [8, 128], strides = [1, 1]} : vector<8x512xf32> to vector<8x128xf32>
    %161 = math.tanh %160 : vector<8x128xf32>
    %162 = vector.extract_strided_slice %147 {offsets = [0, 384], sizes = [8, 128], strides = [1, 1]} : vector<8x512xf32> to vector<8x128xf32>
    %163 = arith.negf %162 : vector<8x128xf32>
    %164 = math.exp %163 : vector<8x128xf32>
    %cst_96 = arith.constant 1.000000e+00 : f32
    %165 = vector.broadcast %cst_96 : f32 to vector<8x128xf32>
    %166 = arith.addf %165, %164 : vector<8x128xf32>
    %167 = arith.divf %165, %166 : vector<8x128xf32>
    %168 = arith.mulf %159, %140 : vector<8x128xf32>
    %169 = arith.mulf %153, %161 : vector<8x128xf32>
    %170 = arith.addf %168, %169 : vector<8x128xf32>
    %171 = math.tanh %170 : vector<8x128xf32>
    %172 = arith.mulf %167, %171 : vector<8x128xf32>
    %c0_97 = arith.constant 0 : index
    %c0_98 = arith.constant 0 : index
    %173 = vector.load %arg14[%c0_97, %c0_98] : memref<8x128xf32, #tpu.memory_space<vmem>>, vector<8x128xf32>
    tpu.vector_store %arg14[%c0_97, %c0_98], %172 {strides = array<i32>} : memref<8x128xf32, #tpu.memory_space<vmem>>, vector<8x128xf32>,
    %c0_99 = arith.constant 0 : index
    %c0_100 = arith.constant 0 : index
    %174 = vector.load %arg15[%c0_99, %c0_100] : memref<8x128xf32, #tpu.memory_space<vmem>>, vector<8x128xf32>
    tpu.vector_store %arg15[%c0_99, %c0_100], %170 {strides = array<i32>} : memref<8x128xf32, #tpu.memory_space<vmem>>, vector<8x128xf32>,
    %175 = arith.index_cast %c3_i32 : i32 to index
    %c0_101 = arith.constant 0 : index
    %c0_102 = arith.constant 0 : index
    %176 = vector.load %arg12[%175, %c0_101, %c0_102] : memref<8x8x128xf32, #tpu.memory_space<vmem>>, vector<1x8x128xf32>
    %177 = vector.shape_cast %176 : vector<1x8x128xf32> to vector<8x128xf32>
    %178 = vector.shape_cast %172 : vector<8x128xf32> to vector<1x8x128xf32>
    tpu.vector_store %arg12[%175, %c0_101, %c0_102], %178 {strides = array<i32>} : memref<8x8x128xf32, #tpu.memory_space<vmem>>, vector<1x8x128xf32>,
    %c4_i32 = arith.constant 4 : i32
    %c0_103 = arith.constant 0 : index
    %c0_104 = arith.constant 0 : index
    %179 = vector.load %arg14[%c0_103, %c0_104] : memref<8x128xf32, #tpu.memory_space<vmem>>, vector<8x128xf32>
    %c0_105 = arith.constant 0 : index
    %c0_106 = arith.constant 0 : index
    %180 = vector.load %arg15[%c0_105, %c0_106] : memref<8x128xf32, #tpu.memory_space<vmem>>, vector<8x128xf32>
    %181 = arith.index_cast %c4_i32 : i32 to index
    %c0_107 = arith.constant 0 : index
    %c0_108 = arith.constant 0 : index
    %182 = vector.load %arg13[%181, %c0_107, %c0_108] : memref<8x8x512xf32, #tpu.memory_space<vmem>>, vector<1x8x512xf32>
    %183 = vector.shape_cast %182 : vector<1x8x512xf32> to vector<8x512xf32>
    %c0_109 = arith.constant 0 : index
    %c0_110 = arith.constant 0 : index
    %c0_111 = arith.constant 0 : index
    %184 = vector.load %arg3[%c0_109, %c0_110, %c0_111] : memref<2x128x512xf32, #tpu.memory_space<vmem>>, vector<1x128x512xf32>
    %185 = vector.shape_cast %184 : vector<1x128x512xf32> to vector<128x512xf32>
    %cst_112 = arith.constant dense<0.000000e+00> : vector<8x512xf32>
    %186 = tpu.matmul %179, %185, %cst_112 {dimension_numbers = #tpu.dot_dimension_numbers<[1], [0], [0], [1], [0, 0, 1, 1], [], []>} : vector<8x128xf32>, vector<128x512xf32>, vector<8x512xf32> -> vector<8x512xf32>
    %187 = arith.addf %183, %186 : vector<8x512xf32>
    %188 = vector.extract_strided_slice %187 {offsets = [0, 0], sizes = [8, 128], strides = [1, 1]} : vector<8x512xf32> to vector<8x128xf32>
    %189 = arith.negf %188 : vector<8x128xf32>
    %190 = math.exp %189 : vector<8x128xf32>
    %cst_113 = arith.constant 1.000000e+00 : f32
    %191 = vector.broadcast %cst_113 : f32 to vector<8x128xf32>
    %192 = arith.addf %191, %190 : vector<8x128xf32>
    %193 = arith.divf %191, %192 : vector<8x128xf32>
    %194 = vector.extract_strided_slice %187 {offsets = [0, 128], sizes = [8, 128], strides = [1, 1]} : vector<8x512xf32> to vector<8x128xf32>
    %195 = arith.negf %194 : vector<8x128xf32>
    %196 = math.exp %195 : vector<8x128xf32>
    %cst_114 = arith.constant 1.000000e+00 : f32
    %197 = vector.broadcast %cst_114 : f32 to vector<8x128xf32>
    %198 = arith.addf %197, %196 : vector<8x128xf32>
    %199 = arith.divf %197, %198 : vector<8x128xf32>
    %200 = vector.extract_strided_slice %187 {offsets = [0, 256], sizes = [8, 128], strides = [1, 1]} : vector<8x512xf32> to vector<8x128xf32>
    %201 = math.tanh %200 : vector<8x128xf32>
    %202 = vector.extract_strided_slice %187 {offsets = [0, 384], sizes = [8, 128], strides = [1, 1]} : vector<8x512xf32> to vector<8x128xf32>
    %203 = arith.negf %202 : vector<8x128xf32>
    %204 = math.exp %203 : vector<8x128xf32>
    %cst_115 = arith.constant 1.000000e+00 : f32
    %205 = vector.broadcast %cst_115 : f32 to vector<8x128xf32>
    %206 = arith.addf %205, %204 : vector<8x128xf32>
    %207 = arith.divf %205, %206 : vector<8x128xf32>
    %208 = arith.mulf %199, %180 : vector<8x128xf32>
    %209 = arith.mulf %193, %201 : vector<8x128xf32>
    %210 = arith.addf %208, %209 : vector<8x128xf32>
    %211 = math.tanh %210 : vector<8x128xf32>
    %212 = arith.mulf %207, %211 : vector<8x128xf32>
    %c0_116 = arith.constant 0 : index
    %c0_117 = arith.constant 0 : index
    %213 = vector.load %arg14[%c0_116, %c0_117] : memref<8x128xf32, #tpu.memory_space<vmem>>, vector<8x128xf32>
    tpu.vector_store %arg14[%c0_116, %c0_117], %212 {strides = array<i32>} : memref<8x128xf32, #tpu.memory_space<vmem>>, vector<8x128xf32>,
    %c0_118 = arith.constant 0 : index
    %c0_119 = arith.constant 0 : index
    %214 = vector.load %arg15[%c0_118, %c0_119] : memref<8x128xf32, #tpu.memory_space<vmem>>, vector<8x128xf32>
    tpu.vector_store %arg15[%c0_118, %c0_119], %210 {strides = array<i32>} : memref<8x128xf32, #tpu.memory_space<vmem>>, vector<8x128xf32>,
    %215 = arith.index_cast %c4_i32 : i32 to index
    %c0_120 = arith.constant 0 : index
    %c0_121 = arith.constant 0 : index
    %216 = vector.load %arg12[%215, %c0_120, %c0_121] : memref<8x8x128xf32, #tpu.memory_space<vmem>>, vector<1x8x128xf32>
    %217 = vector.shape_cast %216 : vector<1x8x128xf32> to vector<8x128xf32>
    %218 = vector.shape_cast %212 : vector<8x128xf32> to vector<1x8x128xf32>
    tpu.vector_store %arg12[%215, %c0_120, %c0_121], %218 {strides = array<i32>} : memref<8x8x128xf32, #tpu.memory_space<vmem>>, vector<1x8x128xf32>,
    %c5_i32 = arith.constant 5 : i32
    %c0_122 = arith.constant 0 : index
    %c0_123 = arith.constant 0 : index
    %219 = vector.load %arg14[%c0_122, %c0_123] : memref<8x128xf32, #tpu.memory_space<vmem>>, vector<8x128xf32>
    %c0_124 = arith.constant 0 : index
    %c0_125 = arith.constant 0 : index
    %220 = vector.load %arg15[%c0_124, %c0_125] : memref<8x128xf32, #tpu.memory_space<vmem>>, vector<8x128xf32>
    %221 = arith.index_cast %c5_i32 : i32 to index
    %c0_126 = arith.constant 0 : index
    %c0_127 = arith.constant 0 : index
    %222 = vector.load %arg13[%221, %c0_126, %c0_127] : memref<8x8x512xf32, #tpu.memory_space<vmem>>, vector<1x8x512xf32>
    %223 = vector.shape_cast %222 : vector<1x8x512xf32> to vector<8x512xf32>
    %c0_128 = arith.constant 0 : index
    %c0_129 = arith.constant 0 : index
    %c0_130 = arith.constant 0 : index
    %224 = vector.load %arg3[%c0_128, %c0_129, %c0_130] : memref<2x128x512xf32, #tpu.memory_space<vmem>>, vector<1x128x512xf32>
    %225 = vector.shape_cast %224 : vector<1x128x512xf32> to vector<128x512xf32>
    %cst_131 = arith.constant dense<0.000000e+00> : vector<8x512xf32>
    %226 = tpu.matmul %219, %225, %cst_131 {dimension_numbers = #tpu.dot_dimension_numbers<[1], [0], [0], [1], [0, 0, 1, 1], [], []>} : vector<8x128xf32>, vector<128x512xf32>, vector<8x512xf32> -> vector<8x512xf32>
    %227 = arith.addf %223, %226 : vector<8x512xf32>
    %228 = vector.extract_strided_slice %227 {offsets = [0, 0], sizes = [8, 128], strides = [1, 1]} : vector<8x512xf32> to vector<8x128xf32>
    %229 = arith.negf %228 : vector<8x128xf32>
    %230 = math.exp %229 : vector<8x128xf32>
    %cst_132 = arith.constant 1.000000e+00 : f32
    %231 = vector.broadcast %cst_132 : f32 to vector<8x128xf32>
    %232 = arith.addf %231, %230 : vector<8x128xf32>
    %233 = arith.divf %231, %232 : vector<8x128xf32>
    %234 = vector.extract_strided_slice %227 {offsets = [0, 128], sizes = [8, 128], strides = [1, 1]} : vector<8x512xf32> to vector<8x128xf32>
    %235 = arith.negf %234 : vector<8x128xf32>
    %236 = math.exp %235 : vector<8x128xf32>
    %cst_133 = arith.constant 1.000000e+00 : f32
    %237 = vector.broadcast %cst_133 : f32 to vector<8x128xf32>
    %238 = arith.addf %237, %236 : vector<8x128xf32>
    %239 = arith.divf %237, %238 : vector<8x128xf32>
    %240 = vector.extract_strided_slice %227 {offsets = [0, 256], sizes = [8, 128], strides = [1, 1]} : vector<8x512xf32> to vector<8x128xf32>
    %241 = math.tanh %240 : vector<8x128xf32>
    %242 = vector.extract_strided_slice %227 {offsets = [0, 384], sizes = [8, 128], strides = [1, 1]} : vector<8x512xf32> to vector<8x128xf32>
    %243 = arith.negf %242 : vector<8x128xf32>
    %244 = math.exp %243 : vector<8x128xf32>
    %cst_134 = arith.constant 1.000000e+00 : f32
    %245 = vector.broadcast %cst_134 : f32 to vector<8x128xf32>
    %246 = arith.addf %245, %244 : vector<8x128xf32>
    %247 = arith.divf %245, %246 : vector<8x128xf32>
    %248 = arith.mulf %239, %220 : vector<8x128xf32>
    %249 = arith.mulf %233, %241 : vector<8x128xf32>
    %250 = arith.addf %248, %249 : vector<8x128xf32>
    %251 = math.tanh %250 : vector<8x128xf32>
    %252 = arith.mulf %247, %251 : vector<8x128xf32>
    %c0_135 = arith.constant 0 : index
    %c0_136 = arith.constant 0 : index
    %253 = vector.load %arg14[%c0_135, %c0_136] : memref<8x128xf32, #tpu.memory_space<vmem>>, vector<8x128xf32>
    tpu.vector_store %arg14[%c0_135, %c0_136], %252 {strides = array<i32>} : memref<8x128xf32, #tpu.memory_space<vmem>>, vector<8x128xf32>,
    %c0_137 = arith.constant 0 : index
    %c0_138 = arith.constant 0 : index
    %254 = vector.load %arg15[%c0_137, %c0_138] : memref<8x128xf32, #tpu.memory_space<vmem>>, vector<8x128xf32>
    tpu.vector_store %arg15[%c0_137, %c0_138], %250 {strides = array<i32>} : memref<8x128xf32, #tpu.memory_space<vmem>>, vector<8x128xf32>,
    %255 = arith.index_cast %c5_i32 : i32 to index
    %c0_139 = arith.constant 0 : index
    %c0_140 = arith.constant 0 : index
    %256 = vector.load %arg12[%255, %c0_139, %c0_140] : memref<8x8x128xf32, #tpu.memory_space<vmem>>, vector<1x8x128xf32>
    %257 = vector.shape_cast %256 : vector<1x8x128xf32> to vector<8x128xf32>
    %258 = vector.shape_cast %252 : vector<8x128xf32> to vector<1x8x128xf32>
    tpu.vector_store %arg12[%255, %c0_139, %c0_140], %258 {strides = array<i32>} : memref<8x8x128xf32, #tpu.memory_space<vmem>>, vector<1x8x128xf32>,
    %c6_i32 = arith.constant 6 : i32
    %c0_141 = arith.constant 0 : index
    %c0_142 = arith.constant 0 : index
    %259 = vector.load %arg14[%c0_141, %c0_142] : memref<8x128xf32, #tpu.memory_space<vmem>>, vector<8x128xf32>
    %c0_143 = arith.constant 0 : index
    %c0_144 = arith.constant 0 : index
    %260 = vector.load %arg15[%c0_143, %c0_144] : memref<8x128xf32, #tpu.memory_space<vmem>>, vector<8x128xf32>
    %261 = arith.index_cast %c6_i32 : i32 to index
    %c0_145 = arith.constant 0 : index
    %c0_146 = arith.constant 0 : index
    %262 = vector.load %arg13[%261, %c0_145, %c0_146] : memref<8x8x512xf32, #tpu.memory_space<vmem>>, vector<1x8x512xf32>
    %263 = vector.shape_cast %262 : vector<1x8x512xf32> to vector<8x512xf32>
    %c0_147 = arith.constant 0 : index
    %c0_148 = arith.constant 0 : index
    %c0_149 = arith.constant 0 : index
    %264 = vector.load %arg3[%c0_147, %c0_148, %c0_149] : memref<2x128x512xf32, #tpu.memory_space<vmem>>, vector<1x128x512xf32>
    %265 = vector.shape_cast %264 : vector<1x128x512xf32> to vector<128x512xf32>
    %cst_150 = arith.constant dense<0.000000e+00> : vector<8x512xf32>
    %266 = tpu.matmul %259, %265, %cst_150 {dimension_numbers = #tpu.dot_dimension_numbers<[1], [0], [0], [1], [0, 0, 1, 1], [], []>} : vector<8x128xf32>, vector<128x512xf32>, vector<8x512xf32> -> vector<8x512xf32>
    %267 = arith.addf %263, %266 : vector<8x512xf32>
    %268 = vector.extract_strided_slice %267 {offsets = [0, 0], sizes = [8, 128], strides = [1, 1]} : vector<8x512xf32> to vector<8x128xf32>
    %269 = arith.negf %268 : vector<8x128xf32>
    %270 = math.exp %269 : vector<8x128xf32>
    %cst_151 = arith.constant 1.000000e+00 : f32
    %271 = vector.broadcast %cst_151 : f32 to vector<8x128xf32>
    %272 = arith.addf %271, %270 : vector<8x128xf32>
    %273 = arith.divf %271, %272 : vector<8x128xf32>
    %274 = vector.extract_strided_slice %267 {offsets = [0, 128], sizes = [8, 128], strides = [1, 1]} : vector<8x512xf32> to vector<8x128xf32>
    %275 = arith.negf %274 : vector<8x128xf32>
    %276 = math.exp %275 : vector<8x128xf32>
    %cst_152 = arith.constant 1.000000e+00 : f32
    %277 = vector.broadcast %cst_152 : f32 to vector<8x128xf32>
    %278 = arith.addf %277, %276 : vector<8x128xf32>
    %279 = arith.divf %277, %278 : vector<8x128xf32>
    %280 = vector.extract_strided_slice %267 {offsets = [0, 256], sizes = [8, 128], strides = [1, 1]} : vector<8x512xf32> to vector<8x128xf32>
    %281 = math.tanh %280 : vector<8x128xf32>
    %282 = vector.extract_strided_slice %267 {offsets = [0, 384], sizes = [8, 128], strides = [1, 1]} : vector<8x512xf32> to vector<8x128xf32>
    %283 = arith.negf %282 : vector<8x128xf32>
    %284 = math.exp %283 : vector<8x128xf32>
    %cst_153 = arith.constant 1.000000e+00 : f32
    %285 = vector.broadcast %cst_153 : f32 to vector<8x128xf32>
    %286 = arith.addf %285, %284 : vector<8x128xf32>
    %287 = arith.divf %285, %286 : vector<8x128xf32>
    %288 = arith.mulf %279, %260 : vector<8x128xf32>
    %289 = arith.mulf %273, %281 : vector<8x128xf32>
    %290 = arith.addf %288, %289 : vector<8x128xf32>
    %291 = math.tanh %290 : vector<8x128xf32>
    %292 = arith.mulf %287, %291 : vector<8x128xf32>
    %c0_154 = arith.constant 0 : index
    %c0_155 = arith.constant 0 : index
    %293 = vector.load %arg14[%c0_154, %c0_155] : memref<8x128xf32, #tpu.memory_space<vmem>>, vector<8x128xf32>
    tpu.vector_store %arg14[%c0_154, %c0_155], %292 {strides = array<i32>} : memref<8x128xf32, #tpu.memory_space<vmem>>, vector<8x128xf32>,
    %c0_156 = arith.constant 0 : index
    %c0_157 = arith.constant 0 : index
    %294 = vector.load %arg15[%c0_156, %c0_157] : memref<8x128xf32, #tpu.memory_space<vmem>>, vector<8x128xf32>
    tpu.vector_store %arg15[%c0_156, %c0_157], %290 {strides = array<i32>} : memref<8x128xf32, #tpu.memory_space<vmem>>, vector<8x128xf32>,
    %295 = arith.index_cast %c6_i32 : i32 to index
    %c0_158 = arith.constant 0 : index
    %c0_159 = arith.constant 0 : index
    %296 = vector.load %arg12[%295, %c0_158, %c0_159] : memref<8x8x128xf32, #tpu.memory_space<vmem>>, vector<1x8x128xf32>
    %297 = vector.shape_cast %296 : vector<1x8x128xf32> to vector<8x128xf32>
    %298 = vector.shape_cast %292 : vector<8x128xf32> to vector<1x8x128xf32>
    tpu.vector_store %arg12[%295, %c0_158, %c0_159], %298 {strides = array<i32>} : memref<8x8x128xf32, #tpu.memory_space<vmem>>, vector<1x8x128xf32>,
    %c7_i32 = arith.constant 7 : i32
    %c0_160 = arith.constant 0 : index
    %c0_161 = arith.constant 0 : index
    %299 = vector.load %arg14[%c0_160, %c0_161] : memref<8x128xf32, #tpu.memory_space<vmem>>, vector<8x128xf32>
    %c0_162 = arith.constant 0 : index
    %c0_163 = arith.constant 0 : index
    %300 = vector.load %arg15[%c0_162, %c0_163] : memref<8x128xf32, #tpu.memory_space<vmem>>, vector<8x128xf32>
    %301 = arith.index_cast %c7_i32 : i32 to index
    %c0_164 = arith.constant 0 : index
    %c0_165 = arith.constant 0 : index
    %302 = vector.load %arg13[%301, %c0_164, %c0_165] : memref<8x8x512xf32, #tpu.memory_space<vmem>>, vector<1x8x512xf32>
    %303 = vector.shape_cast %302 : vector<1x8x512xf32> to vector<8x512xf32>
    %c0_166 = arith.constant 0 : index
    %c0_167 = arith.constant 0 : index
    %c0_168 = arith.constant 0 : index
    %304 = vector.load %arg3[%c0_166, %c0_167, %c0_168] : memref<2x128x512xf32, #tpu.memory_space<vmem>>, vector<1x128x512xf32>
    %305 = vector.shape_cast %304 : vector<1x128x512xf32> to vector<128x512xf32>
    %cst_169 = arith.constant dense<0.000000e+00> : vector<8x512xf32>
    %306 = tpu.matmul %299, %305, %cst_169 {dimension_numbers = #tpu.dot_dimension_numbers<[1], [0], [0], [1], [0, 0, 1, 1], [], []>} : vector<8x128xf32>, vector<128x512xf32>, vector<8x512xf32> -> vector<8x512xf32>
    %307 = arith.addf %303, %306 : vector<8x512xf32>
    %308 = vector.extract_strided_slice %307 {offsets = [0, 0], sizes = [8, 128], strides = [1, 1]} : vector<8x512xf32> to vector<8x128xf32>
    %309 = arith.negf %308 : vector<8x128xf32>
    %310 = math.exp %309 : vector<8x128xf32>
    %cst_170 = arith.constant 1.000000e+00 : f32
    %311 = vector.broadcast %cst_170 : f32 to vector<8x128xf32>
    %312 = arith.addf %311, %310 : vector<8x128xf32>
    %313 = arith.divf %311, %312 : vector<8x128xf32>
    %314 = vector.extract_strided_slice %307 {offsets = [0, 128], sizes = [8, 128], strides = [1, 1]} : vector<8x512xf32> to vector<8x128xf32>
    %315 = arith.negf %314 : vector<8x128xf32>
    %316 = math.exp %315 : vector<8x128xf32>
    %cst_171 = arith.constant 1.000000e+00 : f32
    %317 = vector.broadcast %cst_171 : f32 to vector<8x128xf32>
    %318 = arith.addf %317, %316 : vector<8x128xf32>
    %319 = arith.divf %317, %318 : vector<8x128xf32>
    %320 = vector.extract_strided_slice %307 {offsets = [0, 256], sizes = [8, 128], strides = [1, 1]} : vector<8x512xf32> to vector<8x128xf32>
    %321 = math.tanh %320 : vector<8x128xf32>
    %322 = vector.extract_strided_slice %307 {offsets = [0, 384], sizes = [8, 128], strides = [1, 1]} : vector<8x512xf32> to vector<8x128xf32>
    %323 = arith.negf %322 : vector<8x128xf32>
    %324 = math.exp %323 : vector<8x128xf32>
    %cst_172 = arith.constant 1.000000e+00 : f32
    %325 = vector.broadcast %cst_172 : f32 to vector<8x128xf32>
    %326 = arith.addf %325, %324 : vector<8x128xf32>
    %327 = arith.divf %325, %326 : vector<8x128xf32>
    %328 = arith.mulf %319, %300 : vector<8x128xf32>
    %329 = arith.mulf %313, %321 : vector<8x128xf32>
    %330 = arith.addf %328, %329 : vector<8x128xf32>
    %331 = math.tanh %330 : vector<8x128xf32>
    %332 = arith.mulf %327, %331 : vector<8x128xf32>
    %c0_173 = arith.constant 0 : index
    %c0_174 = arith.constant 0 : index
    %333 = vector.load %arg14[%c0_173, %c0_174] : memref<8x128xf32, #tpu.memory_space<vmem>>, vector<8x128xf32>
    tpu.vector_store %arg14[%c0_173, %c0_174], %332 {strides = array<i32>} : memref<8x128xf32, #tpu.memory_space<vmem>>, vector<8x128xf32>,
    %c0_175 = arith.constant 0 : index
    %c0_176 = arith.constant 0 : index
    %334 = vector.load %arg15[%c0_175, %c0_176] : memref<8x128xf32, #tpu.memory_space<vmem>>, vector<8x128xf32>
    tpu.vector_store %arg15[%c0_175, %c0_176], %330 {strides = array<i32>} : memref<8x128xf32, #tpu.memory_space<vmem>>, vector<8x128xf32>,
    %335 = arith.index_cast %c7_i32 : i32 to index
    %c0_177 = arith.constant 0 : index
    %c0_178 = arith.constant 0 : index
    %336 = vector.load %arg12[%335, %c0_177, %c0_178] : memref<8x8x128xf32, #tpu.memory_space<vmem>>, vector<1x8x128xf32>
    %337 = vector.shape_cast %336 : vector<1x8x128xf32> to vector<8x128xf32>
    %338 = vector.shape_cast %332 : vector<8x128xf32> to vector<1x8x128xf32>
    tpu.vector_store %arg12[%335, %c0_177, %c0_178], %338 {strides = array<i32>} : memref<8x8x128xf32, #tpu.memory_space<vmem>>, vector<1x8x128xf32>,
    %c8_i32 = arith.constant 8 : i32
    %c0_179 = arith.constant 0 : index
    %c0_180 = arith.constant 0 : index
    %339 = vector.load %arg14[%c0_179, %c0_180] : memref<8x128xf32, #tpu.memory_space<vmem>>, vector<8x128xf32>
    %c0_181 = arith.constant 0 : index
    %c0_182 = arith.constant 0 : index
    %c0_183 = arith.constant 0 : index
    %340 = vector.load %arg10[%c0_181, %c0_182, %c0_183] : memref<2x8x128xf32, #tpu.memory_space<vmem>>, vector<1x8x128xf32>
    %341 = vector.shape_cast %340 : vector<1x8x128xf32> to vector<8x128xf32>
    %342 = vector.shape_cast %339 : vector<8x128xf32> to vector<1x8x128xf32>
    tpu.vector_store %arg10[%c0_181, %c0_182, %c0_183], %342 {strides = array<i32>} : memref<2x8x128xf32, #tpu.memory_space<vmem>>, vector<1x8x128xf32>,
    %c0_184 = arith.constant 0 : index
    %c0_185 = arith.constant 0 : index
    %343 = vector.load %arg15[%c0_184, %c0_185] : memref<8x128xf32, #tpu.memory_space<vmem>>, vector<8x128xf32>
    %c0_186 = arith.constant 0 : index
    %c0_187 = arith.constant 0 : index
    %c0_188 = arith.constant 0 : index
    %344 = vector.load %arg11[%c0_186, %c0_187, %c0_188] : memref<2x8x128xf32, #tpu.memory_space<vmem>>, vector<1x8x128xf32>
    %345 = vector.shape_cast %344 : vector<1x8x128xf32> to vector<8x128xf32>
    %346 = vector.shape_cast %343 : vector<8x128xf32> to vector<1x8x128xf32>
    tpu.vector_store %arg11[%c0_186, %c0_187, %c0_188], %346 {strides = array<i32>} : memref<2x8x128xf32, #tpu.memory_space<vmem>>, vector<1x8x128xf32>,
    %c0_189 = arith.constant 0 : index
    %c0_190 = arith.constant 0 : index
    %c0_191 = arith.constant 0 : index
    %347 = vector.load %arg12[%c0_189, %c0_190, %c0_191] : memref<8x8x128xf32, #tpu.memory_space<vmem>>, vector<8x8x128xf32>
    %348 = vector.shape_cast %347 : vector<8x8x128xf32> to vector<64x128xf32>
    %c1 = arith.constant 1 : index
    %c0_192 = arith.constant 0 : index
    %c0_193 = arith.constant 0 : index
    %349 = vector.load %arg2[%c1, %c0_192, %c0_193] : memref<2x128x512xf32, #tpu.memory_space<vmem>>, vector<1x128x512xf32>
    %350 = vector.shape_cast %349 : vector<1x128x512xf32> to vector<128x512xf32>
    %cst_194 = arith.constant dense<0.000000e+00> : vector<64x512xf32>
    %351 = tpu.matmul %348, %350, %cst_194 {dimension_numbers = #tpu.dot_dimension_numbers<[1], [0], [0], [1], [0, 0, 1, 1], [], []>} : vector<64x128xf32>, vector<128x512xf32>, vector<64x512xf32> -> vector<64x512xf32>
    %c1_195 = arith.constant 1 : index
    %c0_196 = arith.constant 0 : index
    %c0_197 = arith.constant 0 : index
    %352 = vector.load %arg4[%c1_195, %c0_196, %c0_197] : memref<2x1x512xf32, #tpu.memory_space<vmem>>, vector<1x1x512xf32>
    %353 = vector.shape_cast %352 : vector<1x1x512xf32> to vector<1x512xf32>
    %354 = vector.broadcast %353 : vector<1x512xf32> to vector<64x512xf32>
    %355 = arith.addf %351, %354 : vector<64x512xf32>
    %356 = vector.shape_cast %355 : vector<64x512xf32> to vector<8x8x512xf32>
    %c0_198 = arith.constant 0 : index
    %c0_199 = arith.constant 0 : index
    %c0_200 = arith.constant 0 : index
    %357 = vector.load %arg13[%c0_198, %c0_199, %c0_200] : memref<8x8x512xf32, #tpu.memory_space<vmem>>, vector<8x8x512xf32>
    tpu.vector_store %arg13[%c0_198, %c0_199, %c0_200], %356 {strides = array<i32>} : memref<8x8x512xf32, #tpu.memory_space<vmem>>, vector<8x8x512xf32>,
    %c1_201 = arith.constant 1 : index
    %c0_202 = arith.constant 0 : index
    %c0_203 = arith.constant 0 : index
    %358 = vector.load %arg5[%c1_201, %c0_202, %c0_203] : memref<2x8x128xf32, #tpu.memory_space<vmem>>, vector<1x8x128xf32>
    %359 = vector.shape_cast %358 : vector<1x8x128xf32> to vector<8x128xf32>
    %c0_204 = arith.constant 0 : index
    %c0_205 = arith.constant 0 : index
    %360 = vector.load %arg14[%c0_204, %c0_205] : memref<8x128xf32, #tpu.memory_space<vmem>>, vector<8x128xf32>
    tpu.vector_store %arg14[%c0_204, %c0_205], %359 {strides = array<i32>} : memref<8x128xf32, #tpu.memory_space<vmem>>, vector<8x128xf32>,
    %c1_206 = arith.constant 1 : index
    %c0_207 = arith.constant 0 : index
    %c0_208 = arith.constant 0 : index
    %361 = vector.load %arg6[%c1_206, %c0_207, %c0_208] : memref<2x8x128xf32, #tpu.memory_space<vmem>>, vector<1x8x128xf32>
    %362 = vector.shape_cast %361 : vector<1x8x128xf32> to vector<8x128xf32>
    %c0_209 = arith.constant 0 : index
    %c0_210 = arith.constant 0 : index
    %363 = vector.load %arg15[%c0_209, %c0_210] : memref<8x128xf32, #tpu.memory_space<vmem>>, vector<8x128xf32>
    tpu.vector_store %arg15[%c0_209, %c0_210], %362 {strides = array<i32>} : memref<8x128xf32, #tpu.memory_space<vmem>>, vector<8x128xf32>,
    %c0_i32_211 = arith.constant 0 : i32
    %c0_212 = arith.constant 0 : index
    %c0_213 = arith.constant 0 : index
    %364 = vector.load %arg14[%c0_212, %c0_213] : memref<8x128xf32, #tpu.memory_space<vmem>>, vector<8x128xf32>
    %c0_214 = arith.constant 0 : index
    %c0_215 = arith.constant 0 : index
    %365 = vector.load %arg15[%c0_214, %c0_215] : memref<8x128xf32, #tpu.memory_space<vmem>>, vector<8x128xf32>
    %366 = arith.index_cast %c0_i32_211 : i32 to index
    %c0_216 = arith.constant 0 : index
    %c0_217 = arith.constant 0 : index
    %367 = vector.load %arg13[%366, %c0_216, %c0_217] : memref<8x8x512xf32, #tpu.memory_space<vmem>>, vector<1x8x512xf32>
    %368 = vector.shape_cast %367 : vector<1x8x512xf32> to vector<8x512xf32>
    %c1_218 = arith.constant 1 : index
    %c0_219 = arith.constant 0 : index
    %c0_220 = arith.constant 0 : index
    %369 = vector.load %arg3[%c1_218, %c0_219, %c0_220] : memref<2x128x512xf32, #tpu.memory_space<vmem>>, vector<1x128x512xf32>
    %370 = vector.shape_cast %369 : vector<1x128x512xf32> to vector<128x512xf32>
    %cst_221 = arith.constant dense<0.000000e+00> : vector<8x512xf32>
    %371 = tpu.matmul %364, %370, %cst_221 {dimension_numbers = #tpu.dot_dimension_numbers<[1], [0], [0], [1], [0, 0, 1, 1], [], []>} : vector<8x128xf32>, vector<128x512xf32>, vector<8x512xf32> -> vector<8x512xf32>
    %372 = arith.addf %368, %371 : vector<8x512xf32>
    %373 = vector.extract_strided_slice %372 {offsets = [0, 0], sizes = [8, 128], strides = [1, 1]} : vector<8x512xf32> to vector<8x128xf32>
    %374 = arith.negf %373 : vector<8x128xf32>
    %375 = math.exp %374 : vector<8x128xf32>
    %cst_222 = arith.constant 1.000000e+00 : f32
    %376 = vector.broadcast %cst_222 : f32 to vector<8x128xf32>
    %377 = arith.addf %376, %375 : vector<8x128xf32>
    %378 = arith.divf %376, %377 : vector<8x128xf32>
    %379 = vector.extract_strided_slice %372 {offsets = [0, 128], sizes = [8, 128], strides = [1, 1]} : vector<8x512xf32> to vector<8x128xf32>
    %380 = arith.negf %379 : vector<8x128xf32>
    %381 = math.exp %380 : vector<8x128xf32>
    %cst_223 = arith.constant 1.000000e+00 : f32
    %382 = vector.broadcast %cst_223 : f32 to vector<8x128xf32>
    %383 = arith.addf %382, %381 : vector<8x128xf32>
    %384 = arith.divf %382, %383 : vector<8x128xf32>
    %385 = vector.extract_strided_slice %372 {offsets = [0, 256], sizes = [8, 128], strides = [1, 1]} : vector<8x512xf32> to vector<8x128xf32>
    %386 = math.tanh %385 : vector<8x128xf32>
    %387 = vector.extract_strided_slice %372 {offsets = [0, 384], sizes = [8, 128], strides = [1, 1]} : vector<8x512xf32> to vector<8x128xf32>
    %388 = arith.negf %387 : vector<8x128xf32>
    %389 = math.exp %388 : vector<8x128xf32>
    %cst_224 = arith.constant 1.000000e+00 : f32
    %390 = vector.broadcast %cst_224 : f32 to vector<8x128xf32>
    %391 = arith.addf %390, %389 : vector<8x128xf32>
    %392 = arith.divf %390, %391 : vector<8x128xf32>
    %393 = arith.mulf %384, %365 : vector<8x128xf32>
    %394 = arith.mulf %378, %386 : vector<8x128xf32>
    %395 = arith.addf %393, %394 : vector<8x128xf32>
    %396 = math.tanh %395 : vector<8x128xf32>
    %397 = arith.mulf %392, %396 : vector<8x128xf32>
    %c0_225 = arith.constant 0 : index
    %c0_226 = arith.constant 0 : index
    %398 = vector.load %arg14[%c0_225, %c0_226] : memref<8x128xf32, #tpu.memory_space<vmem>>, vector<8x128xf32>
    tpu.vector_store %arg14[%c0_225, %c0_226], %397 {strides = array<i32>} : memref<8x128xf32, #tpu.memory_space<vmem>>, vector<8x128xf32>,
    %c0_227 = arith.constant 0 : index
    %c0_228 = arith.constant 0 : index
    %399 = vector.load %arg15[%c0_227, %c0_228] : memref<8x128xf32, #tpu.memory_space<vmem>>, vector<8x128xf32>
    tpu.vector_store %arg15[%c0_227, %c0_228], %395 {strides = array<i32>} : memref<8x128xf32, #tpu.memory_space<vmem>>, vector<8x128xf32>,
    %400 = arith.index_cast %c0_i32_211 : i32 to index
    %c0_229 = arith.constant 0 : index
    %c0_230 = arith.constant 0 : index
    %401 = vector.load %arg12[%400, %c0_229, %c0_230] : memref<8x8x128xf32, #tpu.memory_space<vmem>>, vector<1x8x128xf32>
    %402 = vector.shape_cast %401 : vector<1x8x128xf32> to vector<8x128xf32>
    %403 = vector.shape_cast %397 : vector<8x128xf32> to vector<1x8x128xf32>
    tpu.vector_store %arg12[%400, %c0_229, %c0_230], %403 {strides = array<i32>} : memref<8x8x128xf32, #tpu.memory_space<vmem>>, vector<1x8x128xf32>,
    %c1_i32_231 = arith.constant 1 : i32
    %c0_232 = arith.constant 0 : index
    %c0_233 = arith.constant 0 : index
    %404 = vector.load %arg14[%c0_232, %c0_233] : memref<8x128xf32, #tpu.memory_space<vmem>>, vector<8x128xf32>
    %c0_234 = arith.constant 0 : index
    %c0_235 = arith.constant 0 : index
    %405 = vector.load %arg15[%c0_234, %c0_235] : memref<8x128xf32, #tpu.memory_space<vmem>>, vector<8x128xf32>
    %406 = arith.index_cast %c1_i32_231 : i32 to index
    %c0_236 = arith.constant 0 : index
    %c0_237 = arith.constant 0 : index
    %407 = vector.load %arg13[%406, %c0_236, %c0_237] : memref<8x8x512xf32, #tpu.memory_space<vmem>>, vector<1x8x512xf32>
    %408 = vector.shape_cast %407 : vector<1x8x512xf32> to vector<8x512xf32>
    %c1_238 = arith.constant 1 : index
    %c0_239 = arith.constant 0 : index
    %c0_240 = arith.constant 0 : index
    %409 = vector.load %arg3[%c1_238, %c0_239, %c0_240] : memref<2x128x512xf32, #tpu.memory_space<vmem>>, vector<1x128x512xf32>
    %410 = vector.shape_cast %409 : vector<1x128x512xf32> to vector<128x512xf32>
    %cst_241 = arith.constant dense<0.000000e+00> : vector<8x512xf32>
    %411 = tpu.matmul %404, %410, %cst_241 {dimension_numbers = #tpu.dot_dimension_numbers<[1], [0], [0], [1], [0, 0, 1, 1], [], []>} : vector<8x128xf32>, vector<128x512xf32>, vector<8x512xf32> -> vector<8x512xf32>
    %412 = arith.addf %408, %411 : vector<8x512xf32>
    %413 = vector.extract_strided_slice %412 {offsets = [0, 0], sizes = [8, 128], strides = [1, 1]} : vector<8x512xf32> to vector<8x128xf32>
    %414 = arith.negf %413 : vector<8x128xf32>
    %415 = math.exp %414 : vector<8x128xf32>
    %cst_242 = arith.constant 1.000000e+00 : f32
    %416 = vector.broadcast %cst_242 : f32 to vector<8x128xf32>
    %417 = arith.addf %416, %415 : vector<8x128xf32>
    %418 = arith.divf %416, %417 : vector<8x128xf32>
    %419 = vector.extract_strided_slice %412 {offsets = [0, 128], sizes = [8, 128], strides = [1, 1]} : vector<8x512xf32> to vector<8x128xf32>
    %420 = arith.negf %419 : vector<8x128xf32>
    %421 = math.exp %420 : vector<8x128xf32>
    %cst_243 = arith.constant 1.000000e+00 : f32
    %422 = vector.broadcast %cst_243 : f32 to vector<8x128xf32>
    %423 = arith.addf %422, %421 : vector<8x128xf32>
    %424 = arith.divf %422, %423 : vector<8x128xf32>
    %425 = vector.extract_strided_slice %412 {offsets = [0, 256], sizes = [8, 128], strides = [1, 1]} : vector<8x512xf32> to vector<8x128xf32>
    %426 = math.tanh %425 : vector<8x128xf32>
    %427 = vector.extract_strided_slice %412 {offsets = [0, 384], sizes = [8, 128], strides = [1, 1]} : vector<8x512xf32> to vector<8x128xf32>
    %428 = arith.negf %427 : vector<8x128xf32>
    %429 = math.exp %428 : vector<8x128xf32>
    %cst_244 = arith.constant 1.000000e+00 : f32
    %430 = vector.broadcast %cst_244 : f32 to vector<8x128xf32>
    %431 = arith.addf %430, %429 : vector<8x128xf32>
    %432 = arith.divf %430, %431 : vector<8x128xf32>
    %433 = arith.mulf %424, %405 : vector<8x128xf32>
    %434 = arith.mulf %418, %426 : vector<8x128xf32>
    %435 = arith.addf %433, %434 : vector<8x128xf32>
    %436 = math.tanh %435 : vector<8x128xf32>
    %437 = arith.mulf %432, %436 : vector<8x128xf32>
    %c0_245 = arith.constant 0 : index
    %c0_246 = arith.constant 0 : index
    %438 = vector.load %arg14[%c0_245, %c0_246] : memref<8x128xf32, #tpu.memory_space<vmem>>, vector<8x128xf32>
    tpu.vector_store %arg14[%c0_245, %c0_246], %437 {strides = array<i32>} : memref<8x128xf32, #tpu.memory_space<vmem>>, vector<8x128xf32>,
    %c0_247 = arith.constant 0 : index
    %c0_248 = arith.constant 0 : index
    %439 = vector.load %arg15[%c0_247, %c0_248] : memref<8x128xf32, #tpu.memory_space<vmem>>, vector<8x128xf32>
    tpu.vector_store %arg15[%c0_247, %c0_248], %435 {strides = array<i32>} : memref<8x128xf32, #tpu.memory_space<vmem>>, vector<8x128xf32>,
    %440 = arith.index_cast %c1_i32_231 : i32 to index
    %c0_249 = arith.constant 0 : index
    %c0_250 = arith.constant 0 : index
    %441 = vector.load %arg12[%440, %c0_249, %c0_250] : memref<8x8x128xf32, #tpu.memory_space<vmem>>, vector<1x8x128xf32>
    %442 = vector.shape_cast %441 : vector<1x8x128xf32> to vector<8x128xf32>
    %443 = vector.shape_cast %437 : vector<8x128xf32> to vector<1x8x128xf32>
    tpu.vector_store %arg12[%440, %c0_249, %c0_250], %443 {strides = array<i32>} : memref<8x8x128xf32, #tpu.memory_space<vmem>>, vector<1x8x128xf32>,
    %c2_i32_251 = arith.constant 2 : i32
    %c0_252 = arith.constant 0 : index
    %c0_253 = arith.constant 0 : index
    %444 = vector.load %arg14[%c0_252, %c0_253] : memref<8x128xf32, #tpu.memory_space<vmem>>, vector<8x128xf32>
    %c0_254 = arith.constant 0 : index
    %c0_255 = arith.constant 0 : index
    %445 = vector.load %arg15[%c0_254, %c0_255] : memref<8x128xf32, #tpu.memory_space<vmem>>, vector<8x128xf32>
    %446 = arith.index_cast %c2_i32_251 : i32 to index
    %c0_256 = arith.constant 0 : index
    %c0_257 = arith.constant 0 : index
    %447 = vector.load %arg13[%446, %c0_256, %c0_257] : memref<8x8x512xf32, #tpu.memory_space<vmem>>, vector<1x8x512xf32>
    %448 = vector.shape_cast %447 : vector<1x8x512xf32> to vector<8x512xf32>
    %c1_258 = arith.constant 1 : index
    %c0_259 = arith.constant 0 : index
    %c0_260 = arith.constant 0 : index
    %449 = vector.load %arg3[%c1_258, %c0_259, %c0_260] : memref<2x128x512xf32, #tpu.memory_space<vmem>>, vector<1x128x512xf32>
    %450 = vector.shape_cast %449 : vector<1x128x512xf32> to vector<128x512xf32>
    %cst_261 = arith.constant dense<0.000000e+00> : vector<8x512xf32>
    %451 = tpu.matmul %444, %450, %cst_261 {dimension_numbers = #tpu.dot_dimension_numbers<[1], [0], [0], [1], [0, 0, 1, 1], [], []>} : vector<8x128xf32>, vector<128x512xf32>, vector<8x512xf32> -> vector<8x512xf32>
    %452 = arith.addf %448, %451 : vector<8x512xf32>
    %453 = vector.extract_strided_slice %452 {offsets = [0, 0], sizes = [8, 128], strides = [1, 1]} : vector<8x512xf32> to vector<8x128xf32>
    %454 = arith.negf %453 : vector<8x128xf32>
    %455 = math.exp %454 : vector<8x128xf32>
    %cst_262 = arith.constant 1.000000e+00 : f32
    %456 = vector.broadcast %cst_262 : f32 to vector<8x128xf32>
    %457 = arith.addf %456, %455 : vector<8x128xf32>
    %458 = arith.divf %456, %457 : vector<8x128xf32>
    %459 = vector.extract_strided_slice %452 {offsets = [0, 128], sizes = [8, 128], strides = [1, 1]} : vector<8x512xf32> to vector<8x128xf32>
    %460 = arith.negf %459 : vector<8x128xf32>
    %461 = math.exp %460 : vector<8x128xf32>
    %cst_263 = arith.constant 1.000000e+00 : f32
    %462 = vector.broadcast %cst_263 : f32 to vector<8x128xf32>
    %463 = arith.addf %462, %461 : vector<8x128xf32>
    %464 = arith.divf %462, %463 : vector<8x128xf32>
    %465 = vector.extract_strided_slice %452 {offsets = [0, 256], sizes = [8, 128], strides = [1, 1]} : vector<8x512xf32> to vector<8x128xf32>
    %466 = math.tanh %465 : vector<8x128xf32>
    %467 = vector.extract_strided_slice %452 {offsets = [0, 384], sizes = [8, 128], strides = [1, 1]} : vector<8x512xf32> to vector<8x128xf32>
    %468 = arith.negf %467 : vector<8x128xf32>
    %469 = math.exp %468 : vector<8x128xf32>
    %cst_264 = arith.constant 1.000000e+00 : f32
    %470 = vector.broadcast %cst_264 : f32 to vector<8x128xf32>
    %471 = arith.addf %470, %469 : vector<8x128xf32>
    %472 = arith.divf %470, %471 : vector<8x128xf32>
    %473 = arith.mulf %464, %445 : vector<8x128xf32>
    %474 = arith.mulf %458, %466 : vector<8x128xf32>
    %475 = arith.addf %473, %474 : vector<8x128xf32>
    %476 = math.tanh %475 : vector<8x128xf32>
    %477 = arith.mulf %472, %476 : vector<8x128xf32>
    %c0_265 = arith.constant 0 : index
    %c0_266 = arith.constant 0 : index
    %478 = vector.load %arg14[%c0_265, %c0_266] : memref<8x128xf32, #tpu.memory_space<vmem>>, vector<8x128xf32>
    tpu.vector_store %arg14[%c0_265, %c0_266], %477 {strides = array<i32>} : memref<8x128xf32, #tpu.memory_space<vmem>>, vector<8x128xf32>,
    %c0_267 = arith.constant 0 : index
    %c0_268 = arith.constant 0 : index
    %479 = vector.load %arg15[%c0_267, %c0_268] : memref<8x128xf32, #tpu.memory_space<vmem>>, vector<8x128xf32>
    tpu.vector_store %arg15[%c0_267, %c0_268], %475 {strides = array<i32>} : memref<8x128xf32, #tpu.memory_space<vmem>>, vector<8x128xf32>,
    %480 = arith.index_cast %c2_i32_251 : i32 to index
    %c0_269 = arith.constant 0 : index
    %c0_270 = arith.constant 0 : index
    %481 = vector.load %arg12[%480, %c0_269, %c0_270] : memref<8x8x128xf32, #tpu.memory_space<vmem>>, vector<1x8x128xf32>
    %482 = vector.shape_cast %481 : vector<1x8x128xf32> to vector<8x128xf32>
    %483 = vector.shape_cast %477 : vector<8x128xf32> to vector<1x8x128xf32>
    tpu.vector_store %arg12[%480, %c0_269, %c0_270], %483 {strides = array<i32>} : memref<8x8x128xf32, #tpu.memory_space<vmem>>, vector<1x8x128xf32>,
    %c3_i32_271 = arith.constant 3 : i32
    %c0_272 = arith.constant 0 : index
    %c0_273 = arith.constant 0 : index
    %484 = vector.load %arg14[%c0_272, %c0_273] : memref<8x128xf32, #tpu.memory_space<vmem>>, vector<8x128xf32>
    %c0_274 = arith.constant 0 : index
    %c0_275 = arith.constant 0 : index
    %485 = vector.load %arg15[%c0_274, %c0_275] : memref<8x128xf32, #tpu.memory_space<vmem>>, vector<8x128xf32>
    %486 = arith.index_cast %c3_i32_271 : i32 to index
    %c0_276 = arith.constant 0 : index
    %c0_277 = arith.constant 0 : index
    %487 = vector.load %arg13[%486, %c0_276, %c0_277] : memref<8x8x512xf32, #tpu.memory_space<vmem>>, vector<1x8x512xf32>
    %488 = vector.shape_cast %487 : vector<1x8x512xf32> to vector<8x512xf32>
    %c1_278 = arith.constant 1 : index
    %c0_279 = arith.constant 0 : index
    %c0_280 = arith.constant 0 : index
    %489 = vector.load %arg3[%c1_278, %c0_279, %c0_280] : memref<2x128x512xf32, #tpu.memory_space<vmem>>, vector<1x128x512xf32>
    %490 = vector.shape_cast %489 : vector<1x128x512xf32> to vector<128x512xf32>
    %cst_281 = arith.constant dense<0.000000e+00> : vector<8x512xf32>
    %491 = tpu.matmul %484, %490, %cst_281 {dimension_numbers = #tpu.dot_dimension_numbers<[1], [0], [0], [1], [0, 0, 1, 1], [], []>} : vector<8x128xf32>, vector<128x512xf32>, vector<8x512xf32> -> vector<8x512xf32>
    %492 = arith.addf %488, %491 : vector<8x512xf32>
    %493 = vector.extract_strided_slice %492 {offsets = [0, 0], sizes = [8, 128], strides = [1, 1]} : vector<8x512xf32> to vector<8x128xf32>
    %494 = arith.negf %493 : vector<8x128xf32>
    %495 = math.exp %494 : vector<8x128xf32>
    %cst_282 = arith.constant 1.000000e+00 : f32
    %496 = vector.broadcast %cst_282 : f32 to vector<8x128xf32>
    %497 = arith.addf %496, %495 : vector<8x128xf32>
    %498 = arith.divf %496, %497 : vector<8x128xf32>
    %499 = vector.extract_strided_slice %492 {offsets = [0, 128], sizes = [8, 128], strides = [1, 1]} : vector<8x512xf32> to vector<8x128xf32>
    %500 = arith.negf %499 : vector<8x128xf32>
    %501 = math.exp %500 : vector<8x128xf32>
    %cst_283 = arith.constant 1.000000e+00 : f32
    %502 = vector.broadcast %cst_283 : f32 to vector<8x128xf32>
    %503 = arith.addf %502, %501 : vector<8x128xf32>
    %504 = arith.divf %502, %503 : vector<8x128xf32>
    %505 = vector.extract_strided_slice %492 {offsets = [0, 256], sizes = [8, 128], strides = [1, 1]} : vector<8x512xf32> to vector<8x128xf32>
    %506 = math.tanh %505 : vector<8x128xf32>
    %507 = vector.extract_strided_slice %492 {offsets = [0, 384], sizes = [8, 128], strides = [1, 1]} : vector<8x512xf32> to vector<8x128xf32>
    %508 = arith.negf %507 : vector<8x128xf32>
    %509 = math.exp %508 : vector<8x128xf32>
    %cst_284 = arith.constant 1.000000e+00 : f32
    %510 = vector.broadcast %cst_284 : f32 to vector<8x128xf32>
    %511 = arith.addf %510, %509 : vector<8x128xf32>
    %512 = arith.divf %510, %511 : vector<8x128xf32>
    %513 = arith.mulf %504, %485 : vector<8x128xf32>
    %514 = arith.mulf %498, %506 : vector<8x128xf32>
    %515 = arith.addf %513, %514 : vector<8x128xf32>
    %516 = math.tanh %515 : vector<8x128xf32>
    %517 = arith.mulf %512, %516 : vector<8x128xf32>
    %c0_285 = arith.constant 0 : index
    %c0_286 = arith.constant 0 : index
    %518 = vector.load %arg14[%c0_285, %c0_286] : memref<8x128xf32, #tpu.memory_space<vmem>>, vector<8x128xf32>
    tpu.vector_store %arg14[%c0_285, %c0_286], %517 {strides = array<i32>} : memref<8x128xf32, #tpu.memory_space<vmem>>, vector<8x128xf32>,
    %c0_287 = arith.constant 0 : index
    %c0_288 = arith.constant 0 : index
    %519 = vector.load %arg15[%c0_287, %c0_288] : memref<8x128xf32, #tpu.memory_space<vmem>>, vector<8x128xf32>
    tpu.vector_store %arg15[%c0_287, %c0_288], %515 {strides = array<i32>} : memref<8x128xf32, #tpu.memory_space<vmem>>, vector<8x128xf32>,
    %520 = arith.index_cast %c3_i32_271 : i32 to index
    %c0_289 = arith.constant 0 : index
    %c0_290 = arith.constant 0 : index
    %521 = vector.load %arg12[%520, %c0_289, %c0_290] : memref<8x8x128xf32, #tpu.memory_space<vmem>>, vector<1x8x128xf32>
    %522 = vector.shape_cast %521 : vector<1x8x128xf32> to vector<8x128xf32>
    %523 = vector.shape_cast %517 : vector<8x128xf32> to vector<1x8x128xf32>
    tpu.vector_store %arg12[%520, %c0_289, %c0_290], %523 {strides = array<i32>} : memref<8x8x128xf32, #tpu.memory_space<vmem>>, vector<1x8x128xf32>,
    %c4_i32_291 = arith.constant 4 : i32
    %c0_292 = arith.constant 0 : index
    %c0_293 = arith.constant 0 : index
    %524 = vector.load %arg14[%c0_292, %c0_293] : memref<8x128xf32, #tpu.memory_space<vmem>>, vector<8x128xf32>
    %c0_294 = arith.constant 0 : index
    %c0_295 = arith.constant 0 : index
    %525 = vector.load %arg15[%c0_294, %c0_295] : memref<8x128xf32, #tpu.memory_space<vmem>>, vector<8x128xf32>
    %526 = arith.index_cast %c4_i32_291 : i32 to index
    %c0_296 = arith.constant 0 : index
    %c0_297 = arith.constant 0 : index
    %527 = vector.load %arg13[%526, %c0_296, %c0_297] : memref<8x8x512xf32, #tpu.memory_space<vmem>>, vector<1x8x512xf32>
    %528 = vector.shape_cast %527 : vector<1x8x512xf32> to vector<8x512xf32>
    %c1_298 = arith.constant 1 : index
    %c0_299 = arith.constant 0 : index
    %c0_300 = arith.constant 0 : index
    %529 = vector.load %arg3[%c1_298, %c0_299, %c0_300] : memref<2x128x512xf32, #tpu.memory_space<vmem>>, vector<1x128x512xf32>
    %530 = vector.shape_cast %529 : vector<1x128x512xf32> to vector<128x512xf32>
    %cst_301 = arith.constant dense<0.000000e+00> : vector<8x512xf32>
    %531 = tpu.matmul %524, %530, %cst_301 {dimension_numbers = #tpu.dot_dimension_numbers<[1], [0], [0], [1], [0, 0, 1, 1], [], []>} : vector<8x128xf32>, vector<128x512xf32>, vector<8x512xf32> -> vector<8x512xf32>
    %532 = arith.addf %528, %531 : vector<8x512xf32>
    %533 = vector.extract_strided_slice %532 {offsets = [0, 0], sizes = [8, 128], strides = [1, 1]} : vector<8x512xf32> to vector<8x128xf32>
    %534 = arith.negf %533 : vector<8x128xf32>
    %535 = math.exp %534 : vector<8x128xf32>
    %cst_302 = arith.constant 1.000000e+00 : f32
    %536 = vector.broadcast %cst_302 : f32 to vector<8x128xf32>
    %537 = arith.addf %536, %535 : vector<8x128xf32>
    %538 = arith.divf %536, %537 : vector<8x128xf32>
    %539 = vector.extract_strided_slice %532 {offsets = [0, 128], sizes = [8, 128], strides = [1, 1]} : vector<8x512xf32> to vector<8x128xf32>
    %540 = arith.negf %539 : vector<8x128xf32>
    %541 = math.exp %540 : vector<8x128xf32>
    %cst_303 = arith.constant 1.000000e+00 : f32
    %542 = vector.broadcast %cst_303 : f32 to vector<8x128xf32>
    %543 = arith.addf %542, %541 : vector<8x128xf32>
    %544 = arith.divf %542, %543 : vector<8x128xf32>
    %545 = vector.extract_strided_slice %532 {offsets = [0, 256], sizes = [8, 128], strides = [1, 1]} : vector<8x512xf32> to vector<8x128xf32>
    %546 = math.tanh %545 : vector<8x128xf32>
    %547 = vector.extract_strided_slice %532 {offsets = [0, 384], sizes = [8, 128], strides = [1, 1]} : vector<8x512xf32> to vector<8x128xf32>
    %548 = arith.negf %547 : vector<8x128xf32>
    %549 = math.exp %548 : vector<8x128xf32>
    %cst_304 = arith.constant 1.000000e+00 : f32
    %550 = vector.broadcast %cst_304 : f32 to vector<8x128xf32>
    %551 = arith.addf %550, %549 : vector<8x128xf32>
    %552 = arith.divf %550, %551 : vector<8x128xf32>
    %553 = arith.mulf %544, %525 : vector<8x128xf32>
    %554 = arith.mulf %538, %546 : vector<8x128xf32>
    %555 = arith.addf %553, %554 : vector<8x128xf32>
    %556 = math.tanh %555 : vector<8x128xf32>
    %557 = arith.mulf %552, %556 : vector<8x128xf32>
    %c0_305 = arith.constant 0 : index
    %c0_306 = arith.constant 0 : index
    %558 = vector.load %arg14[%c0_305, %c0_306] : memref<8x128xf32, #tpu.memory_space<vmem>>, vector<8x128xf32>
    tpu.vector_store %arg14[%c0_305, %c0_306], %557 {strides = array<i32>} : memref<8x128xf32, #tpu.memory_space<vmem>>, vector<8x128xf32>,
    %c0_307 = arith.constant 0 : index
    %c0_308 = arith.constant 0 : index
    %559 = vector.load %arg15[%c0_307, %c0_308] : memref<8x128xf32, #tpu.memory_space<vmem>>, vector<8x128xf32>
    tpu.vector_store %arg15[%c0_307, %c0_308], %555 {strides = array<i32>} : memref<8x128xf32, #tpu.memory_space<vmem>>, vector<8x128xf32>,
    %560 = arith.index_cast %c4_i32_291 : i32 to index
    %c0_309 = arith.constant 0 : index
    %c0_310 = arith.constant 0 : index
    %561 = vector.load %arg12[%560, %c0_309, %c0_310] : memref<8x8x128xf32, #tpu.memory_space<vmem>>, vector<1x8x128xf32>
    %562 = vector.shape_cast %561 : vector<1x8x128xf32> to vector<8x128xf32>
    %563 = vector.shape_cast %557 : vector<8x128xf32> to vector<1x8x128xf32>
    tpu.vector_store %arg12[%560, %c0_309, %c0_310], %563 {strides = array<i32>} : memref<8x8x128xf32, #tpu.memory_space<vmem>>, vector<1x8x128xf32>,
    %c5_i32_311 = arith.constant 5 : i32
    %c0_312 = arith.constant 0 : index
    %c0_313 = arith.constant 0 : index
    %564 = vector.load %arg14[%c0_312, %c0_313] : memref<8x128xf32, #tpu.memory_space<vmem>>, vector<8x128xf32>
    %c0_314 = arith.constant 0 : index
    %c0_315 = arith.constant 0 : index
    %565 = vector.load %arg15[%c0_314, %c0_315] : memref<8x128xf32, #tpu.memory_space<vmem>>, vector<8x128xf32>
    %566 = arith.index_cast %c5_i32_311 : i32 to index
    %c0_316 = arith.constant 0 : index
    %c0_317 = arith.constant 0 : index
    %567 = vector.load %arg13[%566, %c0_316, %c0_317] : memref<8x8x512xf32, #tpu.memory_space<vmem>>, vector<1x8x512xf32>
    %568 = vector.shape_cast %567 : vector<1x8x512xf32> to vector<8x512xf32>
    %c1_318 = arith.constant 1 : index
    %c0_319 = arith.constant 0 : index
    %c0_320 = arith.constant 0 : index
    %569 = vector.load %arg3[%c1_318, %c0_319, %c0_320] : memref<2x128x512xf32, #tpu.memory_space<vmem>>, vector<1x128x512xf32>
    %570 = vector.shape_cast %569 : vector<1x128x512xf32> to vector<128x512xf32>
    %cst_321 = arith.constant dense<0.000000e+00> : vector<8x512xf32>
    %571 = tpu.matmul %564, %570, %cst_321 {dimension_numbers = #tpu.dot_dimension_numbers<[1], [0], [0], [1], [0, 0, 1, 1], [], []>} : vector<8x128xf32>, vector<128x512xf32>, vector<8x512xf32> -> vector<8x512xf32>
    %572 = arith.addf %568, %571 : vector<8x512xf32>
    %573 = vector.extract_strided_slice %572 {offsets = [0, 0], sizes = [8, 128], strides = [1, 1]} : vector<8x512xf32> to vector<8x128xf32>
    %574 = arith.negf %573 : vector<8x128xf32>
    %575 = math.exp %574 : vector<8x128xf32>
    %cst_322 = arith.constant 1.000000e+00 : f32
    %576 = vector.broadcast %cst_322 : f32 to vector<8x128xf32>
    %577 = arith.addf %576, %575 : vector<8x128xf32>
    %578 = arith.divf %576, %577 : vector<8x128xf32>
    %579 = vector.extract_strided_slice %572 {offsets = [0, 128], sizes = [8, 128], strides = [1, 1]} : vector<8x512xf32> to vector<8x128xf32>
    %580 = arith.negf %579 : vector<8x128xf32>
    %581 = math.exp %580 : vector<8x128xf32>
    %cst_323 = arith.constant 1.000000e+00 : f32
    %582 = vector.broadcast %cst_323 : f32 to vector<8x128xf32>
    %583 = arith.addf %582, %581 : vector<8x128xf32>
    %584 = arith.divf %582, %583 : vector<8x128xf32>
    %585 = vector.extract_strided_slice %572 {offsets = [0, 256], sizes = [8, 128], strides = [1, 1]} : vector<8x512xf32> to vector<8x128xf32>
    %586 = math.tanh %585 : vector<8x128xf32>
    %587 = vector.extract_strided_slice %572 {offsets = [0, 384], sizes = [8, 128], strides = [1, 1]} : vector<8x512xf32> to vector<8x128xf32>
    %588 = arith.negf %587 : vector<8x128xf32>
    %589 = math.exp %588 : vector<8x128xf32>
    %cst_324 = arith.constant 1.000000e+00 : f32
    %590 = vector.broadcast %cst_324 : f32 to vector<8x128xf32>
    %591 = arith.addf %590, %589 : vector<8x128xf32>
    %592 = arith.divf %590, %591 : vector<8x128xf32>
    %593 = arith.mulf %584, %565 : vector<8x128xf32>
    %594 = arith.mulf %578, %586 : vector<8x128xf32>
    %595 = arith.addf %593, %594 : vector<8x128xf32>
    %596 = math.tanh %595 : vector<8x128xf32>
    %597 = arith.mulf %592, %596 : vector<8x128xf32>
    %c0_325 = arith.constant 0 : index
    %c0_326 = arith.constant 0 : index
    %598 = vector.load %arg14[%c0_325, %c0_326] : memref<8x128xf32, #tpu.memory_space<vmem>>, vector<8x128xf32>
    tpu.vector_store %arg14[%c0_325, %c0_326], %597 {strides = array<i32>} : memref<8x128xf32, #tpu.memory_space<vmem>>, vector<8x128xf32>,
    %c0_327 = arith.constant 0 : index
    %c0_328 = arith.constant 0 : index
    %599 = vector.load %arg15[%c0_327, %c0_328] : memref<8x128xf32, #tpu.memory_space<vmem>>, vector<8x128xf32>
    tpu.vector_store %arg15[%c0_327, %c0_328], %595 {strides = array<i32>} : memref<8x128xf32, #tpu.memory_space<vmem>>, vector<8x128xf32>,
    %600 = arith.index_cast %c5_i32_311 : i32 to index
    %c0_329 = arith.constant 0 : index
    %c0_330 = arith.constant 0 : index
    %601 = vector.load %arg12[%600, %c0_329, %c0_330] : memref<8x8x128xf32, #tpu.memory_space<vmem>>, vector<1x8x128xf32>
    %602 = vector.shape_cast %601 : vector<1x8x128xf32> to vector<8x128xf32>
    %603 = vector.shape_cast %597 : vector<8x128xf32> to vector<1x8x128xf32>
    tpu.vector_store %arg12[%600, %c0_329, %c0_330], %603 {strides = array<i32>} : memref<8x8x128xf32, #tpu.memory_space<vmem>>, vector<1x8x128xf32>,
    %c6_i32_331 = arith.constant 6 : i32
    %c0_332 = arith.constant 0 : index
    %c0_333 = arith.constant 0 : index
    %604 = vector.load %arg14[%c0_332, %c0_333] : memref<8x128xf32, #tpu.memory_space<vmem>>, vector<8x128xf32>
    %c0_334 = arith.constant 0 : index
    %c0_335 = arith.constant 0 : index
    %605 = vector.load %arg15[%c0_334, %c0_335] : memref<8x128xf32, #tpu.memory_space<vmem>>, vector<8x128xf32>
    %606 = arith.index_cast %c6_i32_331 : i32 to index
    %c0_336 = arith.constant 0 : index
    %c0_337 = arith.constant 0 : index
    %607 = vector.load %arg13[%606, %c0_336, %c0_337] : memref<8x8x512xf32, #tpu.memory_space<vmem>>, vector<1x8x512xf32>
    %608 = vector.shape_cast %607 : vector<1x8x512xf32> to vector<8x512xf32>
    %c1_338 = arith.constant 1 : index
    %c0_339 = arith.constant 0 : index
    %c0_340 = arith.constant 0 : index
    %609 = vector.load %arg3[%c1_338, %c0_339, %c0_340] : memref<2x128x512xf32, #tpu.memory_space<vmem>>, vector<1x128x512xf32>
    %610 = vector.shape_cast %609 : vector<1x128x512xf32> to vector<128x512xf32>
    %cst_341 = arith.constant dense<0.000000e+00> : vector<8x512xf32>
    %611 = tpu.matmul %604, %610, %cst_341 {dimension_numbers = #tpu.dot_dimension_numbers<[1], [0], [0], [1], [0, 0, 1, 1], [], []>} : vector<8x128xf32>, vector<128x512xf32>, vector<8x512xf32> -> vector<8x512xf32>
    %612 = arith.addf %608, %611 : vector<8x512xf32>
    %613 = vector.extract_strided_slice %612 {offsets = [0, 0], sizes = [8, 128], strides = [1, 1]} : vector<8x512xf32> to vector<8x128xf32>
    %614 = arith.negf %613 : vector<8x128xf32>
    %615 = math.exp %614 : vector<8x128xf32>
    %cst_342 = arith.constant 1.000000e+00 : f32
    %616 = vector.broadcast %cst_342 : f32 to vector<8x128xf32>
    %617 = arith.addf %616, %615 : vector<8x128xf32>
    %618 = arith.divf %616, %617 : vector<8x128xf32>
    %619 = vector.extract_strided_slice %612 {offsets = [0, 128], sizes = [8, 128], strides = [1, 1]} : vector<8x512xf32> to vector<8x128xf32>
    %620 = arith.negf %619 : vector<8x128xf32>
    %621 = math.exp %620 : vector<8x128xf32>
    %cst_343 = arith.constant 1.000000e+00 : f32
    %622 = vector.broadcast %cst_343 : f32 to vector<8x128xf32>
    %623 = arith.addf %622, %621 : vector<8x128xf32>
    %624 = arith.divf %622, %623 : vector<8x128xf32>
    %625 = vector.extract_strided_slice %612 {offsets = [0, 256], sizes = [8, 128], strides = [1, 1]} : vector<8x512xf32> to vector<8x128xf32>
    %626 = math.tanh %625 : vector<8x128xf32>
    %627 = vector.extract_strided_slice %612 {offsets = [0, 384], sizes = [8, 128], strides = [1, 1]} : vector<8x512xf32> to vector<8x128xf32>
    %628 = arith.negf %627 : vector<8x128xf32>
    %629 = math.exp %628 : vector<8x128xf32>
    %cst_344 = arith.constant 1.000000e+00 : f32
    %630 = vector.broadcast %cst_344 : f32 to vector<8x128xf32>
    %631 = arith.addf %630, %629 : vector<8x128xf32>
    %632 = arith.divf %630, %631 : vector<8x128xf32>
    %633 = arith.mulf %624, %605 : vector<8x128xf32>
    %634 = arith.mulf %618, %626 : vector<8x128xf32>
    %635 = arith.addf %633, %634 : vector<8x128xf32>
    %636 = math.tanh %635 : vector<8x128xf32>
    %637 = arith.mulf %632, %636 : vector<8x128xf32>
    %c0_345 = arith.constant 0 : index
    %c0_346 = arith.constant 0 : index
    %638 = vector.load %arg14[%c0_345, %c0_346] : memref<8x128xf32, #tpu.memory_space<vmem>>, vector<8x128xf32>
    tpu.vector_store %arg14[%c0_345, %c0_346], %637 {strides = array<i32>} : memref<8x128xf32, #tpu.memory_space<vmem>>, vector<8x128xf32>,
    %c0_347 = arith.constant 0 : index
    %c0_348 = arith.constant 0 : index
    %639 = vector.load %arg15[%c0_347, %c0_348] : memref<8x128xf32, #tpu.memory_space<vmem>>, vector<8x128xf32>
    tpu.vector_store %arg15[%c0_347, %c0_348], %635 {strides = array<i32>} : memref<8x128xf32, #tpu.memory_space<vmem>>, vector<8x128xf32>,
    %640 = arith.index_cast %c6_i32_331 : i32 to index
    %c0_349 = arith.constant 0 : index
    %c0_350 = arith.constant 0 : index
    %641 = vector.load %arg12[%640, %c0_349, %c0_350] : memref<8x8x128xf32, #tpu.memory_space<vmem>>, vector<1x8x128xf32>
    %642 = vector.shape_cast %641 : vector<1x8x128xf32> to vector<8x128xf32>
    %643 = vector.shape_cast %637 : vector<8x128xf32> to vector<1x8x128xf32>
    tpu.vector_store %arg12[%640, %c0_349, %c0_350], %643 {strides = array<i32>} : memref<8x8x128xf32, #tpu.memory_space<vmem>>, vector<1x8x128xf32>,
    %c7_i32_351 = arith.constant 7 : i32
    %c0_352 = arith.constant 0 : index
    %c0_353 = arith.constant 0 : index
    %644 = vector.load %arg14[%c0_352, %c0_353] : memref<8x128xf32, #tpu.memory_space<vmem>>, vector<8x128xf32>
    %c0_354 = arith.constant 0 : index
    %c0_355 = arith.constant 0 : index
    %645 = vector.load %arg15[%c0_354, %c0_355] : memref<8x128xf32, #tpu.memory_space<vmem>>, vector<8x128xf32>
    %646 = arith.index_cast %c7_i32_351 : i32 to index
    %c0_356 = arith.constant 0 : index
    %c0_357 = arith.constant 0 : index
    %647 = vector.load %arg13[%646, %c0_356, %c0_357] : memref<8x8x512xf32, #tpu.memory_space<vmem>>, vector<1x8x512xf32>
    %648 = vector.shape_cast %647 : vector<1x8x512xf32> to vector<8x512xf32>
    %c1_358 = arith.constant 1 : index
    %c0_359 = arith.constant 0 : index
    %c0_360 = arith.constant 0 : index
    %649 = vector.load %arg3[%c1_358, %c0_359, %c0_360] : memref<2x128x512xf32, #tpu.memory_space<vmem>>, vector<1x128x512xf32>
    %650 = vector.shape_cast %649 : vector<1x128x512xf32> to vector<128x512xf32>
    %cst_361 = arith.constant dense<0.000000e+00> : vector<8x512xf32>
    %651 = tpu.matmul %644, %650, %cst_361 {dimension_numbers = #tpu.dot_dimension_numbers<[1], [0], [0], [1], [0, 0, 1, 1], [], []>} : vector<8x128xf32>, vector<128x512xf32>, vector<8x512xf32> -> vector<8x512xf32>
    %652 = arith.addf %648, %651 : vector<8x512xf32>
    %653 = vector.extract_strided_slice %652 {offsets = [0, 0], sizes = [8, 128], strides = [1, 1]} : vector<8x512xf32> to vector<8x128xf32>
    %654 = arith.negf %653 : vector<8x128xf32>
    %655 = math.exp %654 : vector<8x128xf32>
    %cst_362 = arith.constant 1.000000e+00 : f32
    %656 = vector.broadcast %cst_362 : f32 to vector<8x128xf32>
    %657 = arith.addf %656, %655 : vector<8x128xf32>
    %658 = arith.divf %656, %657 : vector<8x128xf32>
    %659 = vector.extract_strided_slice %652 {offsets = [0, 128], sizes = [8, 128], strides = [1, 1]} : vector<8x512xf32> to vector<8x128xf32>
    %660 = arith.negf %659 : vector<8x128xf32>
    %661 = math.exp %660 : vector<8x128xf32>
    %cst_363 = arith.constant 1.000000e+00 : f32
    %662 = vector.broadcast %cst_363 : f32 to vector<8x128xf32>
    %663 = arith.addf %662, %661 : vector<8x128xf32>
    %664 = arith.divf %662, %663 : vector<8x128xf32>
    %665 = vector.extract_strided_slice %652 {offsets = [0, 256], sizes = [8, 128], strides = [1, 1]} : vector<8x512xf32> to vector<8x128xf32>
    %666 = math.tanh %665 : vector<8x128xf32>
    %667 = vector.extract_strided_slice %652 {offsets = [0, 384], sizes = [8, 128], strides = [1, 1]} : vector<8x512xf32> to vector<8x128xf32>
    %668 = arith.negf %667 : vector<8x128xf32>
    %669 = math.exp %668 : vector<8x128xf32>
    %cst_364 = arith.constant 1.000000e+00 : f32
    %670 = vector.broadcast %cst_364 : f32 to vector<8x128xf32>
    %671 = arith.addf %670, %669 : vector<8x128xf32>
    %672 = arith.divf %670, %671 : vector<8x128xf32>
    %673 = arith.mulf %664, %645 : vector<8x128xf32>
    %674 = arith.mulf %658, %666 : vector<8x128xf32>
    %675 = arith.addf %673, %674 : vector<8x128xf32>
    %676 = math.tanh %675 : vector<8x128xf32>
    %677 = arith.mulf %672, %676 : vector<8x128xf32>
    %c0_365 = arith.constant 0 : index
    %c0_366 = arith.constant 0 : index
    %678 = vector.load %arg14[%c0_365, %c0_366] : memref<8x128xf32, #tpu.memory_space<vmem>>, vector<8x128xf32>
    tpu.vector_store %arg14[%c0_365, %c0_366], %677 {strides = array<i32>} : memref<8x128xf32, #tpu.memory_space<vmem>>, vector<8x128xf32>,
    %c0_367 = arith.constant 0 : index
    %c0_368 = arith.constant 0 : index
    %679 = vector.load %arg15[%c0_367, %c0_368] : memref<8x128xf32, #tpu.memory_space<vmem>>, vector<8x128xf32>
    tpu.vector_store %arg15[%c0_367, %c0_368], %675 {strides = array<i32>} : memref<8x128xf32, #tpu.memory_space<vmem>>, vector<8x128xf32>,
    %680 = arith.index_cast %c7_i32_351 : i32 to index
    %c0_369 = arith.constant 0 : index
    %c0_370 = arith.constant 0 : index
    %681 = vector.load %arg12[%680, %c0_369, %c0_370] : memref<8x8x128xf32, #tpu.memory_space<vmem>>, vector<1x8x128xf32>
    %682 = vector.shape_cast %681 : vector<1x8x128xf32> to vector<8x128xf32>
    %683 = vector.shape_cast %677 : vector<8x128xf32> to vector<1x8x128xf32>
    tpu.vector_store %arg12[%680, %c0_369, %c0_370], %683 {strides = array<i32>} : memref<8x8x128xf32, #tpu.memory_space<vmem>>, vector<1x8x128xf32>,
    %c8_i32_371 = arith.constant 8 : i32
    %c0_372 = arith.constant 0 : index
    %c0_373 = arith.constant 0 : index
    %684 = vector.load %arg14[%c0_372, %c0_373] : memref<8x128xf32, #tpu.memory_space<vmem>>, vector<8x128xf32>
    %c1_374 = arith.constant 1 : index
    %c0_375 = arith.constant 0 : index
    %c0_376 = arith.constant 0 : index
    %685 = vector.load %arg10[%c1_374, %c0_375, %c0_376] : memref<2x8x128xf32, #tpu.memory_space<vmem>>, vector<1x8x128xf32>
    %686 = vector.shape_cast %685 : vector<1x8x128xf32> to vector<8x128xf32>
    %687 = vector.shape_cast %684 : vector<8x128xf32> to vector<1x8x128xf32>
    tpu.vector_store %arg10[%c1_374, %c0_375, %c0_376], %687 {strides = array<i32>} : memref<2x8x128xf32, #tpu.memory_space<vmem>>, vector<1x8x128xf32>,
    %c0_377 = arith.constant 0 : index
    %c0_378 = arith.constant 0 : index
    %688 = vector.load %arg15[%c0_377, %c0_378] : memref<8x128xf32, #tpu.memory_space<vmem>>, vector<8x128xf32>
    %c1_379 = arith.constant 1 : index
    %c0_380 = arith.constant 0 : index
    %c0_381 = arith.constant 0 : index
    %689 = vector.load %arg11[%c1_379, %c0_380, %c0_381] : memref<2x8x128xf32, #tpu.memory_space<vmem>>, vector<1x8x128xf32>
    %690 = vector.shape_cast %689 : vector<1x8x128xf32> to vector<8x128xf32>
    %691 = vector.shape_cast %688 : vector<8x128xf32> to vector<1x8x128xf32>
    tpu.vector_store %arg11[%c1_379, %c0_380, %c0_381], %691 {strides = array<i32>} : memref<2x8x128xf32, #tpu.memory_space<vmem>>, vector<1x8x128xf32>,
    %c0_382 = arith.constant 0 : index
    %c0_383 = arith.constant 0 : index
    %c0_384 = arith.constant 0 : index
    %692 = vector.load %arg12[%c0_382, %c0_383, %c0_384] : memref<8x8x128xf32, #tpu.memory_space<vmem>>, vector<8x8x128xf32>
    %693 = vector.shape_cast %692 : vector<8x8x128xf32> to vector<64x128xf32>
    %c0_385 = arith.constant 0 : index
    %c0_386 = arith.constant 0 : index
    %694 = vector.load %arg7[%c0_385, %c0_386] : memref<128x128xf32, #tpu.memory_space<vmem>>, vector<128x128xf32>
    %cst_387 = arith.constant dense<0.000000e+00> : vector<64x128xf32>
    %695 = tpu.matmul %693, %694, %cst_387 {dimension_numbers = #tpu.dot_dimension_numbers<[1], [0], [0], [1], [0, 0, 1, 1], [], []>} : vector<64x128xf32>, vector<128x128xf32>, vector<64x128xf32> -> vector<64x128xf32>
    %c0_388 = arith.constant 0 : index
    %c0_389 = arith.constant 0 : index
    %696 = vector.load %arg8[%c0_388, %c0_389] : memref<1x128xf32, #tpu.memory_space<vmem>>, vector<1x128xf32>
    %697 = vector.broadcast %696 : vector<1x128xf32> to vector<64x128xf32>
    %698 = arith.addf %695, %697 : vector<64x128xf32>
    %c0_390 = arith.constant 0 : index
    %c0_391 = arith.constant 0 : index
    %699 = vector.load %arg9[%c0_390, %c0_391] : memref<64x128xf32, #tpu.memory_space<vmem>>, vector<64x128xf32>
    tpu.vector_store %arg9[%c0_390, %c0_391], %698 {strides = array<i32>} : memref<64x128xf32, #tpu.memory_space<vmem>>, vector<64x128xf32>,
    return
  }
  func.func @transform_0(%arg0: i32) -> (i32, i32, i32) {
    %c0_i32 = arith.constant 0 : i32
    %c0_i32_0 = arith.constant 0 : i32
    %c0_i32_1 = arith.constant 0 : i32
    %c0_i32_2 = arith.constant 0 : i32
    return %c0_i32, %c0_i32_0, %c0_i32_1 : i32, i32, i32
  }
  func.func @transform_1(%arg0: i32) -> (i32, i32, i32) {
    %c0_i32 = arith.constant 0 : i32
    %c0_i32_0 = arith.constant 0 : i32
    %c0_i32_1 = arith.constant 0 : i32
    %c0_i32_2 = arith.constant 0 : i32
    return %c0_i32, %c0_i32_0, %c0_i32_1 : i32, i32, i32
  }
  func.func @transform_2(%arg0: i32) -> (i32, i32, i32) {
    %c0_i32 = arith.constant 0 : i32
    %c0_i32_0 = arith.constant 0 : i32
    %c0_i32_1 = arith.constant 0 : i32
    %c0_i32_2 = arith.constant 0 : i32
    return %c0_i32, %c0_i32_0, %c0_i32_1 : i32, i32, i32
  }
  func.func @transform_3(%arg0: i32) -> (i32, i32, i32) {
    %c0_i32 = arith.constant 0 : i32
    %c0_i32_0 = arith.constant 0 : i32
    %c0_i32_1 = arith.constant 0 : i32
    %c0_i32_2 = arith.constant 0 : i32
    return %c0_i32, %c0_i32_0, %c0_i32_1 : i32, i32, i32
  }
  func.func @transform_4(%arg0: i32) -> (i32, i32, i32) {
    %c0_i32 = arith.constant 0 : i32
    %c0_i32_0 = arith.constant 0 : i32
    %c0_i32_1 = arith.constant 0 : i32
    %c0_i32_2 = arith.constant 0 : i32
    return %c0_i32, %c0_i32_0, %c0_i32_1 : i32, i32, i32
  }
  func.func @transform_5(%arg0: i32) -> (i32, i32, i32) {
    %c0_i32 = arith.constant 0 : i32
    %c0_i32_0 = arith.constant 0 : i32
    %c0_i32_1 = arith.constant 0 : i32
    %c0_i32_2 = arith.constant 0 : i32
    return %c0_i32, %c0_i32_0, %c0_i32_1 : i32, i32, i32
  }
  func.func @transform_6(%arg0: i32) -> (i32, i32) {
    %c0_i32 = arith.constant 0 : i32
    %c0_i32_0 = arith.constant 0 : i32
    %c0_i32_1 = arith.constant 0 : i32
    return %c0_i32, %c0_i32_0 : i32, i32
  }
  func.func @transform_7(%arg0: i32) -> (i32, i32) {
    %c0_i32 = arith.constant 0 : i32
    %c0_i32_0 = arith.constant 0 : i32
    %c0_i32_1 = arith.constant 0 : i32
    return %c0_i32, %c0_i32_0 : i32, i32
  }
  func.func @transform_8(%arg0: i32) -> (i32, i32) {
    %c0_i32 = arith.constant 0 : i32
    %c0_i32_0 = arith.constant 0 : i32
    %c0_i32_1 = arith.constant 0 : i32
    return %c0_i32, %c0_i32_0 : i32, i32
  }
  func.func @transform_9(%arg0: i32) -> (i32, i32, i32) {
    %c0_i32 = arith.constant 0 : i32
    %c0_i32_0 = arith.constant 0 : i32
    %c0_i32_1 = arith.constant 0 : i32
    %c0_i32_2 = arith.constant 0 : i32
    return %c0_i32, %c0_i32_0, %c0_i32_1 : i32, i32, i32
  }
  func.func @transform_10(%arg0: i32) -> (i32, i32, i32) {
    %c0_i32 = arith.constant 0 : i32
    %c0_i32_0 = arith.constant 0 : i32
    %c0_i32_1 = arith.constant 0 : i32
    %c0_i32_2 = arith.constant 0 : i32
    return %c0_i32, %c0_i32_0, %c0_i32_1 : i32, i32, i32
  }
}

</mosaic_0001>

<bundles_post_ra>
// kernel: char_rnn_forward.1
= control target key start
LH: loop header
LB: loop body
LE: loop exit
PB: predicated region body
PF: predicated region fallthrough
CT: control target
= control target key end

     0   :  { %16 = vsyncpa [#allocation7], 0  ;;  %v9488_v6 = vmov 0.0   ;;  %s9475_s0 = inlined_call_operand.vmem [shape: f32[8,8,128], index: 0, kind: input, shape index: {}]   ;;  %s9476_s1 = inlined_call_operand.vmem [shape: f32[2,128,512], index: 1, kind: input, shape index: {}]   ;;  %s9477_s2 = inlined_call_operand.vmem [shape: f32[2,128,512], index: 2, kind: input, shape index: {}]   ;;  %s9478_s3 = inlined_call_operand.vmem [shape: f32[2,1,512], index: 3, kind: input, shape index: {}]   ;;  %s9479_s4 = inlined_call_operand.vmem [shape: f32[2,8,128], index: 4, kind: input, shape index: {}, may-alias: {4,5}]   ;;  %s9480_s5 = inlined_call_operand.vmem [shape: f32[2,8,128], index: 5, kind: input, shape index: {}, may-alias: {4,5}]   ;;  %s9481_s6 = inlined_call_operand.vmem [shape: f32[128,128], index: 6, kind: input, shape index: {}]   ;;  %s9482_s7 = inlined_call_operand.vmem [shape: f32[1,128], index: 7, kind: input, shape index: {}]   ;;  %s9483_s8 = inlined_call_operand.vmem [shape: f32[64,128], index: 8, kind: output, shape index: {0}]   ;;  %s9484_s9 = inlined_call_operand.hbm [shape: f32[2,8,128], index: 9, kind: output, shape index: {1}]   ;;  %s9485_s10 = inlined_call_operand.hbm [shape: f32[2,8,128], index: 10, kind: output, shape index: {2}]  }
   0x1   :  { %v119_v0 = vld [vmem:[%s9476_s1 + $0x1e8] sm:$0xff]  ;;  %v118_v1 = vld [vmem:[%s9476_s1 + $0x1e0] sm:$0xff]  ;;  %208 = vmatprep.mubr.f32.mxu1 %v9488_v6  ;;  %540 = vmatprep.mubr.f32.mxu0 %v9488_v6 }
   0x2   :  { %v115_v2 = vld [vmem:[%s9476_s1 + $0x1c8] sm:$0xff]  ;;  %144 = vmatprep.subr.mxu1 %v119_v0  ;;  %v114_v4 = vld [vmem:[%s9476_s1 + $0x1c0] sm:$0xff] }
   0x3   :  { %v5932_v3 = vld [vmem:[%s9477_s2 + $0x1e8] sm:$0xff]  ;;  %v5940_v5 = vld [vmem:[%s9477_s2 + $0x1e0] sm:$0xff]  ;;  %145 = vmatpush1.msra.mxu1 %v118_v1  ;;  %v121_v1 = vld [vmem:[%s9476_s1 + $0x1f8] sm:$0xff] }
   0x4   :  { %476 = vmatprep.subr.mxu0 %v5932_v3  ;;  %v111_v7 = vld [vmem:[%s9476_s1 + $0x1a8] sm:$0xff]  ;;  %146 = vmatprep.subr.mxu1 %v115_v2  ;;  %v110_v9 = vld [vmem:[%s9476_s1 + $0x1a0] sm:$0xff]  ;;  %v120_v2 = vld [vmem:[%s9476_s1 + $0x1f0] sm:$0xff] }
   0x5   :  { %v5950_v8 = vld [vmem:[%s9477_s2 + $0x1c8] sm:$0xff]  ;;  %477 = vmatpush1.msra.mxu0 %v5940_v5  ;;  %v5959_v10 = vld [vmem:[%s9477_s2 + $0x1c0] sm:$0xff]  ;;  %147 = vmatpush1.msra.mxu1 %v114_v4 }
   0x6   :  { %v5964_v11 = vld [vmem:[%s9477_s2 + $0x1a8] sm:$0xff]  ;;  %478 = vmatprep.subr.mxu0 %v5950_v8  ;;  %v5973_v13 = vld [vmem:[%s9477_s2 + $0x1a0] sm:$0xff]  ;;  %148 = vmatprep.subr.mxu1 %v111_v7  ;;  %v117_v7 = vld [vmem:[%s9476_s1 + $0x1d8] sm:$0xff] }
   0x7   :  { %v107_v12 = vld [vmem:[%s9476_s1 + $0x188] sm:$0xff]  ;;  %479 = vmatpush1.msra.mxu0 %v5959_v10  ;;  %v106_v14 = vld [vmem:[%s9476_s1 + $0x180] sm:$0xff]  ;;  %149 = vmatpush1.msra.mxu1 %v110_v9 }
   0x8   :  { %v5982_v15 = vld [vmem:[%s9477_s2 + $0x188] sm:$0xff]  ;;  %480 = vmatprep.subr.mxu0 %v5964_v11  ;;  %v5991_v17 = vld [vmem:[%s9477_s2 + $0x180] sm:$0xff]  ;;  %150 = vmatprep.subr.mxu1 %v107_v12  ;;  %v116_v12 = vld [vmem:[%s9476_s1 + $0x1d0] sm:$0xff] }
   0x9   :  { %v103_v16 = vld [vmem:[%s9476_s1 + $0x168] sm:$0xff]  ;;  %481 = vmatpush1.msra.mxu0 %v5973_v13  ;;  %v102_v18 = vld [vmem:[%s9476_s1 + $0x160] sm:$0xff]  ;;  %151 = vmatpush1.msra.mxu1 %v106_v14 }
   0xa   :  { %v6000_v19 = vld [vmem:[%s9477_s2 + $0x168] sm:$0xff]  ;;  %482 = vmatprep.subr.mxu0 %v5982_v15  ;;  %v6009_v21 = vld [vmem:[%s9477_s2 + $0x160] sm:$0xff]  ;;  %152 = vmatprep.subr.mxu1 %v103_v16  ;;  %v113_v16 = vld [vmem:[%s9476_s1 + $0x1b8] sm:$0xff] }
   0xb   :  { %v99_v20 = vld [vmem:[%s9476_s1 + $0x148] sm:$0xff]  ;;  %483 = vmatpush1.msra.mxu0 %v5991_v17  ;;  %v98_v22 = vld [vmem:[%s9476_s1 + $0x140] sm:$0xff]  ;;  %153 = vmatpush1.msra.mxu1 %v102_v18  ;;  %v112_v18 = vld [vmem:[%s9476_s1 + $0x1b0] sm:$0xff] }
   0xc   :  { %v6018_v23 = vld [vmem:[%s9477_s2 + $0x148] sm:$0xff]  ;;  %484 = vmatprep.subr.mxu0 %v6000_v19  ;;  %v6027_v25 = vld [vmem:[%s9477_s2 + $0x140] sm:$0xff]  ;;  %154 = vmatprep.subr.mxu1 %v99_v20  ;;  %v109_v20 = vld [vmem:[%s9476_s1 + $0x198] sm:$0xff] }
   0xd   :  { %v95_v24 = vld [vmem:[%s9476_s1 + $0x128] sm:$0xff]  ;;  %485 = vmatpush1.msra.mxu0 %v6009_v21  ;;  %v94_v26 = vld [vmem:[%s9476_s1 + $0x120] sm:$0xff]  ;;  %155 = vmatpush1.msra.mxu1 %v98_v22  ;;  %v108_v22 = vld [vmem:[%s9476_s1 + $0x190] sm:$0xff] }
   0xe   :  { %v6036_v27 = vld [vmem:[%s9477_s2 + $0x128] sm:$0xff]  ;;  %486 = vmatprep.subr.mxu0 %v6018_v23  ;;  %v6045_v29 = vld [vmem:[%s9477_s2 + $0x120] sm:$0xff]  ;;  %156 = vmatprep.subr.mxu1 %v95_v24  ;;  %v6258_v24 = vld [vmem:[%s9475_s0 + $0x10] sm:$0xff] }
   0xf   :  { %v91_v28 = vld [vmem:[%s9476_s1 + $0x108] sm:$0xff]  ;;  %487 = vmatpush1.msra.mxu0 %v6027_v25  ;;  %v90_v30 = vld [vmem:[%s9476_s1 + $0x100] sm:$0xff]  ;;  %157 = vmatpush1.msra.mxu1 %v94_v26  ;;  %v105_v26 = vld [vmem:[%s9476_s1 + $0x178] sm:$0xff] }
  0x10   :  { %v6054_v31 = vld [vmem:[%s9477_s2 + $0x108] sm:$0xff]  ;;  %488 = vmatprep.subr.mxu0 %v6036_v27  ;;  %v6063_v33 = vld [vmem:[%s9477_s2 + $0x100] sm:$0xff]  ;;  %158 = vmatprep.subr.mxu1 %v91_v28  ;;  %v101_v28 = vld [vmem:[%s9476_s1 + $0x158] sm:$0xff] }
  0x11   :  { %v87_v32 = vld [vmem:[%s9476_s1 + $0xe8] sm:$0xff]  ;;  %489 = vmatpush1.msra.mxu0 %v6045_v29  ;;  %v86_v34 = vld [vmem:[%s9476_s1 + $0xe0] sm:$0xff]  ;;  %159 = vmatpush1.msra.mxu1 %v90_v30  ;;  %v100_v30 = vld [vmem:[%s9476_s1 + $0x150] sm:$0xff] }
  0x12   :  { %v6072_v35 = vld [vmem:[%s9477_s2 + $0xe8] sm:$0xff]  ;;  %490 = vmatprep.subr.mxu0 %v6054_v31  ;;  %v6081_v37 = vld [vmem:[%s9477_s2 + $0xe0] sm:$0xff]  ;;  %160 = vmatprep.subr.mxu1 %v87_v32  ;;  %v97_v32 = vld [vmem:[%s9476_s1 + $0x138] sm:$0xff] }
  0x13   :  { %v83_v36 = vld [vmem:[%s9476_s1 + $0xc8] sm:$0xff]  ;;  %491 = vmatpush1.msra.mxu0 %v6063_v33  ;;  %v82_v38 = vld [vmem:[%s9476_s1 + $0xc0] sm:$0xff]  ;;  %161 = vmatpush1.msra.mxu1 %v86_v34  ;;  %v93_v34 = vld [vmem:[%s9476_s1 + $0x118] sm:$0xff] }
  0x14   :  { %v6090_v39 = vld [vmem:[%s9477_s2 + $0xc8] sm:$0xff]  ;;  %492 = vmatprep.subr.mxu0 %v6072_v35  ;;  %v6099_v41 = vld [vmem:[%s9477_s2 + $0xc0] sm:$0xff]  ;;  %162 = vmatprep.subr.mxu1 %v83_v36  ;;  %v92_v36 = vld [vmem:[%s9476_s1 + $0x110] sm:$0xff] }
  0x15   :  { %v79_v40 = vld [vmem:[%s9476_s1 + $0xa8] sm:$0xff]  ;;  %493 = vmatpush1.msra.mxu0 %v6081_v37  ;;  %v78_v42 = vld [vmem:[%s9476_s1 + $0xa0] sm:$0xff]  ;;  %163 = vmatpush1.msra.mxu1 %v82_v38 }
  0x16   :  { %v6108_v43 = vld [vmem:[%s9477_s2 + $0xa8] sm:$0xff]  ;;  %494 = vmatprep.subr.mxu0 %v6090_v39  ;;  %v6117_v45 = vld [vmem:[%s9477_s2 + $0xa0] sm:$0xff]  ;;  %164 = vmatprep.subr.mxu1 %v79_v40 }
  0x17   :  { %v75_v44 = vld [vmem:[%s9476_s1 + $0x88] sm:$0xff]  ;;  %495 = vmatpush1.msra.mxu0 %v6099_v41  ;;  %v74_v46 = vld [vmem:[%s9476_s1 + $0x80] sm:$0xff]  ;;  %165 = vmatpush1.msra.mxu1 %v78_v42 }
  0x18   :  { %v6126_v47 = vld [vmem:[%s9477_s2 + $0x88] sm:$0xff]  ;;  %496 = vmatprep.subr.mxu0 %v6108_v43  ;;  %v6135_v49 = vld [vmem:[%s9477_s2 + $0x80] sm:$0xff]  ;;  %166 = vmatprep.subr.mxu1 %v75_v44 }
  0x19   :  { %v71_v48 = vld [vmem:[%s9476_s1 + $0x68] sm:$0xff]  ;;  %497 = vmatpush1.msra.mxu0 %v6117_v45  ;;  %v70_v50 = vld [vmem:[%s9476_s1 + $0x60] sm:$0xff]  ;;  %167 = vmatpush1.msra.mxu1 %v74_v46 }
  0x1a   :  { %v6144_v51 = vld [vmem:[%s9477_s2 + $0x68] sm:$0xff]  ;;  %498 = vmatprep.subr.mxu0 %v6126_v47  ;;  %v6153_v53 = vld [vmem:[%s9477_s2 + $0x60] sm:$0xff]  ;;  %168 = vmatprep.subr.mxu1 %v71_v48 }
  0x1b   :  { %v67_v52 = vld [vmem:[%s9476_s1 + $0x48] sm:$0xff]  ;;  %499 = vmatpush1.msra.mxu0 %v6135_v49  ;;  %v66_v54 = vld [vmem:[%s9476_s1 + $0x40] sm:$0xff]  ;;  %169 = vmatpush1.msra.mxu1 %v70_v50 }
  0x1c   :  { %v6162_v55 = vld [vmem:[%s9477_s2 + $0x48] sm:$0xff]  ;;  %500 = vmatprep.subr.mxu0 %v6144_v51  ;;  %v6171_v57 = vld [vmem:[%s9477_s2 + $0x40] sm:$0xff]  ;;  %170 = vmatprep.subr.mxu1 %v67_v52 }
  0x1d   :  { %v63_v56 = vld [vmem:[%s9476_s1 + $0x28] sm:$0xff]  ;;  %501 = vmatpush1.msra.mxu0 %v6153_v53  ;;  %v62_v58 = vld [vmem:[%s9476_s1 + $0x20] sm:$0xff]  ;;  %171 = vmatpush1.msra.mxu1 %v66_v54 }
  0x1e   :  { %v6180_v59 = vld [vmem:[%s9477_s2 + $0x28] sm:$0xff]  ;;  %502 = vmatprep.subr.mxu0 %v6162_v55  ;;  %v6189_v61 = vld [vmem:[%s9477_s2 + $0x20] sm:$0xff]  ;;  %172 = vmatprep.subr.mxu1 %v63_v56 }
  0x1f   :  { %v59_v60 = vld [vmem:[%s9476_s1 + $0x8] sm:$0xff]  ;;  %503 = vmatpush1.msra.mxu0 %v6171_v57  ;;  %v58_v62 = vld [vmem:[%s9476_s1] sm:$0xff]  ;;  %173 = vmatpush1.msra.mxu1 %v62_v58 }
  0x20   :  { %v6198_v63 = vld [vmem:[%s9477_s2 + $0x8] sm:$0xff]  ;;  %504 = vmatprep.subr.mxu0 %v6180_v59  ;;  %v6204_v0 = vld [vmem:[%s9475_s0] sm:$0xff]  ;;  %174 = vmatprep.subr.mxu1 %v59_v60 }
  0x21   :  { %505 = vmatpush1.msra.mxu0 %v6189_v61  ;;  %v6216_v4 = vld [vmem:[%s9477_s2] sm:$0xff]  ;;  %175 = vmatpush1.msra.mxu1 %v58_v62  ;;  %v6236_v14 = vld [vmem:[%s9475_s0 + $0x8] sm:$0xff] }
  0x22   :  { %506 = vmatprep.subr.mxu0 %v6198_v63  ;;  %209 = vmatmul.mubr.f32.vlgmr.msra.gmra.mxu1 %v6204_v0  ;;  %v6226_v9 = vld [vmem:[%s9479_s4] sm:$0xff] }
  0x23   :  { %257 = vmatprep.subr.mxu1 %v121_v1  ;;  %507 = vmatpush1.msra.mxu0 %v6216_v4 }
  0x24   :  { %258 = vmatpush1.msra.mxu1 %v120_v2  ;;  %541 = vmatmul.mubr.f32.vlgmr.msra.gmra.mxu0 %v6226_v9 }
  0x25   :  { %259 = vmatprep.subr.mxu1 %v117_v7  ;;  %214 = vmatprep.mubr.f32.mxu1 %v9488_v6 }
  0x26   :  { %260 = vmatpush1.msra.mxu1 %v116_v12  ;;  %720 = vmatprep.subr.mxu0 %v5932_v3  ;;  %v104_v3 = vld [vmem:[%s9476_s1 + $0x170] sm:$0xff] }
  0x27   :  { %215 = vmatmul.mubr.f32.gmra.mxu1 %v6236_v14  ;;  %261 = vmatprep.subr.mxu1 %v113_v16 }
  0x28   :  { %262 = vmatpush1.msra.mxu1 %v112_v18  ;;  %220 = vmatprep.mubr.f32.mxu1 %v9488_v6 }
  0x29   :  { %263 = vmatprep.subr.mxu1 %v109_v20  ;;  %721 = vmatpush1.msra.mxu0 %v5940_v5  ;;  %v6279_v5 = vld [vmem:[%s9475_s0 + $0x18] sm:$0xff] }
  0x2a   :  { %264 = vmatpush1.msra.mxu1 %v108_v22  ;;  %722 = vmatprep.subr.mxu0 %v5950_v8  ;;  %v96_v8 = vld [vmem:[%s9476_s1 + $0x130] sm:$0xff] }
  0x2b   :  { %221 = vmatmul.mubr.f32.gmra.mxu1 %v6258_v24  ;;  %265 = vmatprep.subr.mxu1 %v105_v26 }
  0x2c   :  { %266 = vmatpush1.msra.mxu1 %v104_v3  ;;  %226 = vmatprep.mubr.f32.mxu1 %v9488_v6 }
  0x2d   :  { %267 = vmatprep.subr.mxu1 %v101_v28  ;;  %723 = vmatpush1.msra.mxu0 %v5959_v10 }
  0x2e   :  { %268 = vmatpush1.msra.mxu1 %v100_v30  ;;  %724 = vmatprep.subr.mxu0 %v5964_v11 }
  0x2f   :  { %227 = vmatmul.mubr.f32.gmra.mxu1 %v6279_v5  ;;  %269 = vmatprep.subr.mxu1 %v97_v32 }
  0x30   :  { %17 = vsyncpa [#allocation9], 0  ;;  %270 = vmatpush1.msra.mxu1 %v96_v8  ;;  %232 = vmatprep.mubr.f32.mxu1 %v9488_v6  ;;  %v6300_v10 = vld [vmem:[%s9475_s0 + $0x20] sm:$0xff]  ;;  %v89_v11 = vld [vmem:[%s9476_s1 + $0xf8] sm:$0xff]  ;;  %s5861_s28 = smov [#allocation6]  }
  0x31   :  { %271 = vmatprep.subr.mxu1 %v93_v34  ;;  %v88_v38 = vld [vmem:[%s9476_s1 + $0xf0] sm:$0xff]  ;;  %725 = vmatpush1.msra.mxu0 %v5973_v13  ;;  %v85_v40 = vld [vmem:[%s9476_s1 + $0xd8] sm:$0xff]  ;;  %v6321_v13 = vld [vmem:[%s9475_s0 + $0x28] sm:$0xff]  ;;  %s4830_s29 = sshll.u32 %s5861_s28, 4  ;;  %s4831_s29 = int_to_ptr.vmem [resolvable:$true] %s4830_s29 }
  0x32   :  { %272 = vmatpush1.msra.mxu1 %v92_v36  ;;  %726 = vmatprep.subr.mxu0 %v5982_v15  ;;  %v84_v42 = vld [vmem:[%s9476_s1 + $0xd0] sm:$0xff]  ;;  %v81_v44 = vld [vmem:[%s9476_s1 + $0xb8] sm:$0xff]  ;;  %s5816_s30 = scalar_lea.vmem %s4831_s29, 256  ;;  %p5821_p1 = scmp.lt.s32.totalorder %s4831_s29, %s4831_s29 }
  0x33   :  { %233 = vmatmul.mubr.f32.gmra.mxu1 %v6300_v10  ;;  %273 = vmatprep.subr.mxu1 %v89_v11  ;;  %v80_v15 = vld [vmem:[%s9476_s1 + $0xb0] sm:$0xff]  ;;  %v77_v46 = vld [vmem:[%s9476_s1 + $0x98] sm:$0xff]  ;;  %p5817_p0 = scmp.ne.s32.totalorder %s4831_s29, %s5816_s30  ;;  %p5822_p2 = scmp.lt.s32.totalorder %s5816_s30, %s5816_s30 }
  0x34   :  { %274 = vmatpush1.msra.mxu1 %v88_v38  ;;  %238 = vmatprep.mubr.f32.mxu1 %v9488_v6  ;;  %v76_v48 = vld [vmem:[%s9476_s1 + $0x90] sm:$0xff]  ;;  %v73_v50 = vld [vmem:[%s9476_s1 + $0x78] sm:$0xff] }
  0x35   :  { %275 = vmatprep.subr.mxu1 %v85_v40  ;;  %727 = vmatpush1.msra.mxu0 %v5991_v17  ;;  %v6342_v17 = vld [vmem:[%s9475_s0 + $0x30] sm:$0xff]  ;;  %v69_v52 = vld [vmem:[%s9476_s1 + $0x58] sm:$0xff]  ;;  %p5823_p3 = por %p5822_p2, %p5821_p1 }
  0x36   :  { %276 = vmatpush1.msra.mxu1 %v84_v42  ;;  %728 = vmatprep.subr.mxu0 %v6000_v19  ;;  %v72_v19 = vld [vmem:[%s9476_s1 + $0x70] sm:$0xff]  ;;  %v65_v56 = vld [vmem:[%s9476_s1 + $0x38] sm:$0xff] }
  0x37   :  { %239 = vmatmul.mubr.f32.gmra.mxu1 %v6321_v13  ;;  %277 = vmatprep.subr.mxu1 %v81_v44  ;;  %v68_v54 = vld [vmem:[%s9476_s1 + $0x50] sm:$0xff]  ;;  %v61_v58 = vld [vmem:[%s9476_s1 + $0x18] sm:$0xff]  ;;  %p5824_p4 = pnand %p5823_p3, %p5817_p0 }
  0x38   :  { %278 = vmatpush1.msra.mxu1 %v80_v15  ;;  %244 = vmatprep.mubr.f32.mxu1 %v9488_v6  ;;  %v60_v60 = vld [vmem:[%s9476_s1 + $0x10] sm:$0xff]  ;;  %v6395_v62 = vld [vmem:[%s9477_s2 + $0x1d8] sm:$0xff] }
  0x39   :  { %279 = vmatprep.subr.mxu1 %v77_v46  ;;  %729 = vmatpush1.msra.mxu0 %v6009_v21  ;;  %v6363_v21 = vld [vmem:[%s9475_s0 + $0x38] sm:$0xff]  ;;  %v6403_v1 = vld [vmem:[%s9477_s2 + $0x1d0] sm:$0xff] }
  0x3a   :  { %280 = vmatpush1.msra.mxu1 %v76_v48  ;;  %730 = vmatprep.subr.mxu0 %v6018_v23  ;;  %v64_v23 = vld [vmem:[%s9476_s1 + $0x30] sm:$0xff]  ;;  %v6451_v7 = vld [vmem:[%s9477_s2 + $0x158] sm:$0xff] }
  0x3b   :  { %245 = vmatmul.mubr.f32.gmra.mxu1 %v6342_v17  ;;  %281 = vmatprep.subr.mxu1 %v73_v50  ;;  %v6431_v2 = vld [vmem:[%s9477_s2 + $0x190] sm:$0xff]  ;;  %v6507_v18 = vld [vmem:[%s9477_s2 + $0xd8] sm:$0xff] }
  0x3c   :  { %282 = vmatpush1.msra.mxu1 %v72_v19  ;;  %250 = vmatprep.mubr.f32.mxu1 %v9488_v6  ;;  %v6459_v12 = vld [vmem:[%s9477_s2 + $0x150] sm:$0xff]  ;;  %v6535_v22 = vld [vmem:[%s9477_s2 + $0x98] sm:$0xff] }
  0x3d   :  { %283 = vmatprep.subr.mxu1 %v69_v52  ;;  %731 = vmatpush1.msra.mxu0 %v6027_v25  ;;  %v6384_v25 = vld [vmem:[%s9477_s2 + $0x1f8] sm:$0xff]  ;;  %v6487_v16 = vld [vmem:[%s9477_s2 + $0x110] sm:$0xff] }
  0x3e   :  { %284 = vmatpush1.msra.mxu1 %v68_v54  ;;  %732 = vmatprep.subr.mxu0 %v6036_v27  ;;  %v6389_v27 = vld [vmem:[%s9477_s2 + $0x1f0] sm:$0xff]  ;;  %v6563_v26 = vld [vmem:[%s9477_s2 + $0x58] sm:$0xff] }
  0x3f   :  { %251 = vmatmul.mubr.f32.gmra.mxu1 %v6363_v21  ;;  %285 = vmatprep.subr.mxu1 %v65_v56  ;;  %v6515_v20 = vld [vmem:[%s9477_s2 + $0xd0] sm:$0xff]  ;;  %v6591_v28 = vld [vmem:[%s9477_s2 + $0x18] sm:$0xff] }
  0x40   :  { %286 = vmatpush1.msra.mxu1 %v64_v23  ;;  %321 = vmatprep.mubr.f32.mxu1 %v9488_v6  ;;  %v6571_v3 = vld [vmem:[%s9477_s2 + $0x50] sm:$0xff] }
  0x41   :  { %287 = vmatprep.subr.mxu1 %v61_v58  ;;  %733 = vmatpush1.msra.mxu0 %v6045_v29  ;;  %v6410_v29 = vld [vmem:[%s9477_s2 + $0x1b8] sm:$0xff]  ;;  %v6599_v30 = vld [vmem:[%s9477_s2 + $0x10] sm:$0xff] }
  0x42   :  { %288 = vmatpush1.msra.mxu1 %v60_v60  ;;  %734 = vmatprep.subr.mxu0 %v6054_v31  ;;  %v6416_v31 = vld [vmem:[%s9477_s2 + $0x1b0] sm:$0xff] }
  0x43   :  { %322 = vmatmul.mubr.f32.vlgmr.msra.gmra.mxu1 %v6204_v0  ;;  %547 = vmatprep.subr.mxu1 %v6384_v25  ;;  %v6423_v0 = vld [vmem:[%s9477_s2 + $0x198] sm:$0xff] }
  0x44   :  { %548 = vmatpush1.msra.mxu1 %v6389_v27  ;;  %327 = vmatprep.mubr.f32.mxu1 %v9488_v6 }
  0x45   :  { %549 = vmatprep.subr.mxu1 %v6395_v62  ;;  %735 = vmatpush1.msra.mxu0 %v6063_v33  ;;  %v6438_v33 = vld [vmem:[%s9477_s2 + $0x178] sm:$0xff] }
  0x46   :  { %550 = vmatpush1.msra.mxu1 %v6403_v1  ;;  %736 = vmatprep.subr.mxu0 %v6072_v35  ;;  %v6444_v35 = vld [vmem:[%s9477_s2 + $0x170] sm:$0xff] }
  0x47   :  { %328 = vmatmul.mubr.f32.gmra.mxu1 %v6236_v14  ;;  %551 = vmatprep.subr.mxu1 %v6410_v29  ;;  %v6479_v14 = vld [vmem:[%s9477_s2 + $0x118] sm:$0xff] }
  0x48   :  { %552 = vmatpush1.msra.mxu1 %v6416_v31  ;;  %333 = vmatprep.mubr.f32.mxu1 %v9488_v6 }
  0x49   :  { %553 = vmatprep.subr.mxu1 %v6423_v0  ;;  %737 = vmatpush1.msra.mxu0 %v6081_v37  ;;  %v6466_v37 = vld [vmem:[%s9477_s2 + $0x138] sm:$0xff] }
  0x4a   :  { %554 = vmatpush1.msra.mxu1 %v6431_v2  ;;  %738 = vmatprep.subr.mxu0 %v6090_v39  ;;  %v6472_v39 = vld [vmem:[%s9477_s2 + $0x130] sm:$0xff] }
  0x4b   :  { %334 = vmatmul.mubr.f32.gmra.mxu1 %v6258_v24  ;;  %555 = vmatprep.subr.mxu1 %v6438_v33  ;;  %v6543_v24 = vld [vmem:[%s9477_s2 + $0x90] sm:$0xff] }
  0x4c   :  { %556 = vmatpush1.msra.mxu1 %v6444_v35  ;;  %339 = vmatprep.mubr.f32.mxu1 %v9488_v6 }
  0x4d   :  { %557 = vmatprep.subr.mxu1 %v6451_v7  ;;  %739 = vmatpush1.msra.mxu0 %v6099_v41  ;;  %v6494_v41 = vld [vmem:[%s9477_s2 + $0xf8] sm:$0xff] }
  0x4e   :  { %558 = vmatpush1.msra.mxu1 %v6459_v12  ;;  %740 = vmatprep.subr.mxu0 %v6108_v43  ;;  %v6500_v43 = vld [vmem:[%s9477_s2 + $0xf0] sm:$0xff] }
  0x4f   :  { %340 = vmatmul.mubr.f32.gmra.mxu1 %v6279_v5  ;;  %559 = vmatprep.subr.mxu1 %v6466_v37 }
  0x50   :  { %560 = vmatpush1.msra.mxu1 %v6472_v39  ;;  %345 = vmatprep.mubr.f32.mxu1 %v9488_v6 }
  0x51   :  { %561 = vmatprep.subr.mxu1 %v6479_v14  ;;  %741 = vmatpush1.msra.mxu0 %v6117_v45  ;;  %v6522_v45 = vld [vmem:[%s9477_s2 + $0xb8] sm:$0xff] }
  0x52   :  { %562 = vmatpush1.msra.mxu1 %v6487_v16  ;;  %742 = vmatprep.subr.mxu0 %v6126_v47  ;;  %v6528_v47 = vld [vmem:[%s9477_s2 + $0xb0] sm:$0xff] }
  0x53   :  { %346 = vmatmul.mubr.f32.gmra.mxu1 %v6300_v10  ;;  %563 = vmatprep.subr.mxu1 %v6494_v41 }
  0x54   :  { %564 = vmatpush1.msra.mxu1 %v6500_v43  ;;  %351 = vmatprep.mubr.f32.mxu1 %v9488_v6 }
  0x55   :  { %565 = vmatprep.subr.mxu1 %v6507_v18  ;;  %743 = vmatpush1.msra.mxu0 %v6135_v49  ;;  %v6550_v49 = vld [vmem:[%s9477_s2 + $0x78] sm:$0xff] }
  0x56   :  { %566 = vmatpush1.msra.mxu1 %v6515_v20  ;;  %744 = vmatprep.subr.mxu0 %v6144_v51  ;;  %v6556_v51 = vld [vmem:[%s9477_s2 + $0x70] sm:$0xff] }
  0x57   :  { %352 = vmatmul.mubr.f32.gmra.mxu1 %v6321_v13  ;;  %567 = vmatprep.subr.mxu1 %v6522_v45 }
  0x58   :  { %568 = vmatpush1.msra.mxu1 %v6528_v47  ;;  %357 = vmatprep.mubr.f32.mxu1 %v9488_v6 }
  0x59   :  { %569 = vmatprep.subr.mxu1 %v6535_v22  ;;  %745 = vmatpush1.msra.mxu0 %v6153_v53  ;;  %v6578_v53 = vld [vmem:[%s9477_s2 + $0x38] sm:$0xff] }
  0x5a   :  { %570 = vmatpush1.msra.mxu1 %v6543_v24  ;;  %746 = vmatprep.subr.mxu0 %v6162_v55  ;;  %v6584_v55 = vld [vmem:[%s9477_s2 + $0x30] sm:$0xff] }
  0x5b   :  { %358 = vmatmul.mubr.f32.gmra.mxu1 %v6342_v17  ;;  %571 = vmatprep.subr.mxu1 %v6550_v49 }
  0x5c   :  { %572 = vmatpush1.msra.mxu1 %v6556_v51  ;;  %363 = vmatprep.mubr.f32.mxu1 %v9488_v6 }
  0x5d   :  { %573 = vmatprep.subr.mxu1 %v6563_v26  ;;  %747 = vmatpush1.msra.mxu0 %v6171_v57  ;;  %v124_v57 = vlaneseq }
  0x5e   :  { %574 = vmatpush1.msra.mxu1 %v6571_v3  ;;  %748 = vmatprep.subr.mxu0 %v6180_v59 }
  0x5f   :  { %364 = vmatmul.mubr.f32.gmra.mxu1 %v6363_v21  ;;  %575 = vmatprep.subr.mxu1 %v6578_v53  ;;  %v6644_v59 = vshrl.u32 %v124_v57, 7 }
  0x60   :  { %576 = vmatpush1.msra.mxu1 %v6584_v55  ;;  %611 = vmatprep.mubr.f32.mxu1 %v9488_v6 }
  0x61   :  { %577 = vmatprep.subr.mxu1 %v6591_v28  ;;  %749 = vmatpush1.msra.mxu0 %v6189_v61  ;;  %9637 = vst [vmem:[#allocation12_spill] sm:$0xff] %v6644_v59  ;;  %v9487_v61 = vsub.s32 0, %v6644_v59 }
  0x62   :  { %578 = vmatpush1.msra.mxu1 %v6599_v30  ;;  %750 = vmatprep.subr.mxu0 %v6198_v63 }
  0x63   :  { %612 = vmatmul.mubr.f32.vlgmr.msra.gmra.mxu1 %v6226_v9  ;;  %791 = vmatprep.subr.mxu1 %v6384_v25  ;;  %v9486_v9 = vsub.s32 1, %v6644_v59 }
  0x64   :  { %792 = vmatpush1.msra.mxu1 %v6389_v27  ;;  %751 = vmatpush1.msra.mxu0 %v6216_v4  ;;  %v122_v4 = vld [vmem:[%s9478_s3] sm:$0xf] }
  0x65   :  { %793 = vmatprep.subr.mxu1 %v6395_v62  ;;  %784 = vmatprep.mubr.f32.mxu0 %v9488_v6  ;;  %v127_v32 = vrot.slane %v122_v4, %v9487_v61  ;;  %v131_v34 = vrot.slane %v122_v4, %v9486_v9 }
  0x66   :  { %794 = vmatpush1.msra.mxu1 %v6403_v1  ;;  %855 = vmatprep.mubr.f32.mxu1 %v9488_v6 }
  0x67   :  { %795 = vmatprep.subr.mxu1 %v6410_v29 }
  0x68   :  { %796 = vmatpush1.msra.mxu1 %v6416_v31 }
  0x69   :  { %797 = vmatprep.subr.mxu1 %v6423_v0 }
  0x6a   :  { %798 = vmatpush1.msra.mxu1 %v6431_v2 }
  0x6b   :  { %799 = vmatprep.subr.mxu1 %v6438_v33 }
  0x6c   :  { %800 = vmatpush1.msra.mxu1 %v6444_v35 }
  0x6d   :  { %801 = vmatprep.subr.mxu1 %v6451_v7 }
  0x6e   :  { %802 = vmatpush1.msra.mxu1 %v6459_v12 }
  0x6f   :  { %803 = vmatprep.subr.mxu1 %v6466_v37 }
  0x70   :  { %804 = vmatpush1.msra.mxu1 %v6472_v39 }
  0x71   :  { %805 = vmatprep.subr.mxu1 %v6479_v14 }
  0x72   :  { %806 = vmatpush1.msra.mxu1 %v6487_v16 }
  0x73   :  { %807 = vmatprep.subr.mxu1 %v6494_v41 }
  0x74   :  { %808 = vmatpush1.msra.mxu1 %v6500_v43 }
  0x75   :  { %809 = vmatprep.subr.mxu1 %v6507_v18 }
  0x76   :  { %810 = vmatpush1.msra.mxu1 %v6515_v20 }
  0x77   :  { %811 = vmatprep.subr.mxu1 %v6522_v45 }
  0x78   :  { %812 = vmatpush1.msra.mxu1 %v6528_v47 }
  0x79   :  { %813 = vmatprep.subr.mxu1 %v6535_v22 }
  0x7a   :  { %814 = vmatpush1.msra.mxu1 %v6543_v24 }
  0x7b   :  { %815 = vmatprep.subr.mxu1 %v6550_v49 }
  0x7c   :  { %816 = vmatpush1.msra.mxu1 %v6556_v51 }
  0x7d   :  { %817 = vmatprep.subr.mxu1 %v6563_v26 }
  0x7e   :  { %818 = vmatpush1.msra.mxu1 %v6571_v3 }
  0x7f   :  { %819 = vmatprep.subr.mxu1 %v6578_v53 }
  0x80   :  { %820 = vmatpush1.msra.mxu1 %v6584_v55 }
  0x81   :  { %821 = vmatprep.subr.mxu1 %v6591_v28 }
  0x82   :  { %822 = vmatpush1.msra.mxu1 %v6599_v30 }
  0x83   :  { %1036 = vmatprep.subr.mxu1 %v6384_v25 }
  0xe2   :  { %v210_v63 = vpop.f32.mrf.mxu1 }
  0xe3   :  { %v211_v9 = vadd.f32 %v210_v63, %v127_v32 }
  0xe4   :  { %v212_v5 = vpop.f32.mrf.mxu1 }
  0xe7   :  { %v216_v8 = vpop.f32.mrf.mxu1 }
  0xe8   :  { %v6655_v36 = vadd.f32 %v216_v8, %v127_v32 }
  0xe9   :  { %v218_v10 = vpop.f32.mrf.mxu1 }
  0xea   :  { %v6657_v11 = vadd.f32 %v218_v10, %v131_v34 }
  0xeb   :  { %v222_v38 = vpop.f32.mrf.mxu1 }
  0xec   :  { %v6659_v40 = vadd.f32 %v222_v38, %v127_v32 }
  0xed   :  { %v224_v42 = vpop.f32.mrf.mxu1 }
  0xee   :  { %v6661_v13 = vadd.f32 %v224_v42, %v131_v34  ;;  %v542_v42 = vpop.f32.mrf.mxu0 }
  0xef   :  { %v228_v44 = vpop.f32.mrf.mxu1 }
  0xf0   :  { %v6663_v15 = vadd.f32 %v228_v44, %v127_v32  ;;  %v544_v61 = vpop.f32.mrf.mxu0 }
  0xf1   :  { %v230_v46 = vpop.f32.mrf.mxu1 }
  0xf2   :  { %9638 = vst [vmem:[#allocation13_spill] sm:$0xff] %v6663_v15  ;;  %v6665_v48 = vadd.f32 %v230_v46, %v131_v34 }
  0xf3   :  { %v234_v17 = vpop.f32.mrf.mxu1 }
  0xf4   :  { %9639 = vst [vmem:[#allocation14_spill] sm:$0xff] %v6665_v48  ;;  %v6667_v50 = vadd.f32 %v234_v17, %v127_v32  ;;  %v9490_v17 = vsub.s32 2, %v6644_v59 }
  0xf5   :  { %v236_v19 = vpop.f32.mrf.mxu1 }
  0xf6   :  { %9640 = vst [vmem:[#allocation15_spill] sm:$0xff] %v6667_v50  ;;  %v6669_v52 = vadd.f32 %v236_v19, %v131_v34 }
  0xf7   :  { %v240_v54 = vpop.f32.mrf.mxu1 }
  0xf8   :  { %9641 = vst [vmem:[#allocation16_spill] sm:$0xff] %v6669_v52  ;;  %v6671_v21 = vadd.f32 %v240_v54, %v127_v32  ;;  %v213_v54 = vadd.f32 %v212_v5, %v131_v34 }
  0xf9   :  { %v242_v56 = vpop.f32.mrf.mxu1 }
  0xfa   :  { %9642 = vst [vmem:[#allocation17_spill] sm:$0xff] %v6671_v21  ;;  %v6673_v23 = vadd.f32 %v242_v56, %v131_v34  ;;  %v9491_v56 = vsub.s32 3, %v6644_v59 }
  0xfb   :  { %v246_v58 = vpop.f32.mrf.mxu1 }
  0xfc   :  { %9643 = vst [vmem:[#allocation18_spill] sm:$0xff] %v6673_v23  ;;  %v6675_v60 = vadd.f32 %v246_v58, %v127_v32 }
  0xfd   :  { %v248_v57 = vpop.f32.mrf.mxu1 }
  0xfe   :  { %9644 = vst [vmem:[#allocation19_spill] sm:$0xff] %v6675_v60  ;;  %v6677_v8 = vadd.f32 %v248_v57, %v131_v34  ;;  %v135_v57 = vrot.slane %v122_v4, %v9490_v17 }
  0xff   :  { %v252_v10 = vpop.f32.mrf.mxu1 }
 0x100   :  { %9645 = vst [vmem:[#allocation20_spill] sm:$0xff] %v6677_v8  ;;  %v6679_v38 = vadd.f32 %v252_v10, %v127_v32  ;;  %v619_v8 = vadd.f32 %v544_v61, %v213_v54  ;;  %v139_v10 = vrot.slane %v122_v4, %v9491_v56 }
 0x101   :  { %v254_v44 = vpop.f32.mrf.mxu1 }
 0x102   :  { %9646 = vst [vmem:[#allocation21_spill] sm:$0xff] %v6679_v38  ;;  %v6681_v46 = vadd.f32 %v254_v44, %v131_v34  ;;  %v618_v44 = vadd.f32 %v542_v42, %v211_v9  ;;  %v4860_v34 = vmul.f32 -1.442695, %v619_v8 }
 0x103   :  { %v323_v19 = vpop.f32.mrf.mxu1 }
 0x104   :  { %9647 = vst [vmem:[#allocation22_spill] sm:$0xff] %v6681_v46  ;;  %v4859_v63 = vmul.f32 -1.442695, %v618_v44  ;;  %5560 = vpow2.f32 %v4860_v34  ;;  %v324_v50 = vadd.f32 %v323_v19, %v135_v57 }
 0x105   :  { %v325_v58 = vpop.f32.mrf.mxu1 }
 0x106   :  { %5562 = vpow2.f32 %v4859_v63 }
 0x107   :  { %v329_v6 = vpop.f32.mrf.mxu1 }
 0x108   :  { %v6689_v38 = vadd.f32 %v329_v6, %v135_v57 }
 0x109   :  { %v331_v46 = vpop.f32.mrf.mxu1 }
 0x10a   :  { %v6691_v60 = vadd.f32 %v331_v46, %v139_v10 }
 0x10b   :  { %v335_v5 = vpop.f32.mrf.mxu1 }
 0x10c   :  { %v6693_v23 = vadd.f32 %v335_v5, %v135_v57 }
 0x10d   :  { %v337_v32 = vpop.f32.mrf.mxu1 }
 0x10e   :  { %9648 = vst [vmem:[#allocation23_spill] sm:$0xff] %v6693_v23  ;;  %v6695_v21 = vadd.f32 %v337_v32, %v139_v10 }
 0x10f   :  { %v341_v17 = vpop.f32.mrf.mxu1 }
 0x110   :  { %v6697_v61 = vadd.f32 %v341_v17, %v135_v57 }
 0x111   :  { %v343_v4 = vpop.f32.mrf.mxu1  ;;  %v5561_v17 = vpop.eup %5560 }
 0x112   :  { %9649 = vst [vmem:[#allocation24_spill] sm:$0xff] %v6697_v61  ;;  %v6699_v6 = vadd.f32 %v343_v4, %v139_v10 }
 0x113   :  { %v347_v9 = vpop.f32.mrf.mxu1  ;;  %v5563_v59 = vpop.eup %5562 }
 0x114   :  { %9650 = vst [vmem:[#allocation25_spill] sm:$0xff] %v6699_v6  ;;  %v6701_v42 = vadd.f32 %v347_v9, %v135_v57  ;;  %v631_v9 = vadd.f32 1.0, %v5561_v17 }
 0x115   :  { %v349_v46 = vpop.f32.mrf.mxu1 }
 0x116   :  { %9651 = vst [vmem:[#allocation26_spill] sm:$0xff] %v6701_v42  ;;  %v6703_v54 = vadd.f32 %v349_v46, %v139_v10  ;;  %v625_v46 = vadd.f32 1.0, %v5563_v59  ;;  %5564 = vrcp.f32 %v631_v9 }
 0x117   :  { %v353_v8 = vpop.f32.mrf.mxu1 }
 0x118   :  { %9652 = vst [vmem:[#allocation27_spill] sm:$0xff] %v6703_v54  ;;  %v6705_v5 = vadd.f32 %v353_v8, %v135_v57  ;;  %5566 = vrcp.f32 %v625_v46  ;;  %v6912_v46 = vld [vmem:[%s9477_s2 + $0x60] sm:$0xff] }
 0x119   :  { %v355_v44 = vpop.f32.mrf.mxu1  ;;  %9662 = vst [vmem:[#allocation36_spill] sm:$0xff] %v6912_v46 }
 0x11a   :  { %9653 = vst [vmem:[#allocation28_spill] sm:$0xff] %v6705_v5  ;;  %v6707_v32 = vadd.f32 %v355_v44, %v139_v10  ;;  %v326_v44 = vadd.f32 %v325_v58, %v139_v10 }
 0x11b   :  { %v359_v56 = vpop.f32.mrf.mxu1 }
 0x11c   :  { %9654 = vst [vmem:[#allocation29_spill] sm:$0xff] %v6707_v32  ;;  %v6709_v34 = vadd.f32 %v359_v56, %v135_v57 }
 0x11d   :  { %v361_v63 = vpop.f32.mrf.mxu1 }
 0x11e   :  { %9655 = vst [vmem:[#allocation30_spill] sm:$0xff] %v6709_v34  ;;  %v6711_v4 = vadd.f32 %v361_v63, %v139_v10 }
 0x11f   :  { %v365_v52 = vpop.f32.mrf.mxu1 }
 0x120   :  { %9656 = vst [vmem:[#allocation31_spill] sm:$0xff] %v6711_v4  ;;  %v6713_v42 = vadd.f32 %v365_v52, %v135_v57  ;;  %v404_v52 = vld [vmem:[%s9480_s5] sm:$0xff] }
 0x121   :  { %v367_v54 = vpop.f32.mrf.mxu1 }
 0x122   :  { %9657 = vst [vmem:[#allocation32_spill] sm:$0xff] %v6713_v42  ;;  %v6715_v8 = vadd.f32 %v367_v54, %v139_v10 }
 0x123   :  { %v613_v5 = vpop.f32.mrf.mxu1  ;;  %v5565_v63 = vpop.eup %5564 }
 0x124   :  { %9658 = vst [vmem:[#allocation33_spill] sm:$0xff] %v6715_v8  ;;  %v620_v32 = vadd.f32 %v613_v5, %v324_v50  ;;  %v641_v19 = vmul.f32 %v5565_v63, %v404_v52  ;;  %v6930_v63 = vld [vmem:[%s9477_s2 + $0x28] sm:$0xff]  ;;  %v6936_v52 = vld [vmem:[%s9477_s2 + $0x20] sm:$0xff] }
 0x125   :  { %v615_v56 = vpop.f32.mrf.mxu1  ;;  %v5567_v59 = vpop.eup %5566  ;;  %9665 = vst [vmem:[#allocation39_spill] sm:$0xff] %v6930_v63  ;;  %9666 = vst [vmem:[#allocation40_spill] sm:$0xff] %v6936_v52 }
 0x126   :  { %5568 = vtanh.f32 %v620_v32  ;;  %v621_v34 = vadd.f32 %v615_v56, %v326_v44  ;;  %v6900_v32 = vld [vmem:[%s9477_s2 + $0x80] sm:$0xff]  ;;  %v6918_v44 = vld [vmem:[%s9477_s2 + $0x48] sm:$0xff] }
 0x127   :  { %9663 = vst [vmem:[#allocation37_spill] sm:$0xff] %v6918_v44  ;;  %v6924_v56 = vld [vmem:[%s9477_s2 + $0x40] sm:$0xff] }
 0x128   :  { %v4861_v61 = vmul.f32 -1.442695, %v621_v34  ;;  %v6906_v34 = vld [vmem:[%s9477_s2 + $0x68] sm:$0xff]  ;;  %9664 = vst [vmem:[#allocation38_spill] sm:$0xff] %v6924_v56 }
 0x129   :  { %9661 = vst [vmem:[#allocation35_spill] sm:$0xff] %v6906_v34 }
 0x12a   :  { %5570 = vpow2.f32 %v4861_v61  ;;  %v9660_v61 = vmov 0.0  }
 0x133   :  { %v5569_v17 = vpop.eup %5568 }
 0x134   :  { %v642_v57 = vmul.f32 %v5569_v17, %v5567_v59  ;;  %v6942_v59 = vld [vmem:[%s9477_s2 + $0x8] sm:$0xff]  ;;  %v6948_v17 = vld [vmem:[%s9477_s2] sm:$0xff] }
 0x135   :  { %9667 = vst [vmem:[#allocation41_spill] sm:$0xff] %v6942_v59  ;;  %9668 = vst [vmem:[#allocation42_spill] sm:$0xff] %v6948_v17 }
 0x136   :  { %v6720_v54 = vadd.f32 %v642_v57, %v641_v19 }
 0x137   :  { %v5571_v9 = vpop.eup %5570 }
 0x138   :  { %v638_v58 = vadd.f32 1.0, %v5571_v9  ;;  %5572 = vtanh.f32 %v6720_v54 }
 0x13a   :  { %5574 = vrcp.f32 %v638_v58 }
 0x145   :  { %v5573_v50 = vpop.eup %5572 }
 0x147   :  { %v5575_v10 = vpop.eup %5574 }
 0x148   :  { %v6723_v5 = vmul.f32 %v5575_v10, %v5573_v50 }
 0x14a   :  { %9659 = vst [vmem:[#allocation34_spill] sm:$0xff] %v6723_v5  ;;  %785 = vmatmul.mubr.f32.vlgmr.msra.gmra.mxu0 %v6723_v5  ;;  %856 = vmatmul.mubr.f32.vlgmr.msra.gmra.mxu1 %v6723_v5 }
 0x14b   :  { %1037 = vmatpush1.msra.mxu1 %v6389_v27  ;;  %1029 = vmatprep.mubr.f32.mxu0 %v9660_v61 }
 0x14c   :  { %1038 = vmatprep.subr.mxu1 %v6395_v62  ;;  %1100 = vmatprep.mubr.f32.mxu1 %v9660_v61 }
 0x14d   :  { %1039 = vmatpush1.msra.mxu1 %v6403_v1 }
 0x14e   :  { %1040 = vmatprep.subr.mxu1 %v6410_v29 }
 0x14f   :  { %1041 = vmatpush1.msra.mxu1 %v6416_v31 }
 0x150   :  { %1042 = vmatprep.subr.mxu1 %v6423_v0 }
 0x151   :  { %1043 = vmatpush1.msra.mxu1 %v6431_v2 }
 0x152   :  { %1044 = vmatprep.subr.mxu1 %v6438_v33 }
 0x153   :  { %1045 = vmatpush1.msra.mxu1 %v6444_v35 }
 0x154   :  { %1046 = vmatprep.subr.mxu1 %v6451_v7  ;;  %v6764_v7 = vld [vmem:[%s9477_s2 + $0x1e8] sm:$0xff] }
 0x155   :  { %1047 = vmatpush1.msra.mxu1 %v6459_v12  ;;  %965 = vmatprep.subr.mxu0 %v6764_v7  ;;  %v6770_v12 = vld [vmem:[%s9477_s2 + $0x1e0] sm:$0xff] }
 0x156   :  { %1048 = vmatprep.subr.mxu1 %v6466_v37  ;;  %966 = vmatpush1.msra.mxu0 %v6770_v12  ;;  %v6776_v37 = vld [vmem:[%s9477_s2 + $0x1c8] sm:$0xff] }
 0x157   :  { %1049 = vmatpush1.msra.mxu1 %v6472_v39  ;;  %967 = vmatprep.subr.mxu0 %v6776_v37  ;;  %v6788_v39 = vld [vmem:[%s9477_s2 + $0x1a8] sm:$0xff] }
 0x158   :  { %1050 = vmatprep.subr.mxu1 %v6479_v14  ;;  %v6794_v14 = vld [vmem:[%s9477_s2 + $0x1a0] sm:$0xff] }
 0x159   :  { %1051 = vmatpush1.msra.mxu1 %v6487_v16  ;;  %v6800_v16 = vld [vmem:[%s9477_s2 + $0x188] sm:$0xff] }
 0x15a   :  { %1052 = vmatprep.subr.mxu1 %v6494_v41  ;;  %v6806_v41 = vld [vmem:[%s9477_s2 + $0x180] sm:$0xff] }
 0x15b   :  { %1053 = vmatpush1.msra.mxu1 %v6500_v43  ;;  %v6812_v43 = vld [vmem:[%s9477_s2 + $0x168] sm:$0xff] }
 0x15c   :  { %1054 = vmatprep.subr.mxu1 %v6507_v18  ;;  %v6818_v18 = vld [vmem:[%s9477_s2 + $0x160] sm:$0xff] }
 0x15d   :  { %1055 = vmatpush1.msra.mxu1 %v6515_v20  ;;  %v6824_v20 = vld [vmem:[%s9477_s2 + $0x148] sm:$0xff] }
 0x15e   :  { %1056 = vmatprep.subr.mxu1 %v6522_v45  ;;  %v6830_v45 = vld [vmem:[%s9477_s2 + $0x140] sm:$0xff] }
 0x15f   :  { %1057 = vmatpush1.msra.mxu1 %v6528_v47  ;;  %v6836_v47 = vld [vmem:[%s9477_s2 + $0x128] sm:$0xff] }
 0x160   :  { %1058 = vmatprep.subr.mxu1 %v6535_v22  ;;  %v6842_v22 = vld [vmem:[%s9477_s2 + $0x120] sm:$0xff] }
 0x161   :  { %1059 = vmatpush1.msra.mxu1 %v6543_v24  ;;  %v6848_v24 = vld [vmem:[%s9477_s2 + $0x108] sm:$0xff] }
 0x162   :  { %1060 = vmatprep.subr.mxu1 %v6550_v49  ;;  %v6853_v49 = vld [vmem:[%s9477_s2 + $0x100] sm:$0xff] }
 0x163   :  { %1061 = vmatpush1.msra.mxu1 %v6556_v51  ;;  %v6858_v51 = vld [vmem:[%s9477_s2 + $0xe8] sm:$0xff] }
 0x164   :  { %1062 = vmatprep.subr.mxu1 %v6563_v26  ;;  %v6864_v26 = vld [vmem:[%s9477_s2 + $0xe0] sm:$0xff] }
 0x165   :  { %1063 = vmatpush1.msra.mxu1 %v6571_v3  ;;  %v6870_v3 = vld [vmem:[%s9477_s2 + $0xc8] sm:$0xff] }
 0x166   :  { %1064 = vmatprep.subr.mxu1 %v6578_v53  ;;  %v6876_v53 = vld [vmem:[%s9477_s2 + $0xc0] sm:$0xff] }
 0x167   :  { %1065 = vmatpush1.msra.mxu1 %v6584_v55  ;;  %v6882_v55 = vld [vmem:[%s9477_s2 + $0xa8] sm:$0xff] }
 0x168   :  { %1066 = vmatprep.subr.mxu1 %v6591_v28  ;;  %v6888_v28 = vld [vmem:[%s9477_s2 + $0xa0] sm:$0xff] }
 0x169   :  { %1067 = vmatpush1.msra.mxu1 %v6599_v30  ;;  %v6894_v30 = vld [vmem:[%s9477_s2 + $0x88] sm:$0xff] }
 0x16a   :  { %1281 = vmatprep.subr.mxu1 %v6384_v25  ;;  %v6782_v25 = vld [vmem:[%s9477_s2 + $0x1c0] sm:$0xff] }
 0x16b   :  { %968 = vmatpush1.msra.mxu0 %v6782_v25 }
 0x16c   :  { %969 = vmatprep.subr.mxu0 %v6788_v39 }
 0x16d   :  { %970 = vmatpush1.msra.mxu0 %v6794_v14 }
 0x16e   :  { %971 = vmatprep.subr.mxu0 %v6800_v16 }
 0x16f   :  { %972 = vmatpush1.msra.mxu0 %v6806_v41 }
 0x170   :  { %973 = vmatprep.subr.mxu0 %v6812_v43 }
 0x171   :  { %974 = vmatpush1.msra.mxu0 %v6818_v18 }
 0x172   :  { %975 = vmatprep.subr.mxu0 %v6824_v20 }
 0x173   :  { %976 = vmatpush1.msra.mxu0 %v6830_v45 }
 0x174   :  { %977 = vmatprep.subr.mxu0 %v6836_v47 }
 0x175   :  { %978 = vmatpush1.msra.mxu0 %v6842_v22 }
 0x176   :  { %979 = vmatprep.subr.mxu0 %v6848_v24 }
 0x177   :  { %980 = vmatpush1.msra.mxu0 %v6853_v49 }
 0x178   :  { %981 = vmatprep.subr.mxu0 %v6858_v51 }
 0x179   :  { %982 = vmatpush1.msra.mxu0 %v6864_v26 }
 0x17a   :  { %983 = vmatprep.subr.mxu0 %v6870_v3 }
 0x17b   :  { %984 = vmatpush1.msra.mxu0 %v6876_v53 }
 0x17c   :  { %985 = vmatprep.subr.mxu0 %v6882_v55 }
 0x17d   :  { %986 = vmatpush1.msra.mxu0 %v6888_v28 }
 0x17e   :  { %987 = vmatprep.subr.mxu0 %v6894_v30 }
 0x17f   :  { %988 = vmatpush1.msra.mxu0 %v6900_v32 }
 0x180   :  { %989 = vmatprep.subr.mxu0 %v6906_v34 }
 0x181   :  { %990 = vmatpush1.msra.mxu0 %v6912_v46 }
 0x182   :  { %991 = vmatprep.subr.mxu0 %v6918_v44 }
 0x183   :  { %992 = vmatpush1.msra.mxu0 %v6924_v56 }
 0x184   :  { %993 = vmatprep.subr.mxu0 %v6930_v63 }
 0x185   :  { %994 = vmatpush1.msra.mxu0 %v6936_v52 }
 0x186   :  { %995 = vmatprep.subr.mxu0 %v6942_v59 }
 0x187   :  { %996 = vmatpush1.msra.mxu0 %v6948_v17 }
 0x188   :  { %1210 = vmatprep.subr.mxu0 %v6764_v7 }
 0x20a   :  { %v786_v19 = vpop.f32.mrf.mxu0  ;;  %v857_v10 = vpop.f32.mrf.mxu1 }
 0x20b   :  { %v862_v57 = vadd.f32 %v786_v19, %v6655_v36  ;;  %v864_v4 = vadd.f32 %v857_v10, %v6689_v38  ;;  %v7100_v10 = vld [vmem:[%s9477_s2 + $0x70] sm:$0xff] }
 0x20c   :  { %v788_v9 = vpop.f32.mrf.mxu0  ;;  %v859_v8 = vpop.f32.mrf.mxu1  ;;  %9673 = vst [vmem:[#allocation47_spill] sm:$0xff] %v7100_v10 }
 0x20d   :  { %v4862_v58 = vmul.f32 -1.442695, %v862_v57  ;;  %v863_v50 = vadd.f32 %v788_v9, %v6657_v11  ;;  %v865_v5 = vadd.f32 %v859_v8, %v6691_v60  ;;  %v7082_v8 = vld [vmem:[%s9477_s2 + $0x98] sm:$0xff] }
 0x20e   :  { %9670 = vst [vmem:[#allocation44_spill] sm:$0xff] %v7082_v8 }
 0x20f   :  { %5576 = vpow2.f32 %v4862_v58  ;;  %v4863_v42 = vmul.f32 -1.442695, %v863_v50  ;;  %v4864_v6 = vmul.f32 -1.442695, %v865_v5  ;;  %v7094_v5 = vld [vmem:[%s9477_s2 + $0x78] sm:$0xff] }
 0x210   :  { %9672 = vst [vmem:[#allocation46_spill] sm:$0xff] %v7094_v5 }
 0x211   :  { %5578 = vpow2.f32 %v4863_v42 }
 0x212   :  { %5580 = vtanh.f32 %v864_v4 }
 0x213   :  { %5582 = vpow2.f32 %v4864_v6  ;;  %v7076_v6 = vld [vmem:[%s9477_s2 + $0xb0] sm:$0xff] }
 0x21c   :  { %v5577_v48 = vpop.eup %5576 }
 0x21d   :  { %v869_v15 = vadd.f32 1.0, %v5577_v48 }
 0x21e   :  { %v5579_v23 = vpop.eup %5578 }
 0x21f   :  { %5584 = vrcp.f32 %v869_v15  ;;  %v875_v36 = vadd.f32 1.0, %v5579_v23  ;;  %v5581_v19 = vpop.eup %5580  ;;  %v7064_v15 = vld [vmem:[%s9477_s2 + $0xd0] sm:$0xff]  ;;  %v7070_v23 = vld [vmem:[%s9477_s2 + $0xb8] sm:$0xff] }
 0x220   :  { %v5583_v11 = vpop.eup %5582 }
 0x221   :  { %5586 = vrcp.f32 %v875_v36  ;;  %v882_v42 = vadd.f32 1.0, %v5583_v11  ;;  %v7106_v36 = vld [vmem:[%s9477_s2 + $0x58] sm:$0xff] }
 0x222   :  { %9674 = vst [vmem:[#allocation48_spill] sm:$0xff] %v7106_v36  ;;  %v7118_v11 = vld [vmem:[%s9477_s2 + $0x38] sm:$0xff] }
 0x223   :  { %5588 = vrcp.f32 %v882_v42  ;;  %9676 = vst [vmem:[#allocation50_spill] sm:$0xff] %v7118_v11 }
 0x22c   :  { %v5585_v57 = vpop.eup %5584 }
 0x22d   :  { %v886_v9 = vmul.f32 %v5585_v57, %v5581_v19  ;;  %v7112_v19 = vld [vmem:[%s9477_s2 + $0x50] sm:$0xff] }
 0x22e   :  { %v5587_v58 = vpop.eup %5586  ;;  %9675 = vst [vmem:[#allocation49_spill] sm:$0xff] %v7112_v19  ;;  %v7124_v57 = vld [vmem:[%s9477_s2 + $0x30] sm:$0xff] }
 0x22f   :  { %v885_v50 = vmul.f32 %v5587_v58, %v6720_v54  ;;  %v7088_v54 = vld [vmem:[%s9477_s2 + $0x90] sm:$0xff]  ;;  %9677 = vst [vmem:[#allocation51_spill] sm:$0xff] %v7124_v57 }
 0x230   :  { %v5589_v48 = vpop.eup %5588  ;;  %9671 = vst [vmem:[#allocation45_spill] sm:$0xff] %v7088_v54  ;;  %v7136_v58 = vld [vmem:[%s9477_s2 + $0x10] sm:$0xff] }
 0x231   :  { %v6959_v60 = vadd.f32 %v886_v9, %v885_v50  ;;  %v7130_v9 = vld [vmem:[%s9477_s2 + $0x18] sm:$0xff]  ;;  %9679 = vst [vmem:[#allocation53_spill] sm:$0xff] %v7136_v58 }
 0x232   :  { %9678 = vst [vmem:[#allocation52_spill] sm:$0xff] %v7130_v9 }
 0x233   :  { %5590 = vtanh.f32 %v6959_v60 }
 0x240   :  { %v5591_v38 = vpop.eup %5590 }
 0x241   :  { %v6962_v4 = vmul.f32 %v5591_v38, %v5589_v48 }
 0x243   :  { %9669 = vst [vmem:[#allocation43_spill] sm:$0xff] %v6962_v4  ;;  %1030 = vmatmul.mubr.f32.vlgmr.msra.gmra.mxu0 %v6962_v4  ;;  %1101 = vmatmul.mubr.f32.vlgmr.msra.gmra.mxu1 %v6962_v4 }
 0x244   :  { %1211 = vmatpush1.msra.mxu0 %v6770_v12  ;;  %1282 = vmatpush1.msra.mxu1 %v6389_v27  ;;  %v7012_v27 = vld [vmem:[%s9477_s2 + $0x158] sm:$0xff] }
 0x245   :  { %1212 = vmatprep.subr.mxu0 %v6776_v37  ;;  %1283 = vmatprep.subr.mxu1 %v6395_v62  ;;  %v7018_v62 = vld [vmem:[%s9477_s2 + $0x150] sm:$0xff] }
 0x246   :  { %1213 = vmatpush1.msra.mxu0 %v6782_v25  ;;  %1284 = vmatpush1.msra.mxu1 %v6403_v1  ;;  %v7024_v1 = vld [vmem:[%s9477_s2 + $0x138] sm:$0xff] }
 0x247   :  { %1214 = vmatprep.subr.mxu0 %v6788_v39  ;;  %1285 = vmatprep.subr.mxu1 %v6410_v29  ;;  %v7030_v29 = vld [vmem:[%s9477_s2 + $0x130] sm:$0xff] }
 0x248   :  { %1215 = vmatpush1.msra.mxu0 %v6794_v14  ;;  %1286 = vmatpush1.msra.mxu1 %v6416_v31  ;;  %v7036_v31 = vld [vmem:[%s9477_s2 + $0x118] sm:$0xff] }
 0x249   :  { %1216 = vmatprep.subr.mxu0 %v6800_v16  ;;  %1287 = vmatprep.subr.mxu1 %v6423_v0  ;;  %v7041_v0 = vld [vmem:[%s9477_s2 + $0x110] sm:$0xff] }
 0x24a   :  { %1217 = vmatpush1.msra.mxu0 %v6806_v41  ;;  %1288 = vmatpush1.msra.mxu1 %v6431_v2  ;;  %v7046_v2 = vld [vmem:[%s9477_s2 + $0xf8] sm:$0xff] }
 0x24b   :  { %1218 = vmatprep.subr.mxu0 %v6812_v43  ;;  %1289 = vmatprep.subr.mxu1 %v6438_v33  ;;  %v7052_v33 = vld [vmem:[%s9477_s2 + $0xf0] sm:$0xff] }
 0x24c   :  { %1219 = vmatpush1.msra.mxu0 %v6818_v18  ;;  %1290 = vmatpush1.msra.mxu1 %v6444_v35  ;;  %v7058_v35 = vld [vmem:[%s9477_s2 + $0xd8] sm:$0xff] }
 0x24d   :  { %1220 = vmatprep.subr.mxu0 %v6824_v20  ;;  %1274 = vmatprep.mubr.f32.mxu0 %v9660_v61 }
 0x24e   :  { %1221 = vmatpush1.msra.mxu0 %v6830_v45  ;;  %1345 = vmatprep.mubr.f32.mxu1 %v9660_v61 }
 0x24f   :  { %1222 = vmatprep.subr.mxu0 %v6836_v47  ;;  %1291 = vmatprep.subr.mxu1 %v7012_v27 }
 0x250   :  { %1223 = vmatpush1.msra.mxu0 %v6842_v22  ;;  %1292 = vmatpush1.msra.mxu1 %v7018_v62 }
 0x251   :  { %1224 = vmatprep.subr.mxu0 %v6848_v24  ;;  %1293 = vmatprep.subr.mxu1 %v7024_v1 }
 0x252   :  { %1225 = vmatpush1.msra.mxu0 %v6853_v49  ;;  %1294 = vmatpush1.msra.mxu1 %v7030_v29 }
 0x253   :  { %1226 = vmatprep.subr.mxu0 %v6858_v51  ;;  %1295 = vmatprep.subr.mxu1 %v7036_v31 }
 0x254   :  { %1227 = vmatpush1.msra.mxu0 %v6864_v26  ;;  %1296 = vmatpush1.msra.mxu1 %v7041_v0 }
 0x255   :  { %1228 = vmatprep.subr.mxu0 %v6870_v3  ;;  %1297 = vmatprep.subr.mxu1 %v7046_v2 }
 0x256   :  { %1229 = vmatpush1.msra.mxu0 %v6876_v53  ;;  %1298 = vmatpush1.msra.mxu1 %v7052_v33 }
 0x257   :  { %1230 = vmatprep.subr.mxu0 %v6882_v55  ;;  %1299 = vmatprep.subr.mxu1 %v7058_v35 }
 0x258   :  { %1231 = vmatpush1.msra.mxu0 %v6888_v28  ;;  %1300 = vmatpush1.msra.mxu1 %v7064_v15 }
 0x259   :  { %1232 = vmatprep.subr.mxu0 %v6894_v30  ;;  %1301 = vmatprep.subr.mxu1 %v7070_v23 }
 0x25a   :  { %1233 = vmatpush1.msra.mxu0 %v6900_v32  ;;  %1302 = vmatpush1.msra.mxu1 %v7076_v6 }
 0x25b   :  { %1234 = vmatprep.subr.mxu0 %v6906_v34  ;;  %1303 = vmatprep.subr.mxu1 %v7082_v8 }
 0x25c   :  { %1235 = vmatpush1.msra.mxu0 %v6912_v46  ;;  %1304 = vmatpush1.msra.mxu1 %v7088_v54 }
 0x25d   :  { %1236 = vmatprep.subr.mxu0 %v6918_v44  ;;  %1305 = vmatprep.subr.mxu1 %v7094_v5  ;;  %v9680_v5 = vld [vmem:[#allocation23_spill] sm:$0xff] }
 0x25e   :  { %1237 = vmatpush1.msra.mxu0 %v6924_v56  ;;  %1306 = vmatpush1.msra.mxu1 %v7100_v10 }
 0x25f   :  { %1238 = vmatprep.subr.mxu0 %v6930_v63  ;;  %1307 = vmatprep.subr.mxu1 %v7106_v36 }
 0x260   :  { %1239 = vmatpush1.msra.mxu0 %v6936_v52  ;;  %1308 = vmatpush1.msra.mxu1 %v7112_v19 }
 0x261   :  { %1240 = vmatprep.subr.mxu0 %v6942_v59  ;;  %1309 = vmatprep.subr.mxu1 %v7118_v11 }
 0x262   :  { %1241 = vmatpush1.msra.mxu0 %v6948_v17  ;;  %1310 = vmatpush1.msra.mxu1 %v7124_v57 }
 0x263   :  { %1455 = vmatprep.subr.mxu0 %v6764_v7  ;;  %1311 = vmatprep.subr.mxu1 %v7130_v9 }
 0x264   :  { %1312 = vmatpush1.msra.mxu1 %v7136_v58 }
 0x303   :  { %v1031_v42 = vpop.f32.mrf.mxu0  ;;  %v1102_v11 = vpop.f32.mrf.mxu1 }
 0x304   :  { %v1107_v50 = vadd.f32 %v1031_v42, %v6659_v40  ;;  %v1109_v57 = vadd.f32 %v1102_v11, %v9680_v5  ;;  %v7214_v11 = vld [vmem:[%s9477_s2 + $0x1b8] sm:$0xff] }
 0x305   :  { %v1033_v48 = vpop.f32.mrf.mxu0  ;;  %v1104_v36 = vpop.f32.mrf.mxu1 }
 0x306   :  { %v4865_v38 = vmul.f32 -1.442695, %v1107_v50  ;;  %v1108_v4 = vadd.f32 %v1033_v48, %v6661_v13  ;;  %v1110_v10 = vadd.f32 %v1104_v36, %v6695_v21 }
 0x308   :  { %5592 = vpow2.f32 %v4865_v38  ;;  %v4866_v19 = vmul.f32 -1.442695, %v1108_v4  ;;  %v4867_v54 = vmul.f32 -1.442695, %v1110_v10 }
 0x30a   :  { %5594 = vpow2.f32 %v4866_v19 }
 0x30b   :  { %5596 = vtanh.f32 %v1109_v57  ;;  %v7220_v57 = vld [vmem:[%s9477_s2 + $0x1b0] sm:$0xff] }
 0x30c   :  { %5598 = vpow2.f32 %v4867_v54  ;;  %v7202_v54 = vld [vmem:[%s9477_s2 + $0x1d8] sm:$0xff] }
 0x315   :  { %v5593_v9 = vpop.eup %5592 }
 0x316   :  { %v1114_v8 = vadd.f32 1.0, %v5593_v9  ;;  %v7226_v9 = vld [vmem:[%s9477_s2 + $0x198] sm:$0xff] }
 0x317   :  { %v5595_v58 = vpop.eup %5594 }
 0x318   :  { %5600 = vrcp.f32 %v1114_v8  ;;  %v1120_v40 = vadd.f32 1.0, %v5595_v58  ;;  %v5597_v42 = vpop.eup %5596  ;;  %v7196_v8 = vld [vmem:[%s9477_s2 + $0x1f0] sm:$0xff] }
 0x319   :  { %v5599_v13 = vpop.eup %5598  ;;  %v7232_v58 = vld [vmem:[%s9477_s2 + $0x190] sm:$0xff] }
 0x31a   :  { %5602 = vrcp.f32 %v1120_v40  ;;  %v1127_v19 = vadd.f32 1.0, %v5599_v13  ;;  %v7238_v40 = vld [vmem:[%s9477_s2 + $0x178] sm:$0xff]  ;;  %v9683_v13 = vld [vmem:[#allocation44_spill] sm:$0xff] }
 0x31c   :  { %5604 = vrcp.f32 %v1127_v19  ;;  %v9687_v19 = vld [vmem:[#allocation48_spill] sm:$0xff] }
 0x325   :  { %v5601_v50 = vpop.eup %5600 }
 0x326   :  { %v1131_v48 = vmul.f32 %v5601_v50, %v5597_v42  ;;  %v7244_v42 = vld [vmem:[%s9477_s2 + $0x170] sm:$0xff]  ;;  %v9684_v50 = vld [vmem:[#allocation45_spill] sm:$0xff] }
 0x327   :  { %v5603_v4 = vpop.eup %5602 }
 0x328   :  { %v1130_v38 = vmul.f32 %v5603_v4, %v6959_v60  ;;  %v7190_v60 = vld [vmem:[%s9477_s2 + $0x1f8] sm:$0xff] }
 0x329   :  { %v5605_v5 = vpop.eup %5604  ;;  %9682 = vst [vmem:[#allocation54_spill] sm:$0xff] %v7190_v60  ;;  %1526 = vmatprep.subr.mxu1 %v7190_v60  ;;  %v9686_v4 = vld [vmem:[#allocation47_spill] sm:$0xff] }
 0x32a   :  { %v7146_v21 = vadd.f32 %v1131_v48, %v1130_v38  ;;  %v9685_v48 = vld [vmem:[#allocation46_spill] sm:$0xff]  ;;  %v9688_v38 = vld [vmem:[#allocation49_spill] sm:$0xff] }
 0x32c   :  { %5606 = vtanh.f32 %v7146_v21 }
 0x339   :  { %v5607_v10 = vpop.eup %5606 }
 0x33a   :  { %v7149_v36 = vmul.f32 %v5607_v10, %v5605_v5  ;;  %v9689_v5 = vld [vmem:[#allocation50_spill] sm:$0xff]  ;;  %v9690_v10 = vld [vmem:[#allocation51_spill] sm:$0xff] }
 0x33c   :  { %9681 = vst [vmem:[#allocation23_spill] sm:$0xff] %v7149_v36  ;;  %1275 = vmatmul.mubr.f32.vlgmr.msra.gmra.mxu0 %v7149_v36  ;;  %1346 = vmatmul.mubr.f32.vlgmr.msra.gmra.mxu1 %v7149_v36  ;;  %v9691_v36 = vld [vmem:[#allocation52_spill] sm:$0xff] }
 0x33d   :  { %1456 = vmatpush1.msra.mxu0 %v6770_v12  ;;  %1519 = vmatprep.mubr.f32.mxu0 %v9660_v61 }
 0x33e   :  { %1457 = vmatprep.subr.mxu0 %v6776_v37  ;;  %1590 = vmatprep.mubr.f32.mxu1 %v9660_v61  ;;  %v9692_v61 = vld [vmem:[#allocation53_spill] sm:$0xff] }
 0x33f   :  { %1458 = vmatpush1.msra.mxu0 %v6782_v25  ;;  %1527 = vmatpush1.msra.mxu1 %v7196_v8 }
 0x340   :  { %1459 = vmatprep.subr.mxu0 %v6788_v39  ;;  %1528 = vmatprep.subr.mxu1 %v7202_v54 }
 0x341   :  { %1460 = vmatpush1.msra.mxu0 %v6794_v14 }
 0x342   :  { %1461 = vmatprep.subr.mxu0 %v6800_v16 }
 0x343   :  { %1462 = vmatpush1.msra.mxu0 %v6806_v41 }
 0x344   :  { %1463 = vmatprep.subr.mxu0 %v6812_v43 }
 0x345   :  { %1464 = vmatpush1.msra.mxu0 %v6818_v18 }
 0x346   :  { %1465 = vmatprep.subr.mxu0 %v6824_v20 }
 0x347   :  { %1466 = vmatpush1.msra.mxu0 %v6830_v45 }
 0x348   :  { %1467 = vmatprep.subr.mxu0 %v6836_v47 }
 0x349   :  { %1468 = vmatpush1.msra.mxu0 %v6842_v22 }
 0x34a   :  { %1469 = vmatprep.subr.mxu0 %v6848_v24 }
 0x34b   :  { %1470 = vmatpush1.msra.mxu0 %v6853_v49 }
 0x34c   :  { %1471 = vmatprep.subr.mxu0 %v6858_v51 }
 0x34d   :  { %1472 = vmatpush1.msra.mxu0 %v6864_v26 }
 0x34e   :  { %1473 = vmatprep.subr.mxu0 %v6870_v3 }
 0x34f   :  { %1474 = vmatpush1.msra.mxu0 %v6876_v53 }
 0x350   :  { %1475 = vmatprep.subr.mxu0 %v6882_v55 }
 0x351   :  { %1476 = vmatpush1.msra.mxu0 %v6888_v28 }
 0x352   :  { %1477 = vmatprep.subr.mxu0 %v6894_v30 }
 0x353   :  { %1478 = vmatpush1.msra.mxu0 %v6900_v32 }
 0x354   :  { %1479 = vmatprep.subr.mxu0 %v6906_v34 }
 0x355   :  { %1480 = vmatpush1.msra.mxu0 %v6912_v46  ;;  %v9695_v46 = vld [vmem:[#allocation25_spill] sm:$0xff] }
 0x356   :  { %1481 = vmatprep.subr.mxu0 %v6918_v44  ;;  %v9694_v44 = vld [vmem:[#allocation14_spill] sm:$0xff] }
 0x357   :  { %1482 = vmatpush1.msra.mxu0 %v6924_v56 }
 0x358   :  { %1483 = vmatprep.subr.mxu0 %v6930_v63 }
 0x359   :  { %1484 = vmatpush1.msra.mxu0 %v6936_v52 }
 0x35a   :  { %1485 = vmatprep.subr.mxu0 %v6942_v59  ;;  %v9693_v59 = vld [vmem:[#allocation13_spill] sm:$0xff] }
 0x35b   :  { %1486 = vmatpush1.msra.mxu0 %v6948_v17 }
 0x35c   :  { %1700 = vmatprep.subr.mxu0 %v6764_v7  ;;  %v7208_v7 = vld [vmem:[%s9477_s2 + $0x1d0] sm:$0xff] }
 0x35d   :  { %1529 = vmatpush1.msra.mxu1 %v7208_v7 }
 0x35e   :  { %1530 = vmatprep.subr.mxu1 %v7214_v11 }
 0x35f   :  { %1531 = vmatpush1.msra.mxu1 %v7220_v57 }
 0x360   :  { %1532 = vmatprep.subr.mxu1 %v7226_v9 }
 0x361   :  { %1533 = vmatpush1.msra.mxu1 %v7232_v58 }
 0x362   :  { %1534 = vmatprep.subr.mxu1 %v7238_v40 }
 0x363   :  { %1535 = vmatpush1.msra.mxu1 %v7244_v42 }
 0x364   :  { %1536 = vmatprep.subr.mxu1 %v7012_v27 }
 0x365   :  { %1537 = vmatpush1.msra.mxu1 %v7018_v62 }
 0x366   :  { %1538 = vmatprep.subr.mxu1 %v7024_v1 }
 0x367   :  { %1539 = vmatpush1.msra.mxu1 %v7030_v29 }
 0x368   :  { %1540 = vmatprep.subr.mxu1 %v7036_v31 }
 0x369   :  { %1541 = vmatpush1.msra.mxu1 %v7041_v0 }
 0x36a   :  { %1542 = vmatprep.subr.mxu1 %v7046_v2 }
 0x36b   :  { %1543 = vmatpush1.msra.mxu1 %v7052_v33 }
 0x36c   :  { %1544 = vmatprep.subr.mxu1 %v7058_v35 }
 0x36d   :  { %1545 = vmatpush1.msra.mxu1 %v7064_v15 }
 0x36e   :  { %1546 = vmatprep.subr.mxu1 %v7070_v23 }
 0x36f   :  { %1547 = vmatpush1.msra.mxu1 %v7076_v6 }
 0x370   :  { %1548 = vmatprep.subr.mxu1 %v9683_v13 }
 0x371   :  { %1549 = vmatpush1.msra.mxu1 %v9684_v50 }
 0x372   :  { %1550 = vmatprep.subr.mxu1 %v9685_v48  ;;  %v9696_v48 = vld [vmem:[#allocation24_spill] sm:$0xff] }
 0x373   :  { %1551 = vmatpush1.msra.mxu1 %v9686_v4 }
 0x374   :  { %1552 = vmatprep.subr.mxu1 %v9687_v19 }
 0x375   :  { %1553 = vmatpush1.msra.mxu1 %v9688_v38 }
 0x376   :  { %1554 = vmatprep.subr.mxu1 %v9689_v5 }
 0x377   :  { %1555 = vmatpush1.msra.mxu1 %v9690_v10 }
 0x378   :  { %1556 = vmatprep.subr.mxu1 %v9691_v36 }
 0x379   :  { %1557 = vmatpush1.msra.mxu1 %v9692_v61 }
 0x37a   :  { %1771 = vmatprep.subr.mxu1 %v7190_v60 }
 0x3fc   :  { %v1276_v17 = vpop.f32.mrf.mxu0  ;;  %v1347_v19 = vpop.f32.mrf.mxu1 }
 0x3fd   :  { %v1352_v52 = vadd.f32 %v1276_v17, %v9693_v59  ;;  %v1354_v36 = vadd.f32 %v1347_v19, %v9696_v48 }
 0x3fe   :  { %v1278_v63 = vpop.f32.mrf.mxu0  ;;  %v1349_v5 = vpop.f32.mrf.mxu1 }
 0x3ff   :  { %v4868_v56 = vmul.f32 -1.442695, %v1352_v52  ;;  %v1353_v4 = vadd.f32 %v1278_v63, %v9694_v44  ;;  %v1355_v10 = vadd.f32 %v1349_v5, %v9695_v46 }
 0x401   :  { %5608 = vpow2.f32 %v4868_v56  ;;  %v4869_v38 = vmul.f32 -1.442695, %v1353_v4  ;;  %v4870_v34 = vmul.f32 -1.442695, %v1355_v10  ;;  %v9718_v10 = vld [vmem:[#allocation27_spill] sm:$0xff] }
 0x403   :  { %5610 = vpow2.f32 %v4869_v38 }
 0x404   :  { %5612 = vtanh.f32 %v1354_v36 }
 0x405   :  { %5614 = vpow2.f32 %v4870_v34 }
 0x40e   :  { %v5609_v61 = vpop.eup %5608 }
 0x40f   :  { %v1359_v50 = vadd.f32 1.0, %v5609_v61 }
 0x410   :  { %v5611_v60 = vpop.eup %5610 }
 0x411   :  { %5616 = vrcp.f32 %v1359_v50  ;;  %v1365_v59 = vadd.f32 1.0, %v5611_v60  ;;  %v5613_v52 = vpop.eup %5612 }
 0x412   :  { %v5615_v44 = vpop.eup %5614 }
 0x413   :  { %5618 = vrcp.f32 %v1365_v59  ;;  %v1372_v4 = vadd.f32 1.0, %v5615_v44 }
 0x415   :  { %5620 = vrcp.f32 %v1372_v4 }
 0x41e   :  { %v5617_v56 = vpop.eup %5616 }
 0x41f   :  { %v1376_v63 = vmul.f32 %v5617_v56, %v5613_v52  ;;  %v9719_v52 = vld [vmem:[#allocation26_spill] sm:$0xff] }
 0x420   :  { %v5619_v17 = vpop.eup %5618 }
 0x421   :  { %v1375_v38 = vmul.f32 %v5619_v17, %v7146_v21  ;;  %v9717_v21 = vld [vmem:[#allocation16_spill] sm:$0xff] }
 0x422   :  { %v5621_v61 = vpop.eup %5620 }
 0x423   :  { %v7275_v46 = vadd.f32 %v1376_v63, %v1375_v38 }
 0x425   :  { %5622 = vtanh.f32 %v7275_v46 }
 0x432   :  { %v5623_v36 = vpop.eup %5622 }
 0x433   :  { %v7278_v48 = vmul.f32 %v5623_v36, %v5621_v61 }
 0x435   :  { %1520 = vmatmul.mubr.f32.vlgmr.msra.gmra.mxu0 %v7278_v48  ;;  %1591 = vmatmul.mubr.f32.vlgmr.msra.gmra.mxu1 %v7278_v48 }
 0x436   :  { %1701 = vmatpush1.msra.mxu0 %v6770_v12  ;;  %1772 = vmatpush1.msra.mxu1 %v7196_v8  ;;  %v9697_v12 = vld [vmem:[#allocation45_spill] sm:$0xff] }
 0x437   :  { %1702 = vmatprep.subr.mxu0 %v6776_v37  ;;  %1773 = vmatprep.subr.mxu1 %v7202_v54  ;;  %v9698_v37 = vld [vmem:[#allocation35_spill] sm:$0xff] }
 0x438   :  { %1703 = vmatpush1.msra.mxu0 %v6782_v25  ;;  %1774 = vmatpush1.msra.mxu1 %v7208_v7  ;;  %v9699_v25 = vld [vmem:[#allocation46_spill] sm:$0xff] }
 0x439   :  { %1704 = vmatprep.subr.mxu0 %v6788_v39  ;;  %1775 = vmatprep.subr.mxu1 %v7214_v11  ;;  %v9700_v39 = vld [vmem:[#allocation36_spill] sm:$0xff] }
 0x43a   :  { %1705 = vmatpush1.msra.mxu0 %v6794_v14  ;;  %1776 = vmatpush1.msra.mxu1 %v7220_v57  ;;  %v9701_v14 = vld [vmem:[#allocation47_spill] sm:$0xff] }
 0x43b   :  { %1706 = vmatprep.subr.mxu0 %v6800_v16  ;;  %1777 = vmatprep.subr.mxu1 %v7226_v9  ;;  %v9702_v16 = vld [vmem:[#allocation37_spill] sm:$0xff] }
 0x43c   :  { %1707 = vmatpush1.msra.mxu0 %v6806_v41  ;;  %1778 = vmatpush1.msra.mxu1 %v7232_v58  ;;  %v9703_v41 = vld [vmem:[#allocation48_spill] sm:$0xff] }
 0x43d   :  { %1708 = vmatprep.subr.mxu0 %v6812_v43  ;;  %1779 = vmatprep.subr.mxu1 %v7238_v40  ;;  %v9704_v43 = vld [vmem:[#allocation38_spill] sm:$0xff] }
 0x43e   :  { %1709 = vmatpush1.msra.mxu0 %v6818_v18  ;;  %1780 = vmatpush1.msra.mxu1 %v7244_v42  ;;  %v9705_v18 = vld [vmem:[#allocation49_spill] sm:$0xff] }
 0x43f   :  { %1710 = vmatprep.subr.mxu0 %v6824_v20  ;;  %1781 = vmatprep.subr.mxu1 %v7012_v27  ;;  %v9706_v20 = vld [vmem:[#allocation39_spill] sm:$0xff] }
 0x440   :  { %1711 = vmatpush1.msra.mxu0 %v6830_v45  ;;  %1782 = vmatpush1.msra.mxu1 %v7018_v62  ;;  %v9707_v45 = vld [vmem:[#allocation50_spill] sm:$0xff] }
 0x441   :  { %1712 = vmatprep.subr.mxu0 %v6836_v47  ;;  %1783 = vmatprep.subr.mxu1 %v7024_v1  ;;  %v9708_v47 = vld [vmem:[#allocation40_spill] sm:$0xff] }
 0x442   :  { %1713 = vmatpush1.msra.mxu0 %v6842_v22  ;;  %1784 = vmatpush1.msra.mxu1 %v7030_v29  ;;  %v9709_v22 = vld [vmem:[#allocation51_spill] sm:$0xff] }
 0x443   :  { %1714 = vmatprep.subr.mxu0 %v6848_v24  ;;  %1785 = vmatprep.subr.mxu1 %v7036_v31  ;;  %v9710_v24 = vld [vmem:[#allocation41_spill] sm:$0xff] }
 0x444   :  { %1715 = vmatpush1.msra.mxu0 %v6853_v49  ;;  %1786 = vmatpush1.msra.mxu1 %v7041_v0  ;;  %v9711_v49 = vld [vmem:[#allocation52_spill] sm:$0xff] }
 0x445   :  { %1716 = vmatprep.subr.mxu0 %v6858_v51  ;;  %1787 = vmatprep.subr.mxu1 %v7046_v2  ;;  %v9712_v51 = vld [vmem:[#allocation42_spill] sm:$0xff] }
 0x446   :  { %1717 = vmatpush1.msra.mxu0 %v6864_v26  ;;  %1788 = vmatpush1.msra.mxu1 %v7052_v33  ;;  %v9713_v26 = vmov 0.0  }
 0x447   :  { %1718 = vmatprep.subr.mxu0 %v6870_v3  ;;  %1789 = vmatprep.subr.mxu1 %v7058_v35  ;;  %v9714_v3 = vld [vmem:[#allocation53_spill] sm:$0xff] }
 0x448   :  { %1719 = vmatpush1.msra.mxu0 %v6876_v53  ;;  %1790 = vmatpush1.msra.mxu1 %v7064_v15  ;;  %v9715_v53 = vld [vmem:[#allocation54_spill] sm:$0xff] }
 0x449   :  { %1720 = vmatprep.subr.mxu0 %v6882_v55  ;;  %1791 = vmatprep.subr.mxu1 %v7070_v23 }
 0x44a   :  { %1721 = vmatpush1.msra.mxu0 %v6888_v28  ;;  %1792 = vmatpush1.msra.mxu1 %v7076_v6  ;;  %v9716_v28 = vld [vmem:[#allocation15_spill] sm:$0xff] }
 0x44b   :  { %1722 = vmatprep.subr.mxu0 %v6894_v30  ;;  %1793 = vmatprep.subr.mxu1 %v9683_v13 }
 0x44c   :  { %1723 = vmatpush1.msra.mxu0 %v6900_v32  ;;  %1794 = vmatpush1.msra.mxu1 %v9697_v12 }
 0x44d   :  { %1724 = vmatprep.subr.mxu0 %v9698_v37  ;;  %1795 = vmatprep.subr.mxu1 %v9699_v25 }
 0x44e   :  { %1725 = vmatpush1.msra.mxu0 %v9700_v39  ;;  %1796 = vmatpush1.msra.mxu1 %v9701_v14 }
 0x44f   :  { %1726 = vmatprep.subr.mxu0 %v9702_v16  ;;  %1797 = vmatprep.subr.mxu1 %v9703_v41 }
 0x450   :  { %1727 = vmatpush1.msra.mxu0 %v9704_v43  ;;  %1798 = vmatpush1.msra.mxu1 %v9705_v18 }
 0x451   :  { %1728 = vmatprep.subr.mxu0 %v9706_v20  ;;  %1799 = vmatprep.subr.mxu1 %v9707_v45 }
 0x452   :  { %1729 = vmatpush1.msra.mxu0 %v9708_v47  ;;  %1800 = vmatpush1.msra.mxu1 %v9709_v22 }
 0x453   :  { %1730 = vmatprep.subr.mxu0 %v9710_v24  ;;  %1801 = vmatprep.subr.mxu1 %v9711_v49 }
 0x454   :  { %1731 = vmatpush1.msra.mxu0 %v9712_v51  ;;  %1764 = vmatprep.mubr.f32.mxu0 %v9713_v26 }
 0x455   :  { %1802 = vmatpush1.msra.mxu1 %v9714_v3  ;;  %1835 = vmatprep.mubr.f32.mxu1 %v9713_v26 }
 0x456   :  { %2016 = vmatprep.subr.mxu1 %v9715_v53 }
 0x4f5   :  { %v1521_v55 = vpop.f32.mrf.mxu0  ;;  %v1592_v50 = vpop.f32.mrf.mxu1 }
 0x4f6   :  { %v1597_v30 = vadd.f32 %v1521_v55, %v9716_v28  ;;  %v1599_v44 = vadd.f32 %v1592_v50, %v9719_v52  ;;  %v7538_v28 = vld [vmem:[%s9477_s2 + $0x68] sm:$0xff] }
 0x4f7   :  { %v1523_v32 = vpop.f32.mrf.mxu0  ;;  %v1594_v5 = vpop.f32.mrf.mxu1  ;;  %v7574_v50 = vld [vmem:[%s9477_s2 + $0x8] sm:$0xff] }
 0x4f8   :  { %v4871_v34 = vmul.f32 -1.442695, %v1597_v30  ;;  %v1598_v60 = vadd.f32 %v1523_v32, %v9717_v21  ;;  %v1600_v59 = vadd.f32 %v1594_v5, %v9718_v10  ;;  %v7544_v30 = vld [vmem:[%s9477_s2 + $0x60] sm:$0xff]  ;;  %v7550_v32 = vld [vmem:[%s9477_s2 + $0x48] sm:$0xff] }
 0x4f9   :  { %v7562_v21 = vld [vmem:[%s9477_s2 + $0x28] sm:$0xff] }
 0x4fa   :  { %5624 = vpow2.f32 %v4871_v34  ;;  %v4872_v19 = vmul.f32 -1.442695, %v1598_v60  ;;  %v4873_v56 = vmul.f32 -1.442695, %v1600_v59  ;;  %v7556_v34 = vld [vmem:[%s9477_s2 + $0x40] sm:$0xff]  ;;  %v9720_v10 = vld [vmem:[#allocation17_spill] sm:$0xff] }
 0x4fb   :  { %v7568_v60 = vld [vmem:[%s9477_s2 + $0x20] sm:$0xff] }
 0x4fc   :  { %5626 = vpow2.f32 %v4872_v19  ;;  %v7580_v19 = vld [vmem:[%s9477_s2] sm:$0xff] }
 0x4fd   :  { %5628 = vtanh.f32 %v1599_v44 }
 0x4fe   :  { %5630 = vpow2.f32 %v4873_v56  ;;  %v9721_v56 = vld [vmem:[#allocation18_spill] sm:$0xff] }
 0x507   :  { %v5625_v63 = vpop.eup %5624 }
 0x508   :  { %v1604_v17 = vadd.f32 1.0, %v5625_v63 }
 0x509   :  { %v5627_v4 = vpop.eup %5626 }
 0x50a   :  { %5632 = vrcp.f32 %v1604_v17  ;;  %v1610_v38 = vadd.f32 1.0, %v5627_v4  ;;  %v5629_v61 = vpop.eup %5628 }
 0x50b   :  { %v5631_v36 = vpop.eup %5630 }
 0x50c   :  { %5634 = vrcp.f32 %v1610_v38  ;;  %v1617_v43 = vadd.f32 1.0, %v5631_v36 }
 0x50e   :  { %5636 = vrcp.f32 %v1617_v43 }
 0x517   :  { %v5633_v37 = vpop.eup %5632 }
 0x518   :  { %v1621_v39 = vmul.f32 %v5633_v37, %v5629_v61  ;;  %v9722_v61 = vld [vmem:[#allocation29_spill] sm:$0xff]  ;;  %v9723_v37 = vld [vmem:[#allocation28_spill] sm:$0xff] }
 0x519   :  { %v5635_v16 = vpop.eup %5634 }
 0x51a   :  { %v1620_v20 = vmul.f32 %v5635_v16, %v7275_v46  ;;  %v7474_v46 = vld [vmem:[%s9477_s2 + $0x120] sm:$0xff] }
 0x51b   :  { %v5637_v24 = vpop.eup %5636 }
 0x51c   :  { %v7352_v47 = vadd.f32 %v1621_v39, %v1620_v20 }
 0x51e   :  { %5638 = vtanh.f32 %v7352_v47 }
 0x52b   :  { %v5639_v51 = vpop.eup %5638 }
 0x52c   :  { %v7355_v55 = vmul.f32 %v5639_v51, %v5637_v24 }
 0x52e   :  { %1765 = vmatmul.mubr.f32.vlgmr.msra.gmra.mxu0 %v7355_v55  ;;  %1836 = vmatmul.mubr.f32.vlgmr.msra.gmra.mxu1 %v7355_v55 }
 0x52f   :  { %2017 = vmatpush1.msra.mxu1 %v7196_v8  ;;  %2009 = vmatprep.mubr.f32.mxu0 %v9713_v26 }
 0x530   :  { %2018 = vmatprep.subr.mxu1 %v7202_v54  ;;  %2080 = vmatprep.mubr.f32.mxu1 %v9713_v26 }
 0x531   :  { %2019 = vmatpush1.msra.mxu1 %v7208_v7 }
 0x532   :  { %2020 = vmatprep.subr.mxu1 %v7214_v11 }
 0x533   :  { %2021 = vmatpush1.msra.mxu1 %v7220_v57 }
 0x534   :  { %2022 = vmatprep.subr.mxu1 %v7226_v9 }
 0x535   :  { %2023 = vmatpush1.msra.mxu1 %v7232_v58 }
 0x536   :  { %2024 = vmatprep.subr.mxu1 %v7238_v40 }
 0x537   :  { %2025 = vmatpush1.msra.mxu1 %v7244_v42 }
 0x538   :  { %2026 = vmatprep.subr.mxu1 %v7012_v27  ;;  %v7396_v27 = vld [vmem:[%s9477_s2 + $0x1e8] sm:$0xff] }
 0x539   :  { %2027 = vmatpush1.msra.mxu1 %v7018_v62  ;;  %1945 = vmatprep.subr.mxu0 %v7396_v27  ;;  %v7402_v62 = vld [vmem:[%s9477_s2 + $0x1e0] sm:$0xff] }
 0x53a   :  { %2028 = vmatprep.subr.mxu1 %v7024_v1  ;;  %1946 = vmatpush1.msra.mxu0 %v7402_v62  ;;  %v7408_v1 = vld [vmem:[%s9477_s2 + $0x1c8] sm:$0xff] }
 0x53b   :  { %2029 = vmatpush1.msra.mxu1 %v7030_v29  ;;  %1947 = vmatprep.subr.mxu0 %v7408_v1  ;;  %v7414_v29 = vld [vmem:[%s9477_s2 + $0x1c0] sm:$0xff] }
 0x53c   :  { %2030 = vmatprep.subr.mxu1 %v7036_v31  ;;  %1948 = vmatpush1.msra.mxu0 %v7414_v29  ;;  %v7420_v31 = vld [vmem:[%s9477_s2 + $0x1a8] sm:$0xff] }
 0x53d   :  { %2031 = vmatpush1.msra.mxu1 %v7041_v0  ;;  %1949 = vmatprep.subr.mxu0 %v7420_v31  ;;  %v7426_v0 = vld [vmem:[%s9477_s2 + $0x1a0] sm:$0xff] }
 0x53e   :  { %2032 = vmatprep.subr.mxu1 %v7046_v2  ;;  %1950 = vmatpush1.msra.mxu0 %v7426_v0  ;;  %v7432_v2 = vld [vmem:[%s9477_s2 + $0x188] sm:$0xff] }
 0x53f   :  { %2033 = vmatpush1.msra.mxu1 %v7052_v33  ;;  %1951 = vmatprep.subr.mxu0 %v7432_v2  ;;  %v7438_v33 = vld [vmem:[%s9477_s2 + $0x180] sm:$0xff] }
 0x540   :  { %2034 = vmatprep.subr.mxu1 %v7058_v35  ;;  %1952 = vmatpush1.msra.mxu0 %v7438_v33  ;;  %v7444_v35 = vld [vmem:[%s9477_s2 + $0x168] sm:$0xff] }
 0x541   :  { %2035 = vmatpush1.msra.mxu1 %v7064_v15  ;;  %1953 = vmatprep.subr.mxu0 %v7444_v35  ;;  %v7450_v15 = vld [vmem:[%s9477_s2 + $0x160] sm:$0xff] }
 0x542   :  { %2036 = vmatprep.subr.mxu1 %v7070_v23  ;;  %1954 = vmatpush1.msra.mxu0 %v7450_v15  ;;  %v7456_v23 = vld [vmem:[%s9477_s2 + $0x148] sm:$0xff] }
 0x543   :  { %2037 = vmatpush1.msra.mxu1 %v7076_v6  ;;  %1955 = vmatprep.subr.mxu0 %v7456_v23  ;;  %v7462_v6 = vld [vmem:[%s9477_s2 + $0x140] sm:$0xff] }
 0x544   :  { %2038 = vmatprep.subr.mxu1 %v9683_v13  ;;  %1956 = vmatpush1.msra.mxu0 %v7462_v6  ;;  %v7468_v13 = vld [vmem:[%s9477_s2 + $0x128] sm:$0xff] }
 0x545   :  { %2039 = vmatpush1.msra.mxu1 %v9697_v12  ;;  %1957 = vmatprep.subr.mxu0 %v7468_v13  ;;  %v7480_v12 = vld [vmem:[%s9477_s2 + $0x108] sm:$0xff] }
 0x546   :  { %2040 = vmatprep.subr.mxu1 %v9699_v25  ;;  %1958 = vmatpush1.msra.mxu0 %v7474_v46  ;;  %v7485_v25 = vld [vmem:[%s9477_s2 + $0x100] sm:$0xff] }
 0x547   :  { %2041 = vmatpush1.msra.mxu1 %v9701_v14  ;;  %v7490_v14 = vld [vmem:[%s9477_s2 + $0xe8] sm:$0xff]  ;;  %1959 = vmatprep.subr.mxu0 %v7480_v12 }
 0x548   :  { %2042 = vmatprep.subr.mxu1 %v9703_v41  ;;  %v7496_v41 = vld [vmem:[%s9477_s2 + $0xe0] sm:$0xff]  ;;  %1960 = vmatpush1.msra.mxu0 %v7485_v25 }
 0x549   :  { %2043 = vmatpush1.msra.mxu1 %v9705_v18  ;;  %v7502_v18 = vld [vmem:[%s9477_s2 + $0xc8] sm:$0xff]  ;;  %1961 = vmatprep.subr.mxu0 %v7490_v14 }
 0x54a   :  { %2044 = vmatprep.subr.mxu1 %v9707_v45  ;;  %v7508_v45 = vld [vmem:[%s9477_s2 + $0xc0] sm:$0xff]  ;;  %1962 = vmatpush1.msra.mxu0 %v7496_v41 }
 0x54b   :  { %2045 = vmatpush1.msra.mxu1 %v9709_v22  ;;  %v7514_v22 = vld [vmem:[%s9477_s2 + $0xa8] sm:$0xff]  ;;  %1963 = vmatprep.subr.mxu0 %v7502_v18 }
 0x54c   :  { %2046 = vmatprep.subr.mxu1 %v9711_v49  ;;  %v7520_v49 = vld [vmem:[%s9477_s2 + $0xa0] sm:$0xff]  ;;  %1964 = vmatpush1.msra.mxu0 %v7508_v45 }
 0x54d   :  { %2047 = vmatpush1.msra.mxu1 %v9714_v3  ;;  %v7526_v3 = vld [vmem:[%s9477_s2 + $0x88] sm:$0xff]  ;;  %1965 = vmatprep.subr.mxu0 %v7514_v22 }
 0x54e   :  { %2261 = vmatprep.subr.mxu1 %v9715_v53  ;;  %v7532_v53 = vld [vmem:[%s9477_s2 + $0x80] sm:$0xff]  ;;  %1966 = vmatpush1.msra.mxu0 %v7520_v49 }
 0x54f   :  { %1967 = vmatprep.subr.mxu0 %v7526_v3 }
 0x550   :  { %1968 = vmatpush1.msra.mxu0 %v7532_v53 }
 0x551   :  { %1969 = vmatprep.subr.mxu0 %v7538_v28 }
 0x552   :  { %1970 = vmatpush1.msra.mxu0 %v7544_v30 }
 0x553   :  { %1971 = vmatprep.subr.mxu0 %v7550_v32 }
 0x554   :  { %1972 = vmatpush1.msra.mxu0 %v7556_v34 }
 0x555   :  { %1973 = vmatprep.subr.mxu0 %v7562_v21 }
 0x556   :  { %1974 = vmatpush1.msra.mxu0 %v7568_v60 }
 0x557   :  { %1975 = vmatprep.subr.mxu0 %v7574_v50 }
 0x558   :  { %1976 = vmatpush1.msra.mxu0 %v7580_v19 }
 0x559   :  { %2190 = vmatprep.subr.mxu0 %v7396_v27 }
 0x5ee   :  { %v1766_v5 = vpop.f32.mrf.mxu0  ;;  %v1837_v17 = vpop.f32.mrf.mxu1 }
 0x5ef   :  { %v1842_v59 = vadd.f32 %v1766_v5, %v9720_v10  ;;  %v1844_v39 = vadd.f32 %v1837_v17, %v9723_v37 }
 0x5f0   :  { %v1768_v52 = vpop.f32.mrf.mxu0  ;;  %v1839_v38 = vpop.f32.mrf.mxu1 }
 0x5f1   :  { %v4874_v44 = vmul.f32 -1.442695, %v1842_v59  ;;  %v1843_v63 = vadd.f32 %v1768_v52, %v9721_v56  ;;  %v1845_v36 = vadd.f32 %v1839_v38, %v9722_v61 }
 0x5f3   :  { %5640 = vpow2.f32 %v4874_v44  ;;  %v4875_v4 = vmul.f32 -1.442695, %v1843_v63  ;;  %v4876_v16 = vmul.f32 -1.442695, %v1845_v36 }
 0x5f5   :  { %5642 = vpow2.f32 %v4875_v4 }
 0x5f6   :  { %5644 = vtanh.f32 %v1844_v39 }
 0x5f7   :  { %5646 = vpow2.f32 %v4876_v16 }
 0x600   :  { %v5641_v43 = vpop.eup %5640 }
 0x601   :  { %v1849_v20 = vadd.f32 1.0, %v5641_v43 }
 0x602   :  { %v5643_v24 = vpop.eup %5642 }
 0x603   :  { %5648 = vrcp.f32 %v1849_v20  ;;  %v1855_v51 = vadd.f32 1.0, %v5643_v24  ;;  %v5645_v27 = vpop.eup %5644 }
 0x604   :  { %v5647_v5 = vpop.eup %5646 }
 0x605   :  { %5650 = vrcp.f32 %v1855_v51  ;;  %v1862_v44 = vadd.f32 1.0, %v5647_v5 }
 0x607   :  { %5652 = vrcp.f32 %v1862_v44  ;;  %v4945_v44 = vld [vmem:[%s9476_s1 + $0x3f0] sm:$0xff] }
 0x610   :  { %v5649_v10 = vpop.eup %5648 }
 0x611   :  { %v1866_v59 = vmul.f32 %v5649_v10, %v5645_v27 }
 0x612   :  { %v5651_v52 = vpop.eup %5650 }
 0x613   :  { %v1865_v56 = vmul.f32 %v5651_v52, %v7352_v47  ;;  %v2152_v47 = vld [vmem:[%s9477_s2 + $0xd0] sm:$0xff]  ;;  %v4943_v52 = vld [vmem:[%s9476_s1 + $0x3e0] sm:$0xff] }
 0x614   :  { %v5653_v17 = vpop.eup %5652 }
 0x615   :  { %v7591_v63 = vadd.f32 %v1866_v59, %v1865_v56  ;;  %v4940_v56 = vld [vmem:[%s9476_s1 + $0x3c8] sm:$0xff] }
 0x617   :  { %5654 = vtanh.f32 %v7591_v63 }
 0x624   :  { %v5655_v4 = vpop.eup %5654 }
 0x625   :  { %v7594_v38 = vmul.f32 %v5655_v4, %v5653_v17  ;;  %v4939_v17 = vld [vmem:[%s9476_s1 + $0x3c0] sm:$0xff]  ;;  %v4941_v4 = vld [vmem:[%s9476_s1 + $0x3d0] sm:$0xff] }
 0x627   :  { %2010 = vmatmul.mubr.f32.vlgmr.msra.gmra.mxu0 %v7594_v38  ;;  %2081 = vmatmul.mubr.f32.vlgmr.msra.gmra.mxu1 %v7594_v38 }
 0x628   :  { %2191 = vmatpush1.msra.mxu0 %v7402_v62  ;;  %2262 = vmatpush1.msra.mxu1 %v7196_v8  ;;  %v2169_v8 = vld [vmem:[%s9477_s2 + $0x158] sm:$0xff] }
 0x629   :  { %2192 = vmatprep.subr.mxu0 %v7408_v1  ;;  %2263 = vmatprep.subr.mxu1 %v7202_v54  ;;  %v2168_v54 = vld [vmem:[%s9477_s2 + $0x150] sm:$0xff]  ;;  %v2149_v62 = vld [vmem:[%s9477_s2 + $0xb8] sm:$0xff] }
 0x62a   :  { %2193 = vmatpush1.msra.mxu0 %v7414_v29  ;;  %2264 = vmatpush1.msra.mxu1 %v7208_v7  ;;  %v2165_v7 = vld [vmem:[%s9477_s2 + $0x138] sm:$0xff]  ;;  %v2148_v1 = vld [vmem:[%s9477_s2 + $0xb0] sm:$0xff] }
 0x62b   :  { %2194 = vmatprep.subr.mxu0 %v7420_v31  ;;  %2265 = vmatprep.subr.mxu1 %v7214_v11  ;;  %v2164_v11 = vld [vmem:[%s9477_s2 + $0x130] sm:$0xff]  ;;  %v2145_v29 = vld [vmem:[%s9477_s2 + $0x98] sm:$0xff]  ;;  %v4944_v31 = vld [vmem:[%s9476_s1 + $0x3e8] sm:$0xff] }
 0x62c   :  { %2195 = vmatpush1.msra.mxu0 %v7426_v0  ;;  %2266 = vmatpush1.msra.mxu1 %v7220_v57  ;;  %v2161_v57 = vld [vmem:[%s9477_s2 + $0x118] sm:$0xff]  ;;  %v2144_v0 = vld [vmem:[%s9477_s2 + $0x90] sm:$0xff] }
 0x62d   :  { %2196 = vmatprep.subr.mxu0 %v7432_v2  ;;  %2267 = vmatprep.subr.mxu1 %v7226_v9  ;;  %v2160_v9 = vld [vmem:[%s9477_s2 + $0x110] sm:$0xff]  ;;  %v2141_v2 = vld [vmem:[%s9477_s2 + $0x78] sm:$0xff] }
 0x62e   :  { %2197 = vmatpush1.msra.mxu0 %v7438_v33  ;;  %2268 = vmatpush1.msra.mxu1 %v7232_v58  ;;  %v2157_v58 = vld [vmem:[%s9477_s2 + $0xf8] sm:$0xff]  ;;  %v2140_v33 = vld [vmem:[%s9477_s2 + $0x70] sm:$0xff] }
 0x62f   :  { %2198 = vmatprep.subr.mxu0 %v7444_v35  ;;  %2269 = vmatprep.subr.mxu1 %v7238_v40  ;;  %v2156_v40 = vld [vmem:[%s9477_s2 + $0xf0] sm:$0xff]  ;;  %v2137_v35 = vld [vmem:[%s9477_s2 + $0x58] sm:$0xff] }
 0x630   :  { %2199 = vmatpush1.msra.mxu0 %v7450_v15  ;;  %2270 = vmatpush1.msra.mxu1 %v7244_v42  ;;  %v2153_v42 = vld [vmem:[%s9477_s2 + $0xd8] sm:$0xff]  ;;  %v2136_v15 = vld [vmem:[%s9477_s2 + $0x50] sm:$0xff] }
 0x631   :  { %2200 = vmatprep.subr.mxu0 %v7456_v23  ;;  %2254 = vmatprep.mubr.f32.mxu0 %v9713_v26  ;;  %v2133_v23 = vld [vmem:[%s9477_s2 + $0x38] sm:$0xff] }
 0x632   :  { %2201 = vmatpush1.msra.mxu0 %v7462_v6  ;;  %2325 = vmatprep.mubr.f32.mxu1 %v9713_v26  ;;  %v2132_v6 = vld [vmem:[%s9477_s2 + $0x30] sm:$0xff] }
 0x633   :  { %2202 = vmatprep.subr.mxu0 %v7468_v13  ;;  %2271 = vmatprep.subr.mxu1 %v2169_v8  ;;  %v2129_v13 = vld [vmem:[%s9477_s2 + $0x18] sm:$0xff]  ;;  %v4936_v8 = vld [vmem:[%s9476_s1 + $0x3a8] sm:$0xff] }
 0x634   :  { %2203 = vmatpush1.msra.mxu0 %v7474_v46  ;;  %2272 = vmatpush1.msra.mxu1 %v2168_v54  ;;  %v2128_v46 = vld [vmem:[%s9477_s2 + $0x10] sm:$0xff]  ;;  %v4938_v54 = vld [vmem:[%s9476_s1 + $0x3b8] sm:$0xff] }
 0x635   :  { %2204 = vmatprep.subr.mxu0 %v7480_v12  ;;  %2273 = vmatprep.subr.mxu1 %v2165_v7  ;;  %v4946_v12 = vld [vmem:[%s9476_s1 + $0x3f8] sm:$0xff]  ;;  %v4935_v7 = vld [vmem:[%s9476_s1 + $0x3a0] sm:$0xff] }
 0x636   :  { %2205 = vmatpush1.msra.mxu0 %v7485_v25  ;;  %2274 = vmatpush1.msra.mxu1 %v2164_v11  ;;  %v4937_v11 = vld [vmem:[%s9476_s1 + $0x3b0] sm:$0xff] }
 0x637   :  { %2206 = vmatprep.subr.mxu0 %v7490_v14  ;;  %2275 = vmatprep.subr.mxu1 %v2161_v57  ;;  %v9724_v14 = vld [vmem:[#allocation19_spill] sm:$0xff]  ;;  %v4932_v57 = vld [vmem:[%s9476_s1 + $0x388] sm:$0xff] }
 0x638   :  { %2207 = vmatpush1.msra.mxu0 %v7496_v41  ;;  %2276 = vmatpush1.msra.mxu1 %v2160_v9  ;;  %v4934_v9 = vld [vmem:[%s9476_s1 + $0x398] sm:$0xff] }
 0x639   :  { %2208 = vmatprep.subr.mxu0 %v7502_v18  ;;  %2277 = vmatprep.subr.mxu1 %v2157_v58  ;;  %v4931_v58 = vld [vmem:[%s9476_s1 + $0x380] sm:$0xff] }
 0x63a   :  { %2209 = vmatpush1.msra.mxu0 %v7508_v45  ;;  %2278 = vmatpush1.msra.mxu1 %v2156_v40  ;;  %v4933_v40 = vld [vmem:[%s9476_s1 + $0x390] sm:$0xff] }
 0x63b   :  { %2210 = vmatprep.subr.mxu0 %v7514_v22  ;;  %2279 = vmatprep.subr.mxu1 %v2153_v42  ;;  %v9725_v22 = vld [vmem:[#allocation20_spill] sm:$0xff]  ;;  %v4928_v42 = vld [vmem:[%s9476_s1 + $0x368] sm:$0xff] }
 0x63c   :  { %2211 = vmatpush1.msra.mxu0 %v7520_v49  ;;  %2280 = vmatpush1.msra.mxu1 %v2152_v47  ;;  %v4930_v47 = vld [vmem:[%s9476_s1 + $0x378] sm:$0xff] }
 0x63d   :  { %2212 = vmatprep.subr.mxu0 %v7526_v3  ;;  %2281 = vmatprep.subr.mxu1 %v2149_v62  ;;  %v4927_v62 = vld [vmem:[%s9476_s1 + $0x360] sm:$0xff] }
 0x63e   :  { %2213 = vmatpush1.msra.mxu0 %v7532_v53  ;;  %2282 = vmatpush1.msra.mxu1 %v2148_v1  ;;  %v4929_v1 = vld [vmem:[%s9476_s1 + $0x370] sm:$0xff] }
 0x63f   :  { %2214 = vmatprep.subr.mxu0 %v7538_v28  ;;  %2283 = vmatprep.subr.mxu1 %v2145_v29  ;;  %v4924_v29 = vld [vmem:[%s9476_s1 + $0x348] sm:$0xff] }
 0x640   :  { %2215 = vmatpush1.msra.mxu0 %v7544_v30  ;;  %2284 = vmatpush1.msra.mxu1 %v2144_v0  ;;  %v9726_v30 = vld [vmem:[#allocation31_spill] sm:$0xff]  ;;  %v4923_v0 = vld [vmem:[%s9476_s1 + $0x340] sm:$0xff] }
 0x641   :  { %2216 = vmatprep.subr.mxu0 %v7550_v32  ;;  %2285 = vmatprep.subr.mxu1 %v2141_v2  ;;  %v4925_v2 = vld [vmem:[%s9476_s1 + $0x350] sm:$0xff] }
 0x642   :  { %2217 = vmatpush1.msra.mxu0 %v7556_v34  ;;  %2286 = vmatpush1.msra.mxu1 %v2140_v33  ;;  %v9727_v34 = vld [vmem:[#allocation30_spill] sm:$0xff]  ;;  %v4920_v33 = vld [vmem:[%s9476_s1 + $0x328] sm:$0xff] }
 0x643   :  { %2218 = vmatprep.subr.mxu0 %v7562_v21  ;;  %2287 = vmatprep.subr.mxu1 %v2137_v35  ;;  %v4922_v35 = vld [vmem:[%s9476_s1 + $0x338] sm:$0xff] }
 0x644   :  { %2219 = vmatpush1.msra.mxu0 %v7568_v60  ;;  %2288 = vmatpush1.msra.mxu1 %v2136_v15  ;;  %v4919_v15 = vld [vmem:[%s9476_s1 + $0x320] sm:$0xff] }
 0x645   :  { %2220 = vmatprep.subr.mxu0 %v7574_v50  ;;  %2289 = vmatprep.subr.mxu1 %v2133_v23  ;;  %v4921_v23 = vld [vmem:[%s9476_s1 + $0x330] sm:$0xff] }
 0x646   :  { %2221 = vmatpush1.msra.mxu0 %v7580_v19  ;;  %2290 = vmatpush1.msra.mxu1 %v2132_v6  ;;  %v4916_v6 = vld [vmem:[%s9476_s1 + $0x308] sm:$0xff] }
 0x647   :  { %2464 = vmatprep.subr.mxu0 %v4944_v31  ;;  %2291 = vmatprep.subr.mxu1 %v2129_v13  ;;  %v4926_v31 = vld [vmem:[%s9476_s1 + $0x358] sm:$0xff] }
 0x648   :  { %2292 = vmatpush1.msra.mxu1 %v2128_v46  ;;  %v4918_v13 = vld [vmem:[%s9476_s1 + $0x318] sm:$0xff]  ;;  %v4915_v46 = vld [vmem:[%s9476_s1 + $0x300] sm:$0xff] }
 0x649   :  { %2577 = vmatprep.subr.mxu1 %v4946_v12  ;;  %v4917_v12 = vld [vmem:[%s9476_s1 + $0x310] sm:$0xff] }
 0x6e7   :  { %v2011_v25 = vpop.f32.mrf.mxu0  ;;  %v2082_v3 = vpop.f32.mrf.mxu1 }
 0x6e8   :  { %v2087_v41 = vadd.f32 %v2011_v25, %v9724_v14  ;;  %v2089_v21 = vadd.f32 %v2082_v3, %v9727_v34  ;;  %v4912_v25 = vld [vmem:[%s9476_s1 + $0x2e8] sm:$0xff]  ;;  %v4914_v14 = vld [vmem:[%s9476_s1 + $0x2f8] sm:$0xff]  ;;  %v4909_v3 = vld [vmem:[%s9476_s1 + $0x2d0] sm:$0xff] }
 0x6e9   :  { %v2013_v18 = vpop.f32.mrf.mxu0  ;;  %v2084_v28 = vpop.f32.mrf.mxu1  ;;  %v4900_v34 = vld [vmem:[%s9476_s1 + $0x288] sm:$0xff] }
 0x6ea   :  { %v4877_v45 = vmul.f32 -1.442695, %v2087_v41  ;;  %v2088_v49 = vadd.f32 %v2013_v18, %v9725_v22  ;;  %v2090_v32 = vadd.f32 %v2084_v28, %v9726_v30  ;;  %v4911_v41 = vld [vmem:[%s9476_s1 + $0x2e0] sm:$0xff]  ;;  %v4913_v18 = vld [vmem:[%s9476_s1 + $0x2f0] sm:$0xff]  ;;  %v4910_v22 = vld [vmem:[%s9476_s1 + $0x2d8] sm:$0xff] }
 0x6eb   :  { %v4906_v28 = vld [vmem:[%s9476_s1 + $0x2b8] sm:$0xff]  ;;  %v4903_v30 = vld [vmem:[%s9476_s1 + $0x2a0] sm:$0xff] }
 0x6ec   :  { %5656 = vpow2.f32 %v4877_v45  ;;  %v4878_v53 = vmul.f32 -1.442695, %v2088_v49  ;;  %v4879_v60 = vmul.f32 -1.442695, %v2090_v32  ;;  %v4908_v45 = vld [vmem:[%s9476_s1 + $0x2c8] sm:$0xff]  ;;  %v4907_v49 = vld [vmem:[%s9476_s1 + $0x2c0] sm:$0xff] }
 0x6ed   :  { %v4905_v32 = vld [vmem:[%s9476_s1 + $0x2b0] sm:$0xff] }
 0x6ee   :  { %5658 = vpow2.f32 %v4878_v53  ;;  %v4904_v53 = vld [vmem:[%s9476_s1 + $0x2a8] sm:$0xff] }
 0x6ef   :  { %5660 = vtanh.f32 %v2089_v21  ;;  %v4902_v21 = vld [vmem:[%s9476_s1 + $0x298] sm:$0xff] }
 0x6f0   :  { %5662 = vpow2.f32 %v4879_v60  ;;  %v4899_v60 = vld [vmem:[%s9476_s1 + $0x280] sm:$0xff] }
 0x6f9   :  { %v5657_v50 = vpop.eup %5656 }
 0x6fa   :  { %v2094_v19 = vadd.f32 1.0, %v5657_v50  ;;  %v4901_v50 = vld [vmem:[%s9476_s1 + $0x290] sm:$0xff] }
 0x6fb   :  { %v5659_v61 = vpop.eup %5658 }
 0x6fc   :  { %5664 = vrcp.f32 %v2094_v19  ;;  %v2100_v36 = vadd.f32 1.0, %v5659_v61  ;;  %v5661_v37 = vpop.eup %5660  ;;  %v4896_v19 = vld [vmem:[%s9476_s1 + $0x268] sm:$0xff]  ;;  %v4898_v61 = vld [vmem:[%s9476_s1 + $0x278] sm:$0xff] }
 0x6fd   :  { %v5663_v39 = vpop.eup %5662 }
 0x6fe   :  { %5666 = vrcp.f32 %v2100_v36  ;;  %v2107_v24 = vadd.f32 1.0, %v5663_v39  ;;  %v4895_v36 = vld [vmem:[%s9476_s1 + $0x260] sm:$0xff]  ;;  %v4892_v39 = vld [vmem:[%s9476_s1 + $0x248] sm:$0xff] }
 0x700   :  { %5668 = vrcp.f32 %v2107_v24  ;;  %v4888_v24 = vld [vmem:[%s9476_s1 + $0x228] sm:$0xff] }
 0x709   :  { %v5665_v16 = vpop.eup %5664 }
 0x70a   :  { %v2111_v43 = vmul.f32 %v5665_v16, %v5661_v37  ;;  %v4897_v37 = vld [vmem:[%s9476_s1 + $0x270] sm:$0xff]  ;;  %v4894_v16 = vld [vmem:[%s9476_s1 + $0x258] sm:$0xff] }
 0x70b   :  { %v5667_v20 = vpop.eup %5666 }
 0x70c   :  { %v2110_v51 = vmul.f32 %v5667_v20, %v7591_v63  ;;  %v4942_v63 = vld [vmem:[%s9476_s1 + $0x3d8] sm:$0xff]  ;;  %v4893_v20 = vld [vmem:[%s9476_s1 + $0x250] sm:$0xff] }
 0x70d   :  { %v5669_v5 = vpop.eup %5668 }
 0x70e   :  { %v7717_v27 = vadd.f32 %v2111_v43, %v2110_v51  ;;  %v4891_v43 = vld [vmem:[%s9476_s1 + $0x240] sm:$0xff]  ;;  %v4890_v51 = vld [vmem:[%s9476_s1 + $0x238] sm:$0xff] }
 0x710   :  { %5670 = vtanh.f32 %v7717_v27 }
 0x71d   :  { %v5671_v10 = vpop.eup %5670 }
 0x71e   :  { %v7720_v59 = vmul.f32 %v5671_v10, %v5669_v5  ;;  %v4887_v5 = vld [vmem:[%s9476_s1 + $0x220] sm:$0xff]  ;;  %v4889_v10 = vld [vmem:[%s9476_s1 + $0x230] sm:$0xff] }
 0x720   :  { %2255 = vmatmul.mubr.f32.vlgmr.msra.gmra.mxu0 %v7720_v59  ;;  %2326 = vmatmul.mubr.f32.vlgmr.msra.gmra.mxu1 %v7720_v59 }
 0x721   :  { %2465 = vmatpush1.msra.mxu0 %v4943_v52  ;;  %2578 = vmatpush1.msra.mxu1 %v4945_v44  ;;  %v4884_v52 = vld [vmem:[%s9476_s1 + $0x208] sm:$0xff]  ;;  %v4886_v44 = vld [vmem:[%s9476_s1 + $0x218] sm:$0xff] }
 0x722   :  { %2466 = vmatprep.subr.mxu0 %v4940_v56  ;;  %2579 = vmatprep.subr.mxu1 %v4942_v63  ;;  %v4883_v56 = vld [vmem:[%s9476_s1 + $0x200] sm:$0xff]  ;;  %v4885_v63 = vld [vmem:[%s9476_s1 + $0x210] sm:$0xff] }
 0x723   :  { %2467 = vmatpush1.msra.mxu0 %v4939_v17  ;;  %2580 = vmatpush1.msra.mxu1 %v4941_v4  ;;  %v9728_v17 = vld [vmem:[#allocation34_spill] sm:$0xff]  ;;  %v9729_v4 = vld [vmem:[#allocation43_spill] sm:$0xff] }
 0x724   :  { %2468 = vmatprep.subr.mxu0 %v4936_v8  ;;  %2581 = vmatprep.subr.mxu1 %v4938_v54  ;;  %v9730_v8 = vld [vmem:[#allocation23_spill] sm:$0xff]  ;;  %v7967_v54 = vld [vmem:[%s9477_s2 + $0x3c8] sm:$0xff] }
 0x725   :  { %2469 = vmatpush1.msra.mxu0 %v4935_v7  ;;  %2582 = vmatpush1.msra.mxu1 %v4937_v11  ;;  %v7972_v7 = vld [vmem:[%s9477_s2 + $0x3d8] sm:$0xff]  ;;  %v7979_v11 = vld [vmem:[%s9477_s2 + $0x3c0] sm:$0xff] }
 0x726   :  { %2470 = vmatprep.subr.mxu0 %v4932_v57  ;;  %2583 = vmatprep.subr.mxu1 %v4934_v9  ;;  %v7984_v57 = vld [vmem:[%s9477_s2 + $0x3d0] sm:$0xff]  ;;  %v7991_v9 = vld [vmem:[%s9477_s2 + $0x3a8] sm:$0xff] }
 0x727   :  { %2471 = vmatpush1.msra.mxu0 %v4931_v58  ;;  %2584 = vmatpush1.msra.mxu1 %v4933_v40  ;;  %v7996_v58 = vld [vmem:[%s9477_s2 + $0x3b8] sm:$0xff]  ;;  %v8003_v40 = vld [vmem:[%s9477_s2 + $0x3a0] sm:$0xff] }
 0x728   :  { %2472 = vmatprep.subr.mxu0 %v4928_v42  ;;  %2585 = vmatprep.subr.mxu1 %v4930_v47  ;;  %v8008_v42 = vld [vmem:[%s9477_s2 + $0x3b0] sm:$0xff]  ;;  %v8015_v47 = vld [vmem:[%s9477_s2 + $0x388] sm:$0xff] }
 0x729   :  { %2473 = vmatpush1.msra.mxu0 %v4927_v62  ;;  %2586 = vmatpush1.msra.mxu1 %v4929_v1  ;;  %v8020_v62 = vld [vmem:[%s9477_s2 + $0x398] sm:$0xff]  ;;  %v8027_v1 = vld [vmem:[%s9477_s2 + $0x380] sm:$0xff] }
 0x72a   :  { %2474 = vmatprep.subr.mxu0 %v4924_v29  ;;  %2587 = vmatprep.subr.mxu1 %v4926_v31  ;;  %v8032_v29 = vld [vmem:[%s9477_s2 + $0x390] sm:$0xff]  ;;  %v8039_v31 = vld [vmem:[%s9477_s2 + $0x368] sm:$0xff] }
 0x72b   :  { %2475 = vmatpush1.msra.mxu0 %v4923_v0  ;;  %2588 = vmatpush1.msra.mxu1 %v4925_v2  ;;  %v8044_v0 = vld [vmem:[%s9477_s2 + $0x378] sm:$0xff]  ;;  %v8051_v2 = vld [vmem:[%s9477_s2 + $0x360] sm:$0xff] }
 0x72c   :  { %2476 = vmatprep.subr.mxu0 %v4920_v33  ;;  %2589 = vmatprep.subr.mxu1 %v4922_v35  ;;  %v8056_v33 = vld [vmem:[%s9477_s2 + $0x370] sm:$0xff]  ;;  %v8063_v35 = vld [vmem:[%s9477_s2 + $0x348] sm:$0xff] }
 0x72d   :  { %2477 = vmatpush1.msra.mxu0 %v4919_v15  ;;  %2590 = vmatpush1.msra.mxu1 %v4921_v23  ;;  %v8068_v15 = vld [vmem:[%s9477_s2 + $0x358] sm:$0xff]  ;;  %v8075_v23 = vld [vmem:[%s9477_s2 + $0x340] sm:$0xff] }
 0x72e   :  { %2478 = vmatprep.subr.mxu0 %v4916_v6  ;;  %2591 = vmatprep.subr.mxu1 %v4918_v13  ;;  %v8080_v6 = vld [vmem:[%s9477_s2 + $0x350] sm:$0xff]  ;;  %v8087_v13 = vld [vmem:[%s9477_s2 + $0x328] sm:$0xff] }
 0x72f   :  { %2479 = vmatpush1.msra.mxu0 %v4915_v46  ;;  %2592 = vmatpush1.msra.mxu1 %v4917_v12  ;;  %v8092_v46 = vld [vmem:[%s9477_s2 + $0x338] sm:$0xff]  ;;  %v8099_v12 = vld [vmem:[%s9477_s2 + $0x320] sm:$0xff] }
 0x730   :  { %2480 = vmatprep.subr.mxu0 %v4912_v25  ;;  %2593 = vmatprep.subr.mxu1 %v4914_v14  ;;  %v8104_v25 = vld [vmem:[%s9477_s2 + $0x330] sm:$0xff]  ;;  %v8111_v14 = vld [vmem:[%s9477_s2 + $0x308] sm:$0xff] }
 0x731   :  { %2481 = vmatpush1.msra.mxu0 %v4911_v41  ;;  %2594 = vmatpush1.msra.mxu1 %v4913_v18  ;;  %v8116_v41 = vld [vmem:[%s9477_s2 + $0x318] sm:$0xff]  ;;  %v8123_v18 = vld [vmem:[%s9477_s2 + $0x300] sm:$0xff] }
 0x732   :  { %2482 = vmatprep.subr.mxu0 %v4908_v45  ;;  %2595 = vmatprep.subr.mxu1 %v4910_v22  ;;  %v8128_v45 = vld [vmem:[%s9477_s2 + $0x310] sm:$0xff]  ;;  %v8135_v22 = vld [vmem:[%s9477_s2 + $0x2e8] sm:$0xff] }
 0x733   :  { %2483 = vmatpush1.msra.mxu0 %v4907_v49  ;;  %2596 = vmatpush1.msra.mxu1 %v4909_v3  ;;  %v8140_v49 = vld [vmem:[%s9477_s2 + $0x2f8] sm:$0xff]  ;;  %v8147_v3 = vld [vmem:[%s9477_s2 + $0x2e0] sm:$0xff] }
 0x734   :  { %2484 = vmatprep.subr.mxu0 %v4904_v53  ;;  %2597 = vmatprep.subr.mxu1 %v4906_v28  ;;  %v8152_v53 = vld [vmem:[%s9477_s2 + $0x2f0] sm:$0xff]  ;;  %v8159_v28 = vld [vmem:[%s9477_s2 + $0x2c8] sm:$0xff] }
 0x735   :  { %2485 = vmatpush1.msra.mxu0 %v4903_v30  ;;  %2598 = vmatpush1.msra.mxu1 %v4905_v32  ;;  %v8164_v30 = vld [vmem:[%s9477_s2 + $0x2d8] sm:$0xff]  ;;  %v8171_v32 = vld [vmem:[%s9477_s2 + $0x2c0] sm:$0xff] }
 0x736   :  { %2486 = vmatprep.subr.mxu0 %v4900_v34  ;;  %2599 = vmatprep.subr.mxu1 %v4902_v21  ;;  %v8176_v34 = vld [vmem:[%s9477_s2 + $0x2d0] sm:$0xff]  ;;  %v8183_v21 = vld [vmem:[%s9477_s2 + $0x2a8] sm:$0xff] }
 0x737   :  { %2487 = vmatpush1.msra.mxu0 %v4899_v60  ;;  %2600 = vmatpush1.msra.mxu1 %v4901_v50  ;;  %v8188_v60 = vld [vmem:[%s9477_s2 + $0x2b8] sm:$0xff]  ;;  %v8195_v50 = vld [vmem:[%s9477_s2 + $0x2a0] sm:$0xff] }
 0x738   :  { %2488 = vmatprep.subr.mxu0 %v4896_v19  ;;  %2601 = vmatprep.subr.mxu1 %v4898_v61  ;;  %v8200_v19 = vld [vmem:[%s9477_s2 + $0x2b0] sm:$0xff]  ;;  %v8207_v61 = vld [vmem:[%s9477_s2 + $0x288] sm:$0xff] }
 0x739   :  { %2489 = vmatpush1.msra.mxu0 %v4895_v36  ;;  %2602 = vmatpush1.msra.mxu1 %v4897_v37  ;;  %9733 = vst [vmem:[#allocation14_spill] sm:$0xff] %v8207_v61  ;;  %v8212_v36 = vld [vmem:[%s9477_s2 + $0x298] sm:$0xff]  ;;  %v8219_v37 = vld [vmem:[%s9477_s2 + $0x280] sm:$0xff] }
 0x73a   :  { %2490 = vmatprep.subr.mxu0 %v4892_v39  ;;  %2603 = vmatprep.subr.mxu1 %v4894_v16  ;;  %9734 = vst [vmem:[#allocation25_spill] sm:$0xff] %v8212_v36  ;;  %9735 = vst [vmem:[#allocation24_spill] sm:$0xff] %v8219_v37  ;;  %v8224_v39 = vld [vmem:[%s9477_s2 + $0x290] sm:$0xff]  ;;  %v8231_v16 = vld [vmem:[%s9477_s2 + $0x268] sm:$0xff] }
 0x73b   :  { %2491 = vmatpush1.msra.mxu0 %v4891_v43  ;;  %2604 = vmatpush1.msra.mxu1 %v4893_v20  ;;  %9736 = vst [vmem:[#allocation45_spill] sm:$0xff] %v8224_v39  ;;  %9737 = vst [vmem:[#allocation35_spill] sm:$0xff] %v8231_v16  ;;  %v8236_v43 = vld [vmem:[%s9477_s2 + $0x278] sm:$0xff]  ;;  %v8243_v20 = vld [vmem:[%s9477_s2 + $0x260] sm:$0xff] }
 0x73c   :  { %2492 = vmatprep.subr.mxu0 %v4888_v24  ;;  %2605 = vmatprep.subr.mxu1 %v4890_v51  ;;  %9738 = vst [vmem:[#allocation46_spill] sm:$0xff] %v8236_v43  ;;  %9739 = vst [vmem:[#allocation36_spill] sm:$0xff] %v8243_v20  ;;  %v8248_v24 = vld [vmem:[%s9477_s2 + $0x270] sm:$0xff]  ;;  %v8255_v51 = vld [vmem:[%s9477_s2 + $0x248] sm:$0xff] }
 0x73d   :  { %2493 = vmatpush1.msra.mxu0 %v4887_v5  ;;  %2606 = vmatpush1.msra.mxu1 %v4889_v10  ;;  %9740 = vst [vmem:[#allocation47_spill] sm:$0xff] %v8248_v24  ;;  %9741 = vst [vmem:[#allocation37_spill] sm:$0xff] %v8255_v51  ;;  %v8260_v5 = vld [vmem:[%s9477_s2 + $0x258] sm:$0xff]  ;;  %v8267_v10 = vld [vmem:[%s9477_s2 + $0x240] sm:$0xff] }
 0x73e   :  { %2494 = vmatprep.subr.mxu0 %v4884_v52  ;;  %2607 = vmatprep.subr.mxu1 %v4886_v44  ;;  %9742 = vst [vmem:[#allocation48_spill] sm:$0xff] %v8260_v5  ;;  %9743 = vst [vmem:[#allocation38_spill] sm:$0xff] %v8267_v10  ;;  %v8272_v52 = vld [vmem:[%s9477_s2 + $0x250] sm:$0xff]  ;;  %v8279_v44 = vld [vmem:[%s9477_s2 + $0x228] sm:$0xff] }
 0x73f   :  { %2495 = vmatpush1.msra.mxu0 %v4883_v56  ;;  %2528 = vmatprep.mubr.f32.mxu0 %v9713_v26  ;;  %9744 = vst [vmem:[#allocation49_spill] sm:$0xff] %v8272_v52  ;;  %9745 = vst [vmem:[#allocation39_spill] sm:$0xff] %v8279_v44  ;;  %v8284_v56 = vld [vmem:[%s9477_s2 + $0x238] sm:$0xff] }
 0x740   :  { %2608 = vmatpush1.msra.mxu1 %v4885_v63  ;;  %2641 = vmatprep.mubr.f32.mxu1 %v9713_v26  ;;  %9746 = vst [vmem:[#allocation50_spill] sm:$0xff] %v8284_v56  ;;  %v8291_v63 = vld [vmem:[%s9477_s2 + $0x220] sm:$0xff] }
 0x741   :  { %2529 = vmatmul.mubr.f32.vlgmr.msra.gmra.mxu0 %v9728_v17  ;;  %2642 = vmatmul.mubr.f32.vlgmr.msra.gmra.mxu1 %v9728_v17  ;;  %9747 = vst [vmem:[#allocation40_spill] sm:$0xff] %v8291_v63  ;;  %v8296_v17 = vld [vmem:[%s9477_s2 + $0x230] sm:$0xff] }
 0x742   :  { %2534 = vmatprep.mubr.f32.mxu0 %v9713_v26  ;;  %2647 = vmatprep.mubr.f32.mxu1 %v9713_v26  ;;  %9748 = vst [vmem:[#allocation51_spill] sm:$0xff] %v8296_v17 }
 0x745   :  { %2535 = vmatmul.mubr.f32.gmra.mxu0 %v9729_v4  ;;  %2648 = vmatmul.mubr.f32.gmra.mxu1 %v9729_v4  ;;  %v8303_v4 = vld [vmem:[%s9477_s2 + $0x208] sm:$0xff] }
 0x746   :  { %2540 = vmatprep.mubr.f32.mxu0 %v9713_v26  ;;  %2653 = vmatprep.mubr.f32.mxu1 %v9713_v26  ;;  %9749 = vst [vmem:[#allocation41_spill] sm:$0xff] %v8303_v4 }
 0x749   :  { %2541 = vmatmul.mubr.f32.gmra.mxu0 %v9730_v8  ;;  %2654 = vmatmul.mubr.f32.gmra.mxu1 %v9730_v8  ;;  %v8308_v8 = vld [vmem:[%s9477_s2 + $0x218] sm:$0xff] }
 0x74a   :  { %2546 = vmatprep.mubr.f32.mxu0 %v9713_v26  ;;  %2659 = vmatprep.mubr.f32.mxu1 %v9713_v26  ;;  %9750 = vst [vmem:[#allocation52_spill] sm:$0xff] %v8308_v8 }
 0x74d   :  { %2547 = vmatmul.mubr.f32.gmra.mxu0 %v7278_v48  ;;  %2660 = vmatmul.mubr.f32.gmra.mxu1 %v7278_v48  ;;  %v7943_v48 = vld [vmem:[%s9477_s2 + $0x3e8] sm:$0xff] }
 0x74e   :  { %2552 = vmatprep.mubr.f32.mxu0 %v9713_v26  ;;  %2665 = vmatprep.mubr.f32.mxu1 %v9713_v26  ;;  %9731 = vst [vmem:[#allocation44_spill] sm:$0xff] %v7943_v48 }
 0x74f   :  { %2799 = vmatprep.subr.mxu0 %v7943_v48 }
 0x751   :  { %2553 = vmatmul.mubr.f32.gmra.mxu0 %v7355_v55  ;;  %2666 = vmatmul.mubr.f32.gmra.mxu1 %v7355_v55  ;;  %v7948_v55 = vld [vmem:[%s9477_s2 + $0x3f8] sm:$0xff] }
 0x752   :  { %2558 = vmatprep.mubr.f32.mxu0 %v9713_v26  ;;  %2671 = vmatprep.mubr.f32.mxu1 %v9713_v26  ;;  %9732 = vst [vmem:[#allocation13_spill] sm:$0xff] %v7948_v55 }
 0x753   :  { %2870 = vmatprep.subr.mxu1 %v7948_v55 }
 0x755   :  { %2559 = vmatmul.mubr.f32.gmra.mxu0 %v7594_v38  ;;  %2672 = vmatmul.mubr.f32.gmra.mxu1 %v7594_v38  ;;  %v7955_v38 = vld [vmem:[%s9477_s2 + $0x3e0] sm:$0xff] }
 0x756   :  { %2564 = vmatprep.mubr.f32.mxu0 %v9713_v26  ;;  %2677 = vmatprep.mubr.f32.mxu1 %v9713_v26 }
 0x757   :  { %2800 = vmatpush1.msra.mxu0 %v7955_v38 }
 0x758   :  { %2801 = vmatprep.subr.mxu0 %v7967_v54 }
 0x759   :  { %2565 = vmatmul.mubr.f32.gmra.mxu0 %v7720_v59  ;;  %2678 = vmatmul.mubr.f32.gmra.mxu1 %v7720_v59  ;;  %v7960_v59 = vld [vmem:[%s9477_s2 + $0x3f0] sm:$0xff] }
 0x75a   :  { %2570 = vmatprep.mubr.f32.mxu0 %v9713_v26  ;;  %2683 = vmatprep.mubr.f32.mxu1 %v9713_v26 }
 0x75b   :  { %2871 = vmatpush1.msra.mxu1 %v7960_v59  ;;  %2802 = vmatpush1.msra.mxu0 %v7979_v11 }
 0x75c   :  { %2872 = vmatprep.subr.mxu1 %v7972_v7  ;;  %2803 = vmatprep.subr.mxu0 %v7991_v9 }
 0x75d   :  { %2873 = vmatpush1.msra.mxu1 %v7984_v57  ;;  %2804 = vmatpush1.msra.mxu0 %v8003_v40 }
 0x75e   :  { %2874 = vmatprep.subr.mxu1 %v7996_v58  ;;  %2805 = vmatprep.subr.mxu0 %v8015_v47 }
 0x75f   :  { %2875 = vmatpush1.msra.mxu1 %v8008_v42  ;;  %2806 = vmatpush1.msra.mxu0 %v8027_v1 }
 0x760   :  { %2876 = vmatprep.subr.mxu1 %v8020_v62  ;;  %2807 = vmatprep.subr.mxu0 %v8039_v31 }
 0x761   :  { %2877 = vmatpush1.msra.mxu1 %v8032_v29  ;;  %2808 = vmatpush1.msra.mxu0 %v8051_v2 }
 0x762   :  { %2878 = vmatprep.subr.mxu1 %v8044_v0  ;;  %2809 = vmatprep.subr.mxu0 %v8063_v35 }
 0x763   :  { %2879 = vmatpush1.msra.mxu1 %v8056_v33  ;;  %2810 = vmatpush1.msra.mxu0 %v8075_v23 }
 0x764   :  { %2880 = vmatprep.subr.mxu1 %v8068_v15  ;;  %2811 = vmatprep.subr.mxu0 %v8087_v13 }
 0x765   :  { %2881 = vmatpush1.msra.mxu1 %v8080_v6  ;;  %2812 = vmatpush1.msra.mxu0 %v8099_v12 }
 0x766   :  { %2882 = vmatprep.subr.mxu1 %v8092_v46  ;;  %2813 = vmatprep.subr.mxu0 %v8111_v14 }
 0x767   :  { %2883 = vmatpush1.msra.mxu1 %v8104_v25  ;;  %2814 = vmatpush1.msra.mxu0 %v8123_v18 }
 0x768   :  { %2884 = vmatprep.subr.mxu1 %v8116_v41  ;;  %2815 = vmatprep.subr.mxu0 %v8135_v22 }
 0x769   :  { %2885 = vmatpush1.msra.mxu1 %v8128_v45  ;;  %2816 = vmatpush1.msra.mxu0 %v8147_v3 }
 0x76a   :  { %2886 = vmatprep.subr.mxu1 %v8140_v49  ;;  %2817 = vmatprep.subr.mxu0 %v8159_v28 }
 0x76b   :  { %2887 = vmatpush1.msra.mxu1 %v8152_v53  ;;  %2818 = vmatpush1.msra.mxu0 %v8171_v32 }
 0x76c   :  { %2888 = vmatprep.subr.mxu1 %v8164_v30  ;;  %2819 = vmatprep.subr.mxu0 %v8183_v21 }
 0x76d   :  { %2889 = vmatpush1.msra.mxu1 %v8176_v34  ;;  %2820 = vmatpush1.msra.mxu0 %v8195_v50 }
 0x76e   :  { %2890 = vmatprep.subr.mxu1 %v8188_v60  ;;  %2821 = vmatprep.subr.mxu0 %v8207_v61 }
 0x76f   :  { %2891 = vmatpush1.msra.mxu1 %v8200_v19  ;;  %2822 = vmatpush1.msra.mxu0 %v8219_v37 }
 0x770   :  { %2892 = vmatprep.subr.mxu1 %v8212_v36  ;;  %2823 = vmatprep.subr.mxu0 %v8231_v16  ;;  %v9756_v16 = vld [vmem:[#allocation32_spill] sm:$0xff] }
 0x771   :  { %2893 = vmatpush1.msra.mxu1 %v8224_v39  ;;  %2824 = vmatpush1.msra.mxu0 %v8243_v20 }
 0x772   :  { %2894 = vmatprep.subr.mxu1 %v8236_v43  ;;  %2825 = vmatprep.subr.mxu0 %v8255_v51  ;;  %v9755_v43 = vld [vmem:[#allocation33_spill] sm:$0xff] }
 0x773   :  { %2895 = vmatpush1.msra.mxu1 %v8248_v24  ;;  %2826 = vmatpush1.msra.mxu0 %v8267_v10 }
 0x774   :  { %2896 = vmatprep.subr.mxu1 %v8260_v5  ;;  %2827 = vmatprep.subr.mxu0 %v8279_v44  ;;  %v9753_v44 = vld [vmem:[#allocation21_spill] sm:$0xff]  ;;  %v9754_v5 = vld [vmem:[#allocation22_spill] sm:$0xff] }
 0x775   :  { %2897 = vmatpush1.msra.mxu1 %v8272_v52  ;;  %2828 = vmatpush1.msra.mxu0 %v8291_v63 }
 0x776   :  { %2898 = vmatprep.subr.mxu1 %v8284_v56  ;;  %v8313_v56 = vld [vmem:[%s9477_s2 + $0x200] sm:$0xff]  ;;  %2829 = vmatprep.subr.mxu0 %v8303_v4 }
 0x777   :  { %2899 = vmatpush1.msra.mxu1 %v8296_v17  ;;  %9751 = vst [vmem:[#allocation42_spill] sm:$0xff] %v8313_v56  ;;  %v8320_v17 = vld [vmem:[%s9477_s2 + $0x210] sm:$0xff]  ;;  %2830 = vmatpush1.msra.mxu0 %v8313_v56 }
 0x778   :  { %2900 = vmatprep.subr.mxu1 %v8308_v8  ;;  %9752 = vst [vmem:[#allocation53_spill] sm:$0xff] %v8320_v17  ;;  %3042 = vmatprep.subr.mxu0 %v7943_v48 }
 0x779   :  { %2901 = vmatpush1.msra.mxu1 %v8320_v17 }
 0x77a   :  { %3113 = vmatprep.subr.mxu1 %v7948_v55 }
 0x7e0   :  { %v2256_v63 = vpop.f32.mrf.mxu0  ;;  %v2327_v51 = vpop.f32.mrf.mxu1 }
 0x7e1   :  { %v2332_v52 = vadd.f32 %v2256_v63, %v9753_v44  ;;  %v2334_v17 = vadd.f32 %v2327_v51, %v9756_v16  ;;  %v9760_v51 = vld [vmem:[#allocation46_spill] sm:$0xff] }
 0x7e2   :  { %v2258_v10 = vpop.f32.mrf.mxu0  ;;  %v2329_v20 = vpop.f32.mrf.mxu1 }
 0x7e3   :  { %v4880_v4 = vmul.f32 -1.442695, %v2332_v52  ;;  %v2333_v8 = vadd.f32 %v2258_v10, %v9754_v5  ;;  %v2335_v56 = vadd.f32 %v2329_v20, %v9755_v43 }
 0x7e5   :  { %5672 = vpow2.f32 %v4880_v4  ;;  %v4881_v24 = vmul.f32 -1.442695, %v2333_v8  ;;  %v4882_v39 = vmul.f32 -1.442695, %v2335_v56  ;;  %v9761_v56 = vld [vmem:[#allocation36_spill] sm:$0xff] }
 0x7e7   :  { %5674 = vpow2.f32 %v4881_v24 }
 0x7e8   :  { %5676 = vtanh.f32 %v2334_v17  ;;  %v9762_v17 = vld [vmem:[#allocation47_spill] sm:$0xff] }
 0x7e9   :  { %5678 = vpow2.f32 %v4882_v39  ;;  %v9759_v39 = vld [vmem:[#allocation35_spill] sm:$0xff] }
 0x7f2   :  { %v5673_v48 = vpop.eup %5672 }
 0x7f3   :  { %v2339_v37 = vadd.f32 1.0, %v5673_v48 }
 0x7f4   :  { %v5675_v55 = vpop.eup %5674 }
 0x7f5   :  { %5680 = vrcp.f32 %v2339_v37  ;;  %v2345_v44 = vadd.f32 1.0, %v5675_v55  ;;  %v5677_v52 = vpop.eup %5676  ;;  %v4948_v55 = vld [vmem:[%s9479_s4 + $0x8] sm:$0xff] }
 0x7f6   :  { %v5679_v5 = vpop.eup %5678  ;;  %v9758_v37 = vld [vmem:[#allocation45_spill] sm:$0xff] }
 0x7f7   :  { %5682 = vrcp.f32 %v2345_v44  ;;  %v2352_v24 = vadd.f32 1.0, %v5679_v5  ;;  %v9763_v44 = vld [vmem:[#allocation37_spill] sm:$0xff]  ;;  %v9765_v5 = vld [vmem:[#allocation38_spill] sm:$0xff] }
 0x7f9   :  { %5684 = vrcp.f32 %v2352_v24  ;;  %v9769_v24 = vld [vmem:[#allocation40_spill] sm:$0xff] }
 0x802   :  { %v5681_v10 = vpop.eup %5680 }
 0x803   :  { %v2356_v63 = vmul.f32 %v5681_v10, %v5677_v52  ;;  %v9764_v52 = vld [vmem:[#allocation48_spill] sm:$0xff]  ;;  %v9766_v10 = vld [vmem:[#allocation49_spill] sm:$0xff] }
 0x804   :  { %v5683_v4 = vpop.eup %5682 }
 0x805   :  { %v2355_v8 = vmul.f32 %v5683_v4, %v7717_v27  ;;  %v9757_v27 = vld [vmem:[#allocation24_spill] sm:$0xff]  ;;  %v9768_v4 = vld [vmem:[#allocation50_spill] sm:$0xff] }
 0x806   :  { %v5685_v16 = vpop.eup %5684 }
 0x807   :  { %v2357_v43 = vadd.f32 %v2356_v63, %v2355_v8  ;;  %v9767_v63 = vld [vmem:[#allocation39_spill] sm:$0xff] }
 0x808   :  { %v9770_v8 = vld [vmem:[#allocation51_spill] sm:$0xff] }
 0x809   :  { %5686 = vtanh.f32 %v2357_v43  ;;  %2367 = vst [vmem:[#allocation8] sm:$0xff] %v2357_v43  ;;  %v9771_v43 = vld [vmem:[#allocation41_spill] sm:$0xff] }
 0x816   :  { %v5687_v48 = vpop.eup %5686 }
 0x817   :  { %v2359_v20 = vmul.f32 %v5687_v48, %v5685_v16  ;;  %v9772_v16 = vld [vmem:[#allocation52_spill] sm:$0xff]  ;;  %v9773_v48 = vld [vmem:[#allocation42_spill] sm:$0xff] }
 0x819   :  { %2571 = vmatmul.mubr.f32.gmra.mxu0 %v2359_v20  ;;  %2365 = vst [vmem:[#allocation6] sm:$0xff] %v2359_v20  ;;  %2684 = vmatmul.mubr.f32.gmra.mxu1 %v2359_v20  ;;  %v9774_v20 = vld [vmem:[#allocation53_spill] sm:$0xff] }
 0x81a   :  { %2863 = vmatprep.mubr.f32.mxu0 %v9713_v26  ;;  %2934 = vmatprep.mubr.f32.mxu1 %v9713_v26 }
 0x81d   :  { %2864 = vmatmul.mubr.f32.vlgmr.msra.gmra.mxu0 %v4948_v55  ;;  %2935 = vmatmul.mubr.f32.vlgmr.msra.gmra.mxu1 %v4948_v55  ;;  %v9775_v55 = vld [vmem:[#allocation44_spill] sm:$0xff] }
 0x81e   :  { %3043 = vmatpush1.msra.mxu0 %v7955_v38  ;;  %3114 = vmatpush1.msra.mxu1 %v7960_v59 }
 0x81f   :  { %3044 = vmatprep.subr.mxu0 %v7967_v54  ;;  %3115 = vmatprep.subr.mxu1 %v7972_v7 }
 0x820   :  { %3045 = vmatpush1.msra.mxu0 %v7979_v11  ;;  %3116 = vmatpush1.msra.mxu1 %v7984_v57 }
 0x821   :  { %3046 = vmatprep.subr.mxu0 %v7991_v9  ;;  %3117 = vmatprep.subr.mxu1 %v7996_v58 }
 0x822   :  { %3047 = vmatpush1.msra.mxu0 %v8003_v40  ;;  %3118 = vmatpush1.msra.mxu1 %v8008_v42 }
 0x823   :  { %3048 = vmatprep.subr.mxu0 %v8015_v47  ;;  %3119 = vmatprep.subr.mxu1 %v8020_v62 }
 0x824   :  { %3049 = vmatpush1.msra.mxu0 %v8027_v1  ;;  %3120 = vmatpush1.msra.mxu1 %v8032_v29 }
 0x825   :  { %3050 = vmatprep.subr.mxu0 %v8039_v31  ;;  %3121 = vmatprep.subr.mxu1 %v8044_v0 }
 0x826   :  { %3051 = vmatpush1.msra.mxu0 %v8051_v2  ;;  %3122 = vmatpush1.msra.mxu1 %v8056_v33 }
 0x827   :  { %3052 = vmatprep.subr.mxu0 %v8063_v35  ;;  %3123 = vmatprep.subr.mxu1 %v8068_v15 }
 0x828   :  { %3053 = vmatpush1.msra.mxu0 %v8075_v23  ;;  %3124 = vmatpush1.msra.mxu1 %v8080_v6 }
 0x829   :  { %3054 = vmatprep.subr.mxu0 %v8087_v13  ;;  %3125 = vmatprep.subr.mxu1 %v8092_v46 }
 0x82a   :  { %3055 = vmatpush1.msra.mxu0 %v8099_v12  ;;  %3126 = vmatpush1.msra.mxu1 %v8104_v25 }
 0x82b   :  { %3056 = vmatprep.subr.mxu0 %v8111_v14  ;;  %3127 = vmatprep.subr.mxu1 %v8116_v41 }
 0x82c   :  { %3057 = vmatpush1.msra.mxu0 %v8123_v18  ;;  %3128 = vmatpush1.msra.mxu1 %v8128_v45 }
 0x82d   :  { %3058 = vmatprep.subr.mxu0 %v8135_v22  ;;  %3129 = vmatprep.subr.mxu1 %v8140_v49 }
 0x82e   :  { %3059 = vmatpush1.msra.mxu0 %v8147_v3  ;;  %3130 = vmatpush1.msra.mxu1 %v8152_v53 }
 0x82f   :  { %3060 = vmatprep.subr.mxu0 %v8159_v28  ;;  %3131 = vmatprep.subr.mxu1 %v8164_v30 }
 0x830   :  { %3061 = vmatpush1.msra.mxu0 %v8171_v32  ;;  %3132 = vmatpush1.msra.mxu1 %v8176_v34 }
 0x831   :  { %3062 = vmatprep.subr.mxu0 %v8183_v21  ;;  %3133 = vmatprep.subr.mxu1 %v8188_v60 }
 0x832   :  { %3063 = vmatpush1.msra.mxu0 %v8195_v50  ;;  %3134 = vmatpush1.msra.mxu1 %v8200_v19 }
 0x833   :  { %3064 = vmatprep.subr.mxu0 %v8207_v61  ;;  %3135 = vmatprep.subr.mxu1 %v8212_v36 }
 0x834   :  { %3065 = vmatpush1.msra.mxu0 %v9757_v27  ;;  %3136 = vmatpush1.msra.mxu1 %v9758_v37 }
 0x835   :  { %3066 = vmatprep.subr.mxu0 %v9759_v39  ;;  %3137 = vmatprep.subr.mxu1 %v9760_v51 }
 0x836   :  { %3067 = vmatpush1.msra.mxu0 %v9761_v56  ;;  %3138 = vmatpush1.msra.mxu1 %v9762_v17 }
 0x837   :  { %3068 = vmatprep.subr.mxu0 %v9763_v44  ;;  %3139 = vmatprep.subr.mxu1 %v9764_v52 }
 0x838   :  { %3069 = vmatpush1.msra.mxu0 %v9765_v5  ;;  %3140 = vmatpush1.msra.mxu1 %v9766_v10 }
 0x839   :  { %3070 = vmatprep.subr.mxu0 %v9767_v63  ;;  %3141 = vmatprep.subr.mxu1 %v9768_v4  ;;  %v9776_v63 = vld [vmem:[#allocation13_spill] sm:$0xff]  ;;  %v2530_v4 = vpop.f32.mrf.mxu0 }
 0x83a   :  { %3071 = vmatpush1.msra.mxu0 %v9769_v24  ;;  %3142 = vmatpush1.msra.mxu1 %v9770_v8  ;;  %v2643_v24 = vpop.f32.mrf.mxu1 }
 0x83b   :  { %3072 = vmatprep.subr.mxu0 %v9771_v43  ;;  %3143 = vmatprep.subr.mxu1 %v9772_v16  ;;  %v2532_v10 = vpop.f32.mrf.mxu0 }
 0x83c   :  { %3073 = vmatpush1.msra.mxu0 %v9773_v48  ;;  %3106 = vmatprep.mubr.f32.mxu0 %v9713_v26  ;;  %v2645_v8 = vpop.f32.mrf.mxu1 }
 0x83d   :  { %3144 = vmatpush1.msra.mxu1 %v9774_v20  ;;  %3177 = vmatprep.mubr.f32.mxu1 %v9713_v26  ;;  %v8402_v5 = vpop.f32.mrf.mxu0 }
 0x83e   :  { %3285 = vmatprep.subr.mxu0 %v9775_v55  ;;  %3356 = vmatprep.subr.mxu1 %v9776_v63  ;;  %9777 = vst [vmem:[#allocation54_spill] sm:$0xff] %v8402_v5  ;;  %v8404_v43 = vpop.f32.mrf.mxu1 }
 0x83f   :  { %9778 = vst [vmem:[#allocation15_spill] sm:$0xff] %v8404_v43  ;;  %v8406_v16 = vpop.f32.mrf.mxu0 }
 0x840   :  { %9779 = vst [vmem:[#allocation16_spill] sm:$0xff] %v8406_v16  ;;  %v8408_v48 = vpop.f32.mrf.mxu1 }
 0x841   :  { %9780 = vst [vmem:[#allocation27_spill] sm:$0xff] %v8408_v48  ;;  %v8410_v52 = vpop.f32.mrf.mxu0 }
 0x842   :  { %9781 = vst [vmem:[#allocation26_spill] sm:$0xff] %v8410_v52  ;;  %v8412_v20 = vpop.f32.mrf.mxu1 }
 0x843   :  { %9782 = vst [vmem:[#allocation17_spill] sm:$0xff] %v8412_v20  ;;  %v8414_v26 = vpop.f32.mrf.mxu0 }
 0x844   :  { %9783 = vst [vmem:[#allocation18_spill] sm:$0xff] %v8414_v26  ;;  %v8416_v55 = vpop.f32.mrf.mxu1 }
 0x845   :  { %9784 = vst [vmem:[#allocation29_spill] sm:$0xff] %v8416_v55  ;;  %v8418_v63 = vpop.f32.mrf.mxu0 }
 0x846   :  { %9785 = vst [vmem:[#allocation28_spill] sm:$0xff] %v8418_v63  ;;  %v8420_v44 = vpop.f32.mrf.mxu1 }
 0x847   :  { %9786 = vst [vmem:[#allocation19_spill] sm:$0xff] %v8420_v44  ;;  %v8422_v17 = vpop.f32.mrf.mxu0 }
 0x848   :  { %9787 = vst [vmem:[#allocation20_spill] sm:$0xff] %v8422_v17  ;;  %v8424_v5 = vpop.f32.mrf.mxu1 }
 0x849   :  { %9788 = vst [vmem:[#allocation31_spill] sm:$0xff] %v8424_v5  ;;  %v8426_v43 = vpop.f32.mrf.mxu0 }
 0x84a   :  { %9789 = vst [vmem:[#allocation30_spill] sm:$0xff] %v8426_v43  ;;  %v8428_v16 = vpop.f32.mrf.mxu1 }
 0x84b   :  { %9790 = vst [vmem:[#allocation34_spill] sm:$0xff] %v8428_v16  ;;  %v8430_v48 = vpop.f32.mrf.mxu0  ;;  %v4947_v16 = vld [vmem:[%s9478_s3 + $0x4] sm:$0xf] }
 0x84c   :  { %9791 = vst [vmem:[#allocation43_spill] sm:$0xff] %v8430_v48  ;;  %v8432_v52 = vpop.f32.mrf.mxu1  ;;  %v9800_v48 = vld [vmem:[#allocation12_spill] sm:$0xff] }
 0x84d   :  { %9792 = vst [vmem:[#allocation23_spill] sm:$0xff] %v8432_v52  ;;  %v8434_v20 = vpop.f32.mrf.mxu0  ;;  %v9801_v52 = vsub.s32 0, %v9800_v48 }
 0x84e   :  { %9793 = vst [vmem:[#allocation21_spill] sm:$0xff] %v8434_v20  ;;  %v8436_v26 = vpop.f32.mrf.mxu1 }
 0x84f   :  { %9794 = vst [vmem:[#allocation22_spill] sm:$0xff] %v8436_v26  ;;  %v8438_v55 = vpop.f32.mrf.mxu0  ;;  %v8453_v5 = vrot.slane %v4947_v16, %v9801_v52 }
 0x850   :  { %9795 = vst [vmem:[#allocation33_spill] sm:$0xff] %v8438_v55  ;;  %v8440_v63 = vpop.f32.mrf.mxu1 }
 0x851   :  { %9796 = vst [vmem:[#allocation32_spill] sm:$0xff] %v8440_v63  ;;  %v8442_v44 = vpop.f32.mrf.mxu0  ;;  %9802 = vst [vmem:[#allocation12_spill] sm:$0xff] %v8453_v5  ;;  %v9805_v63 = vsub.s32 1, %v9800_v48  ;;  %v2531_v56 = vadd.f32 %v2530_v4, %v8453_v5 }
 0x852   :  { %9797 = vst [vmem:[#allocation44_spill] sm:$0xff] %v8442_v44  ;;  %v8444_v17 = vpop.f32.mrf.mxu1 }
 0x853   :  { %9798 = vst [vmem:[#allocation13_spill] sm:$0xff] %v8444_v17  ;;  %v8449_v43 = vpop.f32.mrf.mxu0  ;;  %v8461_v55 = vrot.slane %v4947_v16, %v9805_v63  ;;  %v9809_v63 = vsub.s32 3, %v9800_v48 }
 0x854   :  { %9799 = vst [vmem:[#allocation55_spill] sm:$0xff] %v8449_v43  ;;  %v8455_v20 = vpop.f32.mrf.mxu1 }
 0x855   :  { %9803 = vst [vmem:[#allocation56_spill] sm:$0xff] %v8455_v20  ;;  %v2533_v43 = vadd.f32 %v2532_v10, %v8461_v55  ;;  %v8473_v61 = vrot.slane %v4947_v16, %v9809_v63 }
 0x857   :  { %v2646_v4 = vadd.f32 %v2645_v8, %v8473_v61 }
 0x8d9   :  { %v8457_v26 = vpop.f32.mrf.mxu0  ;;  %v8463_v44 = vpop.f32.mrf.mxu1 }
 0x8da   :  { %9804 = vst [vmem:[#allocation57_spill] sm:$0xff] %v8457_v26  ;;  %9806 = vst [vmem:[#allocation58_spill] sm:$0xff] %v8463_v44 }
 0x8db   :  { %v8465_v17 = vpop.f32.mrf.mxu0  ;;  %v8469_v39 = vpop.f32.mrf.mxu1 }
 0x8dc   :  { %9807 = vst [vmem:[#allocation59_spill] sm:$0xff] %v8465_v17  ;;  %9808 = vst [vmem:[#allocation60_spill] sm:$0xff] %v8469_v39  ;;  %v9810_v17 = vsub.s32 2, %v9800_v48 }
 0x8dd   :  { %v2865_v51 = vpop.f32.mrf.mxu0  ;;  %v2936_v26 = vpop.f32.mrf.mxu1 }
 0x8de   :  { %v2941_v52 = vadd.f32 %v2865_v51, %v2531_v56  ;;  %v8478_v10 = vrot.slane %v4947_v16, %v9810_v17  ;;  %v4949_v17 = vld [vmem:[%s9480_s5 + $0x8] sm:$0xff] }
 0x8df   :  { %v2867_v37 = vpop.f32.mrf.mxu0  ;;  %v2938_v44 = vpop.f32.mrf.mxu1 }
 0x8e0   :  { %v5014_v20 = vmul.f32 -1.442695, %v2941_v52  ;;  %v2942_v27 = vadd.f32 %v2867_v37, %v2533_v43  ;;  %v2944_v39 = vadd.f32 %v2938_v44, %v2646_v4  ;;  %v2644_v51 = vadd.f32 %v2643_v24, %v8478_v10 }
 0x8e2   :  { %5688 = vpow2.f32 %v5014_v20  ;;  %v5015_v36 = vmul.f32 -1.442695, %v2942_v27  ;;  %v5016_v56 = vmul.f32 -1.442695, %v2944_v39  ;;  %v2943_v43 = vadd.f32 %v2936_v26, %v2644_v51 }
 0x8e4   :  { %5690 = vpow2.f32 %v5015_v36 }
 0x8e5   :  { %5692 = vpow2.f32 %v5016_v56 }
 0x8ef   :  { %v5689_v37 = vpop.eup %5688 }
 0x8f0   :  { %v2948_v20 = vadd.f32 1.0, %v5689_v37 }
 0x8f1   :  { %v5691_v27 = vpop.eup %5690 }
 0x8f2   :  { %5694 = vrcp.f32 %v2948_v20  ;;  %v2954_v52 = vadd.f32 1.0, %v5691_v27  ;;  %v5693_v36 = vpop.eup %5692 }
 0x8f3   :  { %5696 = vtanh.f32 %v2943_v43  ;;  %v2961_v16 = vadd.f32 1.0, %v5693_v36  ;;  %v9836_v43 = vld [vmem:[#allocation15_spill] sm:$0xff] }
 0x8f4   :  { %5698 = vrcp.f32 %v2954_v52  ;;  %v2650_v20 = vadd.f32 %v9836_v43, %v8478_v10  ;;  %v8641_v43 = vld [vmem:[%s9477_s2 + $0x3b0] sm:$0xff] }
 0x8f5   :  { %5700 = vrcp.f32 %v2961_v16 }
 0x8ff   :  { %v5695_v63 = vpop.eup %5694 }
 0x900   :  { %v5697_v8 = vpop.eup %5696 }
 0x901   :  { %v5699_v44 = vpop.eup %5698  ;;  %v2965_v24 = vmul.f32 %v5697_v8, %v5695_v63 }
 0x902   :  { %v2964_v39 = vmul.f32 %v5699_v44, %v4949_v17  ;;  %v5701_v26 = vpop.eup %5700 }
 0x904   :  { %v8484_v48 = vadd.f32 %v2965_v24, %v2964_v39 }
 0x906   :  { %5702 = vtanh.f32 %v8484_v48 }
 0x913   :  { %v5703_v4 = vpop.eup %5702 }
 0x914   :  { %v8487_v51 = vmul.f32 %v5703_v4, %v5701_v26 }
 0x916   :  { %9811 = vst [vmem:[#allocation61_spill] sm:$0xff] %v8487_v51  ;;  %3107 = vmatmul.mubr.f32.vlgmr.msra.gmra.mxu0 %v8487_v51  ;;  %3178 = vmatmul.mubr.f32.vlgmr.msra.gmra.mxu1 %v8487_v51  ;;  %v8749_v51 = vld [vmem:[%s9477_s2 + $0x318] sm:$0xff] }
 0x917   :  { %3286 = vmatpush1.msra.mxu0 %v7955_v38  ;;  %3357 = vmatpush1.msra.mxu1 %v7960_v59  ;;  %v9812_v38 = vld [vmem:[#allocation14_spill] sm:$0xff]  ;;  %v9813_v59 = vld [vmem:[#allocation25_spill] sm:$0xff] }
 0x918   :  { %3287 = vmatprep.subr.mxu0 %v7967_v54  ;;  %3358 = vmatprep.subr.mxu1 %v7972_v7  ;;  %v9814_v54 = vld [vmem:[#allocation24_spill] sm:$0xff]  ;;  %v9815_v7 = vld [vmem:[#allocation45_spill] sm:$0xff] }
 0x919   :  { %3288 = vmatpush1.msra.mxu0 %v7979_v11  ;;  %3359 = vmatpush1.msra.mxu1 %v7984_v57  ;;  %v9816_v11 = vld [vmem:[#allocation35_spill] sm:$0xff]  ;;  %v9817_v57 = vld [vmem:[#allocation46_spill] sm:$0xff] }
 0x91a   :  { %3289 = vmatprep.subr.mxu0 %v7991_v9  ;;  %3360 = vmatprep.subr.mxu1 %v7996_v58  ;;  %v9818_v9 = vld [vmem:[#allocation36_spill] sm:$0xff]  ;;  %v9819_v58 = vld [vmem:[#allocation47_spill] sm:$0xff] }
 0x91b   :  { %3290 = vmatpush1.msra.mxu0 %v8003_v40  ;;  %3361 = vmatpush1.msra.mxu1 %v8008_v42  ;;  %v9820_v40 = vld [vmem:[#allocation37_spill] sm:$0xff]  ;;  %v9821_v42 = vld [vmem:[#allocation48_spill] sm:$0xff]  ;;  %9844 = vst [vmem:[#allocation47_spill] sm:$0xff] %v8749_v51 }
 0x91c   :  { %3291 = vmatprep.subr.mxu0 %v8015_v47  ;;  %3362 = vmatprep.subr.mxu1 %v8020_v62  ;;  %v9822_v47 = vld [vmem:[#allocation38_spill] sm:$0xff]  ;;  %v9823_v62 = vld [vmem:[#allocation49_spill] sm:$0xff] }
 0x91d   :  { %3292 = vmatpush1.msra.mxu0 %v8027_v1  ;;  %3363 = vmatpush1.msra.mxu1 %v8032_v29  ;;  %v9824_v1 = vld [vmem:[#allocation39_spill] sm:$0xff]  ;;  %v9825_v29 = vld [vmem:[#allocation50_spill] sm:$0xff] }
 0x91e   :  { %3293 = vmatprep.subr.mxu0 %v8039_v31  ;;  %3364 = vmatprep.subr.mxu1 %v8044_v0  ;;  %v9826_v31 = vld [vmem:[#allocation40_spill] sm:$0xff]  ;;  %v9827_v0 = vld [vmem:[#allocation51_spill] sm:$0xff] }
 0x91f   :  { %3294 = vmatpush1.msra.mxu0 %v8051_v2  ;;  %3365 = vmatpush1.msra.mxu1 %v8056_v33  ;;  %v9828_v2 = vld [vmem:[#allocation41_spill] sm:$0xff]  ;;  %v9829_v33 = vld [vmem:[#allocation52_spill] sm:$0xff] }
 0x920   :  { %3295 = vmatprep.subr.mxu0 %v8063_v35  ;;  %3366 = vmatprep.subr.mxu1 %v8068_v15  ;;  %v9830_v35 = vld [vmem:[#allocation42_spill] sm:$0xff]  ;;  %v9831_v15 = vmov 0.0  }
 0x921   :  { %3296 = vmatpush1.msra.mxu0 %v8075_v23  ;;  %3367 = vmatpush1.msra.mxu1 %v8080_v6  ;;  %v9832_v23 = vld [vmem:[#allocation53_spill] sm:$0xff]  ;;  %v9833_v6 = vld [vmem:[#allocation54_spill] sm:$0xff] }
 0x922   :  { %3297 = vmatprep.subr.mxu0 %v8087_v13  ;;  %3368 = vmatprep.subr.mxu1 %v8092_v46  ;;  %v2537_v13 = vadd.f32 %v9833_v6, %v8453_v5 }
 0x923   :  { %3298 = vmatpush1.msra.mxu0 %v8099_v12  ;;  %3369 = vmatpush1.msra.mxu1 %v8104_v25  ;;  %v9834_v12 = vld [vmem:[#allocation16_spill] sm:$0xff] }
 0x924   :  { %3299 = vmatprep.subr.mxu0 %v8111_v14  ;;  %3370 = vmatprep.subr.mxu1 %v8116_v41  ;;  %v2539_v25 = vadd.f32 %v9834_v12, %v8461_v55 }
 0x925   :  { %3300 = vmatpush1.msra.mxu0 %v8123_v18  ;;  %3371 = vmatpush1.msra.mxu1 %v8128_v45 }
 0x926   :  { %3301 = vmatprep.subr.mxu0 %v8135_v22  ;;  %3372 = vmatprep.subr.mxu1 %v8140_v49 }
 0x927   :  { %3302 = vmatpush1.msra.mxu0 %v8147_v3  ;;  %3373 = vmatpush1.msra.mxu1 %v8152_v53  ;;  %v9835_v53 = vld [vmem:[#allocation27_spill] sm:$0xff] }
 0x928   :  { %3303 = vmatprep.subr.mxu0 %v8159_v28  ;;  %3374 = vmatprep.subr.mxu1 %v8164_v30  ;;  %v2652_v56 = vadd.f32 %v9835_v53, %v8473_v61  ;;  %v8624_v53 = vld [vmem:[%s9477_s2 + $0x3a8] sm:$0xff] }
 0x929   :  { %3304 = vmatpush1.msra.mxu0 %v8171_v32  ;;  %3375 = vmatpush1.msra.mxu1 %v8176_v34 }
 0x92a   :  { %3305 = vmatprep.subr.mxu0 %v8183_v21  ;;  %3376 = vmatprep.subr.mxu1 %v8188_v60 }
 0x92b   :  { %3306 = vmatpush1.msra.mxu0 %v8195_v50  ;;  %3377 = vmatpush1.msra.mxu1 %v8200_v19 }
 0x92c   :  { %3307 = vmatprep.subr.mxu0 %v9812_v38  ;;  %3378 = vmatprep.subr.mxu1 %v9813_v59 }
 0x92d   :  { %3308 = vmatpush1.msra.mxu0 %v9814_v54  ;;  %3379 = vmatpush1.msra.mxu1 %v9815_v7 }
 0x92e   :  { %3309 = vmatprep.subr.mxu0 %v9816_v11  ;;  %3380 = vmatprep.subr.mxu1 %v9817_v57 }
 0x92f   :  { %3310 = vmatpush1.msra.mxu0 %v9818_v9  ;;  %3381 = vmatpush1.msra.mxu1 %v9819_v58 }
 0x930   :  { %3311 = vmatprep.subr.mxu0 %v9820_v40  ;;  %3382 = vmatprep.subr.mxu1 %v9821_v42 }
 0x931   :  { %3312 = vmatpush1.msra.mxu0 %v9822_v47  ;;  %3383 = vmatpush1.msra.mxu1 %v9823_v62 }
 0x932   :  { %3313 = vmatprep.subr.mxu0 %v9824_v1  ;;  %3384 = vmatprep.subr.mxu1 %v9825_v29 }
 0x933   :  { %3314 = vmatpush1.msra.mxu0 %v9826_v31  ;;  %3385 = vmatpush1.msra.mxu1 %v9827_v0 }
 0x934   :  { %3315 = vmatprep.subr.mxu0 %v9828_v2  ;;  %3386 = vmatprep.subr.mxu1 %v9829_v33 }
 0x935   :  { %3316 = vmatpush1.msra.mxu0 %v9830_v35  ;;  %3349 = vmatprep.mubr.f32.mxu0 %v9831_v15 }
 0x936   :  { %3387 = vmatpush1.msra.mxu1 %v9832_v23  ;;  %3420 = vmatprep.mubr.f32.mxu1 %v9831_v15 }
 0x9d6   :  { %v3108_v46 = vpop.f32.mrf.mxu0  ;;  %v3179_v22 = vpop.f32.mrf.mxu1 }
 0x9d7   :  { %v3184_v14 = vadd.f32 %v3108_v46, %v2537_v13  ;;  %v3186_v27 = vadd.f32 %v3179_v22, %v2650_v20  ;;  %v8605_v22 = vld [vmem:[%s9477_s2 + $0x3d8] sm:$0xff]  ;;  %v8648_v20 = vld [vmem:[%s9477_s2 + $0x388] sm:$0xff] }
 0x9d8   :  { %v3110_v41 = vpop.f32.mrf.mxu0  ;;  %v3181_v3 = vpop.f32.mrf.mxu1 }
 0x9d9   :  { %v5081_v18 = vmul.f32 -1.442695, %v3184_v14  ;;  %v3185_v45 = vadd.f32 %v3110_v41, %v2539_v25  ;;  %v3187_v37 = vadd.f32 %v3181_v3, %v2652_v56  ;;  %v8581_v14 = vld [vmem:[%s9477_s2 + $0x3f8] sm:$0xff]  ;;  %v8588_v41 = vld [vmem:[%s9477_s2 + $0x3e0] sm:$0xff]  ;;  %v8617_v3 = vld [vmem:[%s9477_s2 + $0x3d0] sm:$0xff] }
 0x9da   :  { %9839 = vst [vmem:[#allocation24_spill] sm:$0xff] %v8581_v14  ;;  %3599 = vmatprep.subr.mxu1 %v8581_v14  ;;  %v8629_v56 = vld [vmem:[%s9477_s2 + $0x3b8] sm:$0xff] }
 0x9db   :  { %5704 = vpow2.f32 %v5081_v18  ;;  %v5082_v49 = vmul.f32 -1.442695, %v3185_v45  ;;  %v5083_v52 = vmul.f32 -1.442695, %v3187_v37  ;;  %v8593_v18 = vld [vmem:[%s9477_s2 + $0x3f0] sm:$0xff]  ;;  %v8600_v45 = vld [vmem:[%s9477_s2 + $0x3c8] sm:$0xff] }
 0x9dc   :  { %v8636_v37 = vld [vmem:[%s9477_s2 + $0x3a0] sm:$0xff] }
 0x9dd   :  { %5706 = vpow2.f32 %v5082_v49  ;;  %v8612_v49 = vld [vmem:[%s9477_s2 + $0x3c0] sm:$0xff] }
 0x9de   :  { %5708 = vtanh.f32 %v3186_v27  ;;  %v8653_v27 = vld [vmem:[%s9477_s2 + $0x398] sm:$0xff] }
 0x9df   :  { %5710 = vpow2.f32 %v5083_v52  ;;  %v8660_v52 = vld [vmem:[%s9477_s2 + $0x380] sm:$0xff] }
 0x9e8   :  { %v5705_v36 = vpop.eup %5704 }
 0x9e9   :  { %v3191_v63 = vadd.f32 1.0, %v5705_v36  ;;  %v8665_v36 = vld [vmem:[%s9477_s2 + $0x390] sm:$0xff] }
 0x9ea   :  { %v5707_v17 = vpop.eup %5706 }
 0x9eb   :  { %5712 = vrcp.f32 %v3191_v63  ;;  %v3197_v8 = vadd.f32 1.0, %v5707_v17  ;;  %v5709_v44 = vpop.eup %5708  ;;  %v8672_v63 = vld [vmem:[%s9477_s2 + $0x368] sm:$0xff]  ;;  %v8677_v17 = vld [vmem:[%s9477_s2 + $0x378] sm:$0xff] }
 0x9ec   :  { %v5711_v16 = vpop.eup %5710 }
 0x9ed   :  { %5714 = vrcp.f32 %v3197_v8  ;;  %v3204_v4 = vadd.f32 1.0, %v5711_v16  ;;  %v8684_v8 = vld [vmem:[%s9477_s2 + $0x360] sm:$0xff]  ;;  %v8696_v16 = vld [vmem:[%s9477_s2 + $0x348] sm:$0xff] }
 0x9ef   :  { %5716 = vrcp.f32 %v3204_v4  ;;  %v8720_v4 = vld [vmem:[%s9477_s2 + $0x328] sm:$0xff] }
 0x9f0   :  { %9840 = vst [vmem:[#allocation45_spill] sm:$0xff] %v8720_v4 }
 0x9f8   :  { %v5713_v24 = vpop.eup %5712 }
 0x9f9   :  { %v3208_v39 = vmul.f32 %v5713_v24, %v5709_v44  ;;  %v8689_v44 = vld [vmem:[%s9477_s2 + $0x370] sm:$0xff]  ;;  %v8701_v24 = vld [vmem:[%s9477_s2 + $0x358] sm:$0xff] }
 0x9fa   :  { %v5715_v26 = vpop.eup %5714 }
 0x9fb   :  { %v3207_v6 = vmul.f32 %v5715_v26, %v8484_v48  ;;  %v8576_v48 = vld [vmem:[%s9477_s2 + $0x3e8] sm:$0xff]  ;;  %v8713_v26 = vld [vmem:[%s9477_s2 + $0x350] sm:$0xff] }
 0x9fc   :  { %v5717_v46 = vpop.eup %5716  ;;  %9838 = vst [vmem:[#allocation25_spill] sm:$0xff] %v8576_v48  ;;  %3528 = vmatprep.subr.mxu0 %v8576_v48 }
 0x9fd   :  { %v8564_v13 = vadd.f32 %v3208_v39, %v3207_v6  ;;  %v8708_v39 = vld [vmem:[%s9477_s2 + $0x340] sm:$0xff]  ;;  %v8725_v6 = vld [vmem:[%s9477_s2 + $0x338] sm:$0xff] }
 0x9fe   :  { %9841 = vst [vmem:[#allocation35_spill] sm:$0xff] %v8725_v6 }
 0x9ff   :  { %5718 = vtanh.f32 %v8564_v13 }
 0xa0c   :  { %v5719_v12 = vpop.eup %5718 }
 0xa0d   :  { %v8567_v25 = vmul.f32 %v5719_v12, %v5717_v46  ;;  %v8732_v46 = vld [vmem:[%s9477_s2 + $0x320] sm:$0xff]  ;;  %v8737_v12 = vld [vmem:[%s9477_s2 + $0x330] sm:$0xff] }
 0xa0e   :  { %9842 = vst [vmem:[#allocation46_spill] sm:$0xff] %v8732_v46  ;;  %9843 = vst [vmem:[#allocation36_spill] sm:$0xff] %v8737_v12 }
 0xa0f   :  { %9837 = vst [vmem:[#allocation14_spill] sm:$0xff] %v8567_v25  ;;  %3350 = vmatmul.mubr.f32.vlgmr.msra.gmra.mxu0 %v8567_v25  ;;  %3421 = vmatmul.mubr.f32.vlgmr.msra.gmra.mxu1 %v8567_v25  ;;  %v8742_v25 = vld [vmem:[%s9477_s2 + $0x308] sm:$0xff] }
 0xa10   :  { %3592 = vmatprep.mubr.f32.mxu0 %v9831_v15  ;;  %3663 = vmatprep.mubr.f32.mxu1 %v9831_v15  ;;  %v8754_v15 = vld [vmem:[%s9477_s2 + $0x300] sm:$0xff] }
 0xa11   :  { %3529 = vmatpush1.msra.mxu0 %v8588_v41  ;;  %3600 = vmatpush1.msra.mxu1 %v8593_v18 }
 0xa12   :  { %3530 = vmatprep.subr.mxu0 %v8600_v45  ;;  %3601 = vmatprep.subr.mxu1 %v8605_v22 }
 0xa13   :  { %3531 = vmatpush1.msra.mxu0 %v8612_v49  ;;  %3602 = vmatpush1.msra.mxu1 %v8617_v3 }
 0xa14   :  { %3532 = vmatprep.subr.mxu0 %v8624_v53  ;;  %3603 = vmatprep.subr.mxu1 %v8629_v56 }
 0xa15   :  { %3533 = vmatpush1.msra.mxu0 %v8636_v37  ;;  %3604 = vmatpush1.msra.mxu1 %v8641_v43 }
 0xa16   :  { %3534 = vmatprep.subr.mxu0 %v8648_v20  ;;  %3605 = vmatprep.subr.mxu1 %v8653_v27 }
 0xa17   :  { %3535 = vmatpush1.msra.mxu0 %v8660_v52  ;;  %3606 = vmatpush1.msra.mxu1 %v8665_v36 }
 0xa18   :  { %3536 = vmatprep.subr.mxu0 %v8672_v63  ;;  %3607 = vmatprep.subr.mxu1 %v8677_v17 }
 0xa19   :  { %3537 = vmatpush1.msra.mxu0 %v8684_v8  ;;  %3608 = vmatpush1.msra.mxu1 %v8689_v44 }
 0xa1a   :  { %3538 = vmatprep.subr.mxu0 %v8696_v16  ;;  %3609 = vmatprep.subr.mxu1 %v8701_v24 }
 0xa1b   :  { %3539 = vmatpush1.msra.mxu0 %v8708_v39  ;;  %3610 = vmatpush1.msra.mxu1 %v8713_v26 }
 0xa1c   :  { %3540 = vmatprep.subr.mxu0 %v8720_v4  ;;  %3611 = vmatprep.subr.mxu1 %v8725_v6  ;;  %v8759_v6 = vld [vmem:[%s9477_s2 + $0x310] sm:$0xff]  ;;  %v8776_v4 = vld [vmem:[%s9477_s2 + $0x2e0] sm:$0xff] }
 0xa1d   :  { %3541 = vmatpush1.msra.mxu0 %v8732_v46  ;;  %3612 = vmatpush1.msra.mxu1 %v8737_v12  ;;  %v8766_v12 = vld [vmem:[%s9477_s2 + $0x2e8] sm:$0xff]  ;;  %v8771_v46 = vld [vmem:[%s9477_s2 + $0x2f8] sm:$0xff] }
 0xa1e   :  { %3542 = vmatprep.subr.mxu0 %v8742_v25  ;;  %3613 = vmatprep.subr.mxu1 %v8749_v51  ;;  %v8783_v51 = vld [vmem:[%s9477_s2 + $0x2f0] sm:$0xff] }
 0xa1f   :  { %3543 = vmatpush1.msra.mxu0 %v8754_v15  ;;  %3614 = vmatpush1.msra.mxu1 %v8759_v6 }
 0xa20   :  { %3544 = vmatprep.subr.mxu0 %v8766_v12  ;;  %3615 = vmatprep.subr.mxu1 %v8771_v46 }
 0xa21   :  { %3545 = vmatpush1.msra.mxu0 %v8776_v4  ;;  %3616 = vmatpush1.msra.mxu1 %v8783_v51 }
 0xa22   :  { %3546 = vmatprep.subr.mxu0 %v8159_v28  ;;  %3617 = vmatprep.subr.mxu1 %v8164_v30  ;;  %v9845_v28 = vld [vmem:[#allocation26_spill] sm:$0xff] }
 0xa23   :  { %3547 = vmatpush1.msra.mxu0 %v8171_v32  ;;  %3618 = vmatpush1.msra.mxu1 %v8176_v34  ;;  %v2543_v30 = vadd.f32 %v9845_v28, %v8453_v5  ;;  %v9846_v34 = vld [vmem:[#allocation18_spill] sm:$0xff] }
 0xa24   :  { %3548 = vmatprep.subr.mxu0 %v8183_v21  ;;  %3619 = vmatprep.subr.mxu1 %v8188_v60  ;;  %v2545_v21 = vadd.f32 %v9846_v34, %v8461_v55 }
 0xa25   :  { %3549 = vmatpush1.msra.mxu0 %v8195_v50  ;;  %3620 = vmatpush1.msra.mxu1 %v8200_v19 }
 0xa26   :  { %3550 = vmatprep.subr.mxu0 %v9812_v38  ;;  %3621 = vmatprep.subr.mxu1 %v9813_v59 }
 0xa27   :  { %3551 = vmatpush1.msra.mxu0 %v9814_v54  ;;  %3622 = vmatpush1.msra.mxu1 %v9815_v7 }
 0xa28   :  { %3552 = vmatprep.subr.mxu0 %v9816_v11  ;;  %3623 = vmatprep.subr.mxu1 %v9817_v57  ;;  %v9847_v11 = vld [vmem:[#allocation29_spill] sm:$0xff] }
 0xa29   :  { %3553 = vmatpush1.msra.mxu0 %v9818_v9  ;;  %3624 = vmatpush1.msra.mxu1 %v9819_v58  ;;  %v2658_v57 = vadd.f32 %v9847_v11, %v8473_v61  ;;  %v9848_v58 = vld [vmem:[#allocation17_spill] sm:$0xff]  ;;  %v8879_v11 = vld [vmem:[%s9477_s2 + $0x2d8] sm:$0xff] }
 0xa2a   :  { %3554 = vmatprep.subr.mxu0 %v9820_v40  ;;  %3625 = vmatprep.subr.mxu1 %v9821_v42  ;;  %v2656_v40 = vadd.f32 %v9848_v58, %v8478_v10  ;;  %v8896_v58 = vld [vmem:[%s9477_s2 + $0x2a8] sm:$0xff] }
 0xa2b   :  { %3555 = vmatpush1.msra.mxu0 %v9822_v47  ;;  %3626 = vmatpush1.msra.mxu1 %v9823_v62 }
 0xa2c   :  { %3556 = vmatprep.subr.mxu0 %v9824_v1  ;;  %3627 = vmatprep.subr.mxu1 %v9825_v29 }
 0xa2d   :  { %3557 = vmatpush1.msra.mxu0 %v9826_v31  ;;  %3628 = vmatpush1.msra.mxu1 %v9827_v0 }
 0xa2e   :  { %3558 = vmatprep.subr.mxu0 %v9828_v2  ;;  %3629 = vmatprep.subr.mxu1 %v9829_v33 }
 0xa2f   :  { %3559 = vmatpush1.msra.mxu0 %v9830_v35  ;;  %3630 = vmatpush1.msra.mxu1 %v9832_v23 }
 0xa30   :  { %3771 = vmatprep.subr.mxu0 %v8576_v48  ;;  %3842 = vmatprep.subr.mxu1 %v8581_v14 }
 0xacf   :  { %v3351_v32 = vpop.f32.mrf.mxu0  ;;  %v3422_v59 = vpop.f32.mrf.mxu1 }
 0xad0   :  { %v3427_v60 = vadd.f32 %v3351_v32, %v2543_v30  ;;  %v3429_v42 = vadd.f32 %v3422_v59, %v2656_v40  ;;  %v9854_v59 = vld [vmem:[#allocation47_spill] sm:$0xff] }
 0xad1   :  { %v3353_v50 = vpop.f32.mrf.mxu0  ;;  %v3424_v7 = vpop.f32.mrf.mxu1  ;;  %v8901_v40 = vld [vmem:[%s9477_s2 + $0x2b8] sm:$0xff] }
 0xad2   :  { %v5148_v19 = vmul.f32 -1.442695, %v3427_v60  ;;  %v3428_v38 = vadd.f32 %v3353_v50, %v2545_v21  ;;  %v3430_v9 = vadd.f32 %v3424_v7, %v2658_v57  ;;  %v9851_v50 = vld [vmem:[#allocation35_spill] sm:$0xff]  ;;  %v8874_v7 = vld [vmem:[%s9477_s2 + $0x2c8] sm:$0xff]  ;;  %v8884_v57 = vld [vmem:[%s9477_s2 + $0x2c0] sm:$0xff] }
 0xad4   :  { %5720 = vpow2.f32 %v5148_v19  ;;  %v5149_v54 = vmul.f32 -1.442695, %v3428_v38  ;;  %v5150_v47 = vmul.f32 -1.442695, %v3430_v9  ;;  %v9852_v19 = vld [vmem:[#allocation46_spill] sm:$0xff]  ;;  %v9853_v38 = vld [vmem:[#allocation36_spill] sm:$0xff] }
 0xad5   :  { %v8891_v9 = vld [vmem:[%s9477_s2 + $0x2d0] sm:$0xff] }
 0xad6   :  { %5722 = vpow2.f32 %v5149_v54  ;;  %v9855_v54 = vmov 0.0  }
 0xad7   :  { %5724 = vtanh.f32 %v3429_v42  ;;  %v8908_v42 = vld [vmem:[%s9477_s2 + $0x2a0] sm:$0xff] }
 0xad8   :  { %5726 = vpow2.f32 %v5150_v47  ;;  %v8913_v47 = vld [vmem:[%s9477_s2 + $0x2b0] sm:$0xff] }
 0xad9   :  { %9856 = vst [vmem:[#allocation48_spill] sm:$0xff] %v8913_v47 }
 0xae1   :  { %v5721_v62 = vpop.eup %5720 }
 0xae2   :  { %v3434_v1 = vadd.f32 1.0, %v5721_v62  ;;  %v8918_v62 = vld [vmem:[%s9477_s2 + $0x288] sm:$0xff] }
 0xae3   :  { %v5723_v29 = vpop.eup %5722  ;;  %9857 = vst [vmem:[#allocation38_spill] sm:$0xff] %v8918_v62 }
 0xae4   :  { %5728 = vrcp.f32 %v3434_v1  ;;  %v3440_v31 = vadd.f32 1.0, %v5723_v29  ;;  %v5725_v0 = vpop.eup %5724  ;;  %v8925_v1 = vld [vmem:[%s9477_s2 + $0x298] sm:$0xff]  ;;  %v8930_v29 = vld [vmem:[%s9477_s2 + $0x280] sm:$0xff] }
 0xae5   :  { %v5727_v2 = vpop.eup %5726  ;;  %9858 = vst [vmem:[#allocation49_spill] sm:$0xff] %v8925_v1  ;;  %9859 = vst [vmem:[#allocation39_spill] sm:$0xff] %v8930_v29 }
 0xae6   :  { %5730 = vrcp.f32 %v3440_v31  ;;  %v3447_v28 = vadd.f32 1.0, %v5727_v2  ;;  %v8935_v31 = vld [vmem:[%s9477_s2 + $0x290] sm:$0xff]  ;;  %v8947_v2 = vld [vmem:[%s9477_s2 + $0x278] sm:$0xff] }
 0xae7   :  { %9860 = vst [vmem:[#allocation50_spill] sm:$0xff] %v8935_v31  ;;  %9862 = vst [vmem:[#allocation51_spill] sm:$0xff] %v8947_v2 }
 0xae8   :  { %5732 = vrcp.f32 %v3447_v28  ;;  %v8971_v28 = vld [vmem:[%s9477_s2 + $0x258] sm:$0xff] }
 0xae9   :  { %9866 = vst [vmem:[#allocation53_spill] sm:$0xff] %v8971_v28 }
 0xaf1   :  { %v5729_v33 = vpop.eup %5728 }
 0xaf2   :  { %v3451_v35 = vmul.f32 %v5729_v33, %v5725_v0  ;;  %v8942_v0 = vld [vmem:[%s9477_s2 + $0x268] sm:$0xff]  ;;  %v8954_v33 = vld [vmem:[%s9477_s2 + $0x260] sm:$0xff] }
 0xaf3   :  { %v5731_v23 = vpop.eup %5730  ;;  %9861 = vst [vmem:[#allocation40_spill] sm:$0xff] %v8942_v0  ;;  %9863 = vst [vmem:[#allocation41_spill] sm:$0xff] %v8954_v33 }
 0xaf4   :  { %v3450_v30 = vmul.f32 %v5731_v23, %v8564_v13  ;;  %v9850_v13 = vld [vmem:[#allocation45_spill] sm:$0xff] }
 0xaf5   :  { %v5733_v34 = vpop.eup %5732  ;;  %v8966_v23 = vld [vmem:[%s9477_s2 + $0x248] sm:$0xff] }
 0xaf6   :  { %v8828_v32 = vadd.f32 %v3451_v35, %v3450_v30  ;;  %v8959_v35 = vld [vmem:[%s9477_s2 + $0x270] sm:$0xff]  ;;  %9865 = vst [vmem:[#allocation42_spill] sm:$0xff] %v8966_v23  ;;  %v8978_v30 = vld [vmem:[%s9477_s2 + $0x240] sm:$0xff] }
 0xaf7   :  { %9864 = vst [vmem:[#allocation52_spill] sm:$0xff] %v8959_v35  ;;  %9867 = vst [vmem:[#allocation54_spill] sm:$0xff] %v8978_v30 }
 0xaf8   :  { %5734 = vtanh.f32 %v8828_v32 }
 0xb05   :  { %v5735_v21 = vpop.eup %5734 }
 0xb06   :  { %v8831_v60 = vmul.f32 %v5735_v21, %v5733_v34  ;;  %v8983_v34 = vld [vmem:[%s9477_s2 + $0x250] sm:$0xff]  ;;  %v8990_v21 = vld [vmem:[%s9477_s2 + $0x228] sm:$0xff] }
 0xb07   :  { %9868 = vst [vmem:[#allocation16_spill] sm:$0xff] %v8983_v34  ;;  %9869 = vst [vmem:[#allocation27_spill] sm:$0xff] %v8990_v21 }
 0xb08   :  { %9849 = vst [vmem:[#allocation37_spill] sm:$0xff] %v8831_v60  ;;  %3593 = vmatmul.mubr.f32.vlgmr.msra.gmra.mxu0 %v8831_v60  ;;  %3664 = vmatmul.mubr.f32.vlgmr.msra.gmra.mxu1 %v8831_v60  ;;  %v8995_v60 = vld [vmem:[%s9477_s2 + $0x238] sm:$0xff] }
 0xb09   :  { %3772 = vmatpush1.msra.mxu0 %v8588_v41  ;;  %3843 = vmatpush1.msra.mxu1 %v8593_v18  ;;  %9870 = vst [vmem:[#allocation15_spill] sm:$0xff] %v8995_v60 }
 0xb0a   :  { %3773 = vmatprep.subr.mxu0 %v8600_v45  ;;  %3844 = vmatprep.subr.mxu1 %v8605_v22 }
 0xb0b   :  { %3774 = vmatpush1.msra.mxu0 %v8612_v49  ;;  %3845 = vmatpush1.msra.mxu1 %v8617_v3 }
 0xb0c   :  { %3775 = vmatprep.subr.mxu0 %v8624_v53  ;;  %3846 = vmatprep.subr.mxu1 %v8629_v56 }
 0xb0d   :  { %3776 = vmatpush1.msra.mxu0 %v8636_v37  ;;  %3847 = vmatpush1.msra.mxu1 %v8641_v43 }
 0xb0e   :  { %3777 = vmatprep.subr.mxu0 %v8648_v20  ;;  %3848 = vmatprep.subr.mxu1 %v8653_v27 }
 0xb0f   :  { %3778 = vmatpush1.msra.mxu0 %v8660_v52  ;;  %3849 = vmatpush1.msra.mxu1 %v8665_v36 }
 0xb10   :  { %3779 = vmatprep.subr.mxu0 %v8672_v63  ;;  %3850 = vmatprep.subr.mxu1 %v8677_v17 }
 0xb11   :  { %3780 = vmatpush1.msra.mxu0 %v8684_v8  ;;  %3851 = vmatpush1.msra.mxu1 %v8689_v44 }
 0xb12   :  { %3781 = vmatprep.subr.mxu0 %v8696_v16  ;;  %3852 = vmatprep.subr.mxu1 %v8701_v24 }
 0xb13   :  { %3782 = vmatpush1.msra.mxu0 %v8708_v39  ;;  %3853 = vmatpush1.msra.mxu1 %v8713_v26 }
 0xb14   :  { %3783 = vmatprep.subr.mxu0 %v9850_v13  ;;  %3854 = vmatprep.subr.mxu1 %v9851_v50 }
 0xb15   :  { %3784 = vmatpush1.msra.mxu0 %v9852_v19  ;;  %3855 = vmatpush1.msra.mxu1 %v9853_v38 }
 0xb16   :  { %3785 = vmatprep.subr.mxu0 %v8742_v25  ;;  %3856 = vmatprep.subr.mxu1 %v9854_v59 }
 0xb17   :  { %3786 = vmatpush1.msra.mxu0 %v8754_v15  ;;  %3857 = vmatpush1.msra.mxu1 %v8759_v6 }
 0xb18   :  { %3787 = vmatprep.subr.mxu0 %v8766_v12  ;;  %3858 = vmatprep.subr.mxu1 %v8771_v46 }
 0xb19   :  { %3788 = vmatpush1.msra.mxu0 %v8776_v4  ;;  %3859 = vmatpush1.msra.mxu1 %v8783_v51 }
 0xb1a   :  { %3835 = vmatprep.mubr.f32.mxu0 %v9855_v54  ;;  %3906 = vmatprep.mubr.f32.mxu1 %v9855_v54  ;;  %v9002_v54 = vld [vmem:[%s9477_s2 + $0x220] sm:$0xff] }
 0xb1b   :  { %3789 = vmatprep.subr.mxu0 %v8874_v7  ;;  %3860 = vmatprep.subr.mxu1 %v8879_v11  ;;  %9871 = vst [vmem:[#allocation26_spill] sm:$0xff] %v9002_v54 }
 0xb1c   :  { %3790 = vmatpush1.msra.mxu0 %v8884_v57  ;;  %3861 = vmatpush1.msra.mxu1 %v8891_v9 }
 0xb1d   :  { %3791 = vmatprep.subr.mxu0 %v8896_v58  ;;  %3862 = vmatprep.subr.mxu1 %v8901_v40 }
 0xb1e   :  { %3792 = vmatpush1.msra.mxu0 %v8908_v42  ;;  %3863 = vmatpush1.msra.mxu1 %v8913_v47 }
 0xb1f   :  { %3793 = vmatprep.subr.mxu0 %v8918_v62  ;;  %3864 = vmatprep.subr.mxu1 %v8925_v1  ;;  %v9880_v1 = vld [vmem:[#allocation19_spill] sm:$0xff] }
 0xb20   :  { %3794 = vmatpush1.msra.mxu0 %v8930_v29  ;;  %3865 = vmatpush1.msra.mxu1 %v8935_v31 }
 0xb21   :  { %3795 = vmatprep.subr.mxu0 %v8942_v0  ;;  %3866 = vmatprep.subr.mxu1 %v8947_v2 }
 0xb22   :  { %3796 = vmatpush1.msra.mxu0 %v8954_v33  ;;  %3867 = vmatpush1.msra.mxu1 %v8959_v35  ;;  %v9007_v35 = vld [vmem:[%s9477_s2 + $0x230] sm:$0xff] }
 0xb23   :  { %3797 = vmatprep.subr.mxu0 %v8966_v23  ;;  %3868 = vmatprep.subr.mxu1 %v8971_v28  ;;  %9872 = vst [vmem:[#allocation18_spill] sm:$0xff] %v9007_v35  ;;  %v9014_v23 = vld [vmem:[%s9477_s2 + $0x208] sm:$0xff]  ;;  %v9019_v28 = vld [vmem:[%s9477_s2 + $0x218] sm:$0xff] }
 0xb24   :  { %3798 = vmatpush1.msra.mxu0 %v8978_v30  ;;  %3869 = vmatpush1.msra.mxu1 %v8983_v34  ;;  %9873 = vst [vmem:[#allocation29_spill] sm:$0xff] %v9014_v23  ;;  %9874 = vst [vmem:[#allocation17_spill] sm:$0xff] %v9019_v28  ;;  %v9026_v30 = vld [vmem:[%s9477_s2 + $0x200] sm:$0xff]  ;;  %v9031_v34 = vld [vmem:[%s9477_s2 + $0x210] sm:$0xff] }
 0xb25   :  { %3799 = vmatprep.subr.mxu0 %v8990_v21  ;;  %3870 = vmatprep.subr.mxu1 %v8995_v60  ;;  %9875 = vst [vmem:[#allocation45_spill] sm:$0xff] %v9026_v30  ;;  %9876 = vst [vmem:[#allocation35_spill] sm:$0xff] %v9031_v34  ;;  %v9877_v60 = vld [vmem:[#allocation28_spill] sm:$0xff] }
 0xb26   :  { %3800 = vmatpush1.msra.mxu0 %v9002_v54  ;;  %3871 = vmatpush1.msra.mxu1 %v9007_v35  ;;  %v2549_v21 = vadd.f32 %v9877_v60, %v8453_v5  ;;  %v9878_v54 = vld [vmem:[#allocation20_spill] sm:$0xff]  ;;  %v2662_v60 = vadd.f32 %v9880_v1, %v8478_v10  ;;  %v9884_v1 = vld [vmem:[#allocation49_spill] sm:$0xff] }
 0xb27   :  { %3801 = vmatprep.subr.mxu0 %v9014_v23  ;;  %3872 = vmatprep.subr.mxu1 %v9019_v28  ;;  %v2551_v2 = vadd.f32 %v9878_v54, %v8461_v55 }
 0xb28   :  { %3802 = vmatpush1.msra.mxu0 %v9026_v30  ;;  %3873 = vmatpush1.msra.mxu1 %v9031_v34 }
 0xb29   :  { %4014 = vmatprep.subr.mxu0 %v8576_v48  ;;  %4085 = vmatprep.subr.mxu1 %v8581_v14  ;;  %v9879_v48 = vld [vmem:[#allocation31_spill] sm:$0xff] }
 0xb2a   :  { %v2664_v29 = vadd.f32 %v9879_v48, %v8473_v61 }
 0xbc8   :  { %v3594_v33 = vpop.f32.mrf.mxu0  ;;  %v3665_v28 = vpop.f32.mrf.mxu1 }
 0xbc9   :  { %v3670_v35 = vadd.f32 %v3594_v33, %v2549_v21  ;;  %v3672_v5 = vadd.f32 %v3665_v28, %v2662_v60  ;;  %v9885_v28 = vld [vmem:[#allocation39_spill] sm:$0xff]  ;;  %v9886_v21 = vld [vmem:[#allocation50_spill] sm:$0xff]  ;;  %v9887_v60 = vld [vmem:[#allocation40_spill] sm:$0xff] }
 0xbca   :  { %v3596_v0 = vpop.f32.mrf.mxu0  ;;  %v3667_v34 = vpop.f32.mrf.mxu1 }
 0xbcb   :  { %v5215_v23 = vmul.f32 -1.442695, %v3670_v35  ;;  %v3671_v31 = vadd.f32 %v3596_v0, %v2551_v2  ;;  %v3673_v14 = vadd.f32 %v3667_v34, %v2664_v29 }
 0xbcd   :  { %5736 = vpow2.f32 %v5215_v23  ;;  %v5216_v30 = vmul.f32 -1.442695, %v3671_v31  ;;  %v5217_v62 = vmul.f32 -1.442695, %v3673_v14 }
 0xbcf   :  { %5738 = vpow2.f32 %v5216_v30 }
 0xbd0   :  { %5740 = vtanh.f32 %v3672_v5 }
 0xbd1   :  { %5742 = vpow2.f32 %v5217_v62  ;;  %v9883_v62 = vld [vmem:[#allocation38_spill] sm:$0xff] }
 0xbda   :  { %v5737_v47 = vpop.eup %5736 }
 0xbdb   :  { %v3677_v54 = vadd.f32 1.0, %v5737_v47 }
 0xbdc   :  { %v5739_v33 = vpop.eup %5738 }
 0xbdd   :  { %5744 = vrcp.f32 %v3677_v54  ;;  %v3683_v0 = vadd.f32 1.0, %v5739_v33  ;;  %v5741_v31 = vpop.eup %5740  ;;  %v9888_v54 = vld [vmem:[#allocation51_spill] sm:$0xff]  ;;  %v9889_v33 = vld [vmem:[#allocation41_spill] sm:$0xff] }
 0xbde   :  { %v5743_v2 = vpop.eup %5742 }
 0xbdf   :  { %5746 = vrcp.f32 %v3683_v0  ;;  %v3690_v48 = vadd.f32 1.0, %v5743_v2  ;;  %v9890_v0 = vld [vmem:[#allocation52_spill] sm:$0xff]  ;;  %v9892_v2 = vld [vmem:[#allocation53_spill] sm:$0xff] }
 0xbe1   :  { %5748 = vrcp.f32 %v3690_v48  ;;  %v9896_v48 = vld [vmem:[#allocation15_spill] sm:$0xff] }
 0xbea   :  { %v5745_v35 = vpop.eup %5744 }
 0xbeb   :  { %v3694_v23 = vmul.f32 %v5745_v35, %v5741_v31  ;;  %v9891_v31 = vld [vmem:[#allocation42_spill] sm:$0xff] }
 0xbec   :  { %v5747_v30 = vpop.eup %5746  ;;  %v9893_v35 = vld [vmem:[#allocation54_spill] sm:$0xff] }
 0xbed   :  { %v3693_v29 = vmul.f32 %v5747_v30, %v8828_v32  ;;  %v9882_v32 = vld [vmem:[#allocation48_spill] sm:$0xff]  ;;  %v9895_v30 = vld [vmem:[#allocation27_spill] sm:$0xff] }
 0xbee   :  { %v5749_v14 = vpop.eup %5748 }
 0xbef   :  { %v9050_v34 = vadd.f32 %v3694_v23, %v3693_v29  ;;  %v9894_v23 = vld [vmem:[#allocation16_spill] sm:$0xff]  ;;  %v9897_v29 = vld [vmem:[#allocation26_spill] sm:$0xff] }
 0xbf1   :  { %5750 = vtanh.f32 %v9050_v34 }
 0xbfe   :  { %v5751_v5 = vpop.eup %5750 }
 0xbff   :  { %v9053_v47 = vmul.f32 %v5751_v5, %v5749_v14  ;;  %v9898_v14 = vld [vmem:[#allocation18_spill] sm:$0xff]  ;;  %v9899_v5 = vld [vmem:[#allocation29_spill] sm:$0xff] }
 0xc01   :  { %9881 = vst [vmem:[#allocation46_spill] sm:$0xff] %v9053_v47  ;;  %3836 = vmatmul.mubr.f32.vlgmr.msra.gmra.mxu0 %v9053_v47  ;;  %3907 = vmatmul.mubr.f32.vlgmr.msra.gmra.mxu1 %v9053_v47  ;;  %v9900_v47 = vld [vmem:[#allocation17_spill] sm:$0xff] }
 0xc02   :  { %4015 = vmatpush1.msra.mxu0 %v8588_v41  ;;  %4086 = vmatpush1.msra.mxu1 %v8593_v18 }
 0xc03   :  { %4016 = vmatprep.subr.mxu0 %v8600_v45  ;;  %4087 = vmatprep.subr.mxu1 %v8605_v22 }
 0xc04   :  { %4017 = vmatpush1.msra.mxu0 %v8612_v49  ;;  %4088 = vmatpush1.msra.mxu1 %v8617_v3 }
 0xc05   :  { %4018 = vmatprep.subr.mxu0 %v8624_v53  ;;  %4089 = vmatprep.subr.mxu1 %v8629_v56 }
 0xc06   :  { %4019 = vmatpush1.msra.mxu0 %v8636_v37  ;;  %4090 = vmatpush1.msra.mxu1 %v8641_v43 }
 0xc07   :  { %4020 = vmatprep.subr.mxu0 %v8648_v20  ;;  %4091 = vmatprep.subr.mxu1 %v8653_v27 }
 0xc08   :  { %4021 = vmatpush1.msra.mxu0 %v8660_v52  ;;  %4092 = vmatpush1.msra.mxu1 %v8665_v36 }
 0xc09   :  { %4022 = vmatprep.subr.mxu0 %v8672_v63  ;;  %4093 = vmatprep.subr.mxu1 %v8677_v17 }
 0xc0a   :  { %4023 = vmatpush1.msra.mxu0 %v8684_v8  ;;  %4094 = vmatpush1.msra.mxu1 %v8689_v44 }
 0xc0b   :  { %4024 = vmatprep.subr.mxu0 %v8696_v16  ;;  %4095 = vmatprep.subr.mxu1 %v8701_v24 }
 0xc0c   :  { %4025 = vmatpush1.msra.mxu0 %v8708_v39  ;;  %4096 = vmatpush1.msra.mxu1 %v8713_v26 }
 0xc0d   :  { %4026 = vmatprep.subr.mxu0 %v9850_v13  ;;  %4097 = vmatprep.subr.mxu1 %v9851_v50 }
 0xc0e   :  { %4027 = vmatpush1.msra.mxu0 %v9852_v19  ;;  %4098 = vmatpush1.msra.mxu1 %v9853_v38 }
 0xc0f   :  { %4028 = vmatprep.subr.mxu0 %v8742_v25  ;;  %4099 = vmatprep.subr.mxu1 %v9854_v59 }
 0xc10   :  { %4029 = vmatpush1.msra.mxu0 %v8754_v15  ;;  %4100 = vmatpush1.msra.mxu1 %v8759_v6 }
 0xc11   :  { %4030 = vmatprep.subr.mxu0 %v8766_v12  ;;  %4101 = vmatprep.subr.mxu1 %v8771_v46 }
 0xc12   :  { %4031 = vmatpush1.msra.mxu0 %v8776_v4  ;;  %4102 = vmatpush1.msra.mxu1 %v8783_v51 }
 0xc13   :  { %4032 = vmatprep.subr.mxu0 %v8874_v7  ;;  %4103 = vmatprep.subr.mxu1 %v8879_v11 }
 0xc14   :  { %4033 = vmatpush1.msra.mxu0 %v8884_v57  ;;  %4104 = vmatpush1.msra.mxu1 %v8891_v9 }
 0xc15   :  { %4034 = vmatprep.subr.mxu0 %v8896_v58  ;;  %4105 = vmatprep.subr.mxu1 %v8901_v40 }
 0xc16   :  { %4035 = vmatpush1.msra.mxu0 %v8908_v42  ;;  %4106 = vmatpush1.msra.mxu1 %v9882_v32 }
 0xc17   :  { %4036 = vmatprep.subr.mxu0 %v9883_v62  ;;  %4107 = vmatprep.subr.mxu1 %v9884_v1  ;;  %v9910_v1 = vld [vmem:[#allocation34_spill] sm:$0xff] }
 0xc18   :  { %4037 = vmatpush1.msra.mxu0 %v9885_v28  ;;  %4108 = vmatpush1.msra.mxu1 %v9886_v21 }
 0xc19   :  { %4038 = vmatprep.subr.mxu0 %v9887_v60  ;;  %4109 = vmatprep.subr.mxu1 %v9888_v54 }
 0xc1a   :  { %4039 = vmatpush1.msra.mxu0 %v9889_v33  ;;  %4110 = vmatpush1.msra.mxu1 %v9890_v0  ;;  %v9901_v0 = vld [vmem:[#allocation45_spill] sm:$0xff] }
 0xc1b   :  { %4040 = vmatprep.subr.mxu0 %v9891_v31  ;;  %4111 = vmatprep.subr.mxu1 %v9892_v2  ;;  %v9902_v31 = vmov 0.0   ;;  %v9903_v2 = vld [vmem:[#allocation35_spill] sm:$0xff] }
 0xc1c   :  { %4041 = vmatpush1.msra.mxu0 %v9893_v35  ;;  %4112 = vmatpush1.msra.mxu1 %v9894_v23  ;;  %v9904_v23 = vld [vmem:[#allocation25_spill] sm:$0xff] }
 0xc1d   :  { %4042 = vmatprep.subr.mxu0 %v9895_v30  ;;  %4113 = vmatprep.subr.mxu1 %v9896_v48  ;;  %v9905_v30 = vld [vmem:[#allocation24_spill] sm:$0xff] }
 0xc1e   :  { %4043 = vmatpush1.msra.mxu0 %v9897_v29  ;;  %4114 = vmatpush1.msra.mxu1 %v9898_v14  ;;  %v9906_v48 = vld [vmem:[#allocation12_spill] sm:$0xff]  ;;  %v9907_v29 = vld [vmem:[#allocation30_spill] sm:$0xff] }
 0xc1f   :  { %4044 = vmatprep.subr.mxu0 %v9899_v5  ;;  %4115 = vmatprep.subr.mxu1 %v9900_v47  ;;  %v2555_v35 = vadd.f32 %v9907_v29, %v9906_v48  ;;  %v9908_v5 = vld [vmem:[#allocation43_spill] sm:$0xff]  ;;  %v2668_v29 = vadd.f32 %v9910_v1, %v8478_v10 }
 0xc20   :  { %4045 = vmatpush1.msra.mxu0 %v9901_v0  ;;  %4078 = vmatprep.mubr.f32.mxu0 %v9902_v31  ;;  %v2557_v33 = vadd.f32 %v9908_v5, %v8461_v55 }
 0xc21   :  { %4116 = vmatpush1.msra.mxu1 %v9903_v2  ;;  %4149 = vmatprep.mubr.f32.mxu1 %v9902_v31 }
 0xc22   :  { %4257 = vmatprep.subr.mxu0 %v9904_v23  ;;  %4328 = vmatprep.subr.mxu1 %v9905_v30  ;;  %v9909_v23 = vld [vmem:[#allocation23_spill] sm:$0xff] }
 0xc23   :  { %v2670_v28 = vadd.f32 %v9909_v23, %v8473_v61 }
 0xcc1   :  { %v3837_v14 = vpop.f32.mrf.mxu0  ;;  %v3908_v21 = vpop.f32.mrf.mxu1 }
 0xcc2   :  { %v3913_v47 = vadd.f32 %v3837_v14, %v2555_v35  ;;  %v3915_v48 = vadd.f32 %v3908_v21, %v2668_v29 }
 0xcc3   :  { %v3839_v54 = vpop.f32.mrf.mxu0  ;;  %v3910_v31 = vpop.f32.mrf.mxu1 }
 0xcc4   :  { %v5282_v0 = vmul.f32 -1.442695, %v3913_v47  ;;  %v3914_v60 = vadd.f32 %v3839_v54, %v2557_v33  ;;  %v3916_v30 = vadd.f32 %v3910_v31, %v2670_v28 }
 0xcc6   :  { %5752 = vpow2.f32 %v5282_v0  ;;  %v5283_v2 = vmul.f32 -1.442695, %v3914_v60  ;;  %v5284_v62 = vmul.f32 -1.442695, %v3916_v30  ;;  %v9937_v30 = vld [vmem:[#allocation22_spill] sm:$0xff] }
 0xcc7   :  { %v2674_v29 = vadd.f32 %v9937_v30, %v8478_v10  ;;  %v5473_v30 = vld [vmem:[%s9477_s2 + $0x3b0] sm:$0xff] }
 0xcc8   :  { %5754 = vpow2.f32 %v5283_v2 }
 0xcc9   :  { %5756 = vtanh.f32 %v3915_v48 }
 0xcca   :  { %5758 = vpow2.f32 %v5284_v62  ;;  %v9936_v62 = vld [vmem:[#allocation32_spill] sm:$0xff] }
 0xccb   :  { %v2676_v48 = vadd.f32 %v9936_v62, %v8473_v61  ;;  %v5471_v62 = vld [vmem:[%s9477_s2 + $0x3a0] sm:$0xff] }
 0xcd3   :  { %v5753_v32 = vpop.eup %5752 }
 0xcd4   :  { %v3920_v5 = vadd.f32 1.0, %v5753_v32 }
 0xcd5   :  { %v5755_v35 = vpop.eup %5754 }
 0xcd6   :  { %5760 = vrcp.f32 %v3920_v5  ;;  %v3926_v47 = vadd.f32 1.0, %v5755_v35  ;;  %v5757_v60 = vpop.eup %5756 }
 0xcd7   :  { %v5759_v54 = vpop.eup %5758 }
 0xcd8   :  { %5762 = vrcp.f32 %v3926_v47  ;;  %v3933_v14 = vadd.f32 1.0, %v5759_v54 }
 0xcda   :  { %5764 = vrcp.f32 %v3933_v14 }
 0xce3   :  { %v5761_v33 = vpop.eup %5760 }
 0xce4   :  { %v3937_v0 = vmul.f32 %v5761_v33, %v5757_v60 }
 0xce5   :  { %v5763_v2 = vpop.eup %5762 }
 0xce6   :  { %v3936_v28 = vmul.f32 %v5763_v2, %v9050_v34 }
 0xce7   :  { %v5765_v32 = vpop.eup %5764 }
 0xce8   :  { %v9132_v31 = vadd.f32 %v3937_v0, %v3936_v28 }
 0xcea   :  { %5766 = vtanh.f32 %v9132_v31 }
 0xcf7   :  { %v5767_v1 = vpop.eup %5766 }
 0xcf8   :  { %v9135_v21 = vmul.f32 %v5767_v1, %v5765_v32 }
 0xcfa   :  { %4079 = vmatmul.mubr.f32.vlgmr.msra.gmra.mxu0 %v9135_v21  ;;  %4150 = vmatmul.mubr.f32.vlgmr.msra.gmra.mxu1 %v9135_v21 }
 0xcfb   :  { %4258 = vmatpush1.msra.mxu0 %v8588_v41  ;;  %4329 = vmatpush1.msra.mxu1 %v8593_v18  ;;  %v9913_v41 = vld [vmem:[#allocation49_spill] sm:$0xff]  ;;  %v9915_v18 = vld [vmem:[#allocation50_spill] sm:$0xff] }
 0xcfc   :  { %4259 = vmatprep.subr.mxu0 %v8600_v45  ;;  %4330 = vmatprep.subr.mxu1 %v8605_v22  ;;  %v9916_v45 = vld [vmem:[#allocation40_spill] sm:$0xff]  ;;  %v9917_v22 = vld [vmem:[#allocation51_spill] sm:$0xff] }
 0xcfd   :  { %4260 = vmatpush1.msra.mxu0 %v8612_v49  ;;  %4331 = vmatpush1.msra.mxu1 %v8617_v3  ;;  %v9918_v49 = vld [vmem:[#allocation41_spill] sm:$0xff]  ;;  %v9919_v3 = vld [vmem:[#allocation52_spill] sm:$0xff] }
 0xcfe   :  { %4261 = vmatprep.subr.mxu0 %v8624_v53  ;;  %4332 = vmatprep.subr.mxu1 %v8629_v56  ;;  %v9920_v53 = vld [vmem:[#allocation42_spill] sm:$0xff]  ;;  %v9921_v56 = vld [vmem:[#allocation53_spill] sm:$0xff] }
 0xcff   :  { %4262 = vmatpush1.msra.mxu0 %v8636_v37  ;;  %4333 = vmatpush1.msra.mxu1 %v8641_v43  ;;  %v9922_v37 = vld [vmem:[#allocation54_spill] sm:$0xff]  ;;  %v9923_v43 = vld [vmem:[#allocation16_spill] sm:$0xff] }
 0xd00   :  { %4263 = vmatprep.subr.mxu0 %v8648_v20  ;;  %4334 = vmatprep.subr.mxu1 %v8653_v27  ;;  %v9924_v20 = vld [vmem:[#allocation27_spill] sm:$0xff] }
 0xd01   :  { %4264 = vmatpush1.msra.mxu0 %v8660_v52  ;;  %4335 = vmatpush1.msra.mxu1 %v8665_v36  ;;  %v9925_v27 = vld [vmem:[#allocation15_spill] sm:$0xff]  ;;  %v9926_v52 = vld [vmem:[#allocation26_spill] sm:$0xff] }
 0xd02   :  { %4265 = vmatprep.subr.mxu0 %v8672_v63  ;;  %4336 = vmatprep.subr.mxu1 %v8677_v17  ;;  %v9927_v36 = vld [vmem:[#allocation18_spill] sm:$0xff]  ;;  %v9928_v63 = vld [vmem:[#allocation29_spill] sm:$0xff] }
 0xd03   :  { %4266 = vmatpush1.msra.mxu0 %v8684_v8  ;;  %4337 = vmatpush1.msra.mxu1 %v8689_v44  ;;  %v9929_v17 = vld [vmem:[#allocation17_spill] sm:$0xff]  ;;  %v9931_v44 = vmov 0.0  }
 0xd04   :  { %4267 = vmatprep.subr.mxu0 %v8696_v16  ;;  %4338 = vmatprep.subr.mxu1 %v8701_v24  ;;  %v9930_v8 = vld [vmem:[#allocation45_spill] sm:$0xff]  ;;  %v9932_v16 = vld [vmem:[#allocation35_spill] sm:$0xff]  ;;  %v9933_v24 = vld [vmem:[#allocation12_spill] sm:$0xff] }
 0xd05   :  { %4268 = vmatpush1.msra.mxu0 %v8708_v39  ;;  %4339 = vmatpush1.msra.mxu1 %v8713_v26  ;;  %v9934_v39 = vld [vmem:[#allocation21_spill] sm:$0xff] }
 0xd06   :  { %4269 = vmatprep.subr.mxu0 %v9850_v13  ;;  %4340 = vmatprep.subr.mxu1 %v9851_v50  ;;  %v2561_v26 = vadd.f32 %v9934_v39, %v9933_v24 }
 0xd07   :  { %4270 = vmatpush1.msra.mxu0 %v9852_v19  ;;  %4341 = vmatpush1.msra.mxu1 %v9853_v38 }
 0xd08   :  { %4271 = vmatprep.subr.mxu0 %v8742_v25  ;;  %4342 = vmatprep.subr.mxu1 %v9854_v59  ;;  %v9912_v25 = vld [vmem:[#allocation38_spill] sm:$0xff] }
 0xd09   :  { %4272 = vmatpush1.msra.mxu0 %v8754_v15  ;;  %4343 = vmatpush1.msra.mxu1 %v8759_v6  ;;  %v9911_v15 = vld [vmem:[#allocation48_spill] sm:$0xff]  ;;  %v9935_v6 = vld [vmem:[#allocation33_spill] sm:$0xff] }
 0xd0a   :  { %4273 = vmatprep.subr.mxu0 %v8766_v12  ;;  %4344 = vmatprep.subr.mxu1 %v8771_v46  ;;  %v2563_v46 = vadd.f32 %v9935_v6, %v8461_v55 }
 0xd0b   :  { %4274 = vmatpush1.msra.mxu0 %v8776_v4  ;;  %4345 = vmatpush1.msra.mxu1 %v8783_v51  ;;  %v9914_v51 = vld [vmem:[#allocation39_spill] sm:$0xff] }
 0xd0c   :  { %4275 = vmatprep.subr.mxu0 %v8874_v7  ;;  %4346 = vmatprep.subr.mxu1 %v8879_v11 }
 0xd0d   :  { %4276 = vmatpush1.msra.mxu0 %v8884_v57  ;;  %4347 = vmatpush1.msra.mxu1 %v8891_v9 }
 0xd0e   :  { %4277 = vmatprep.subr.mxu0 %v8896_v58  ;;  %4348 = vmatprep.subr.mxu1 %v8901_v40 }
 0xd0f   :  { %4278 = vmatpush1.msra.mxu0 %v8908_v42  ;;  %4349 = vmatpush1.msra.mxu1 %v9911_v15 }
 0xd10   :  { %4279 = vmatprep.subr.mxu0 %v9912_v25  ;;  %4350 = vmatprep.subr.mxu1 %v9913_v41 }
 0xd11   :  { %4280 = vmatpush1.msra.mxu0 %v9914_v51  ;;  %4351 = vmatpush1.msra.mxu1 %v9915_v18 }
 0xd12   :  { %4281 = vmatprep.subr.mxu0 %v9916_v45  ;;  %4352 = vmatprep.subr.mxu1 %v9917_v22 }
 0xd13   :  { %4282 = vmatpush1.msra.mxu0 %v9918_v49  ;;  %4353 = vmatpush1.msra.mxu1 %v9919_v3 }
 0xd14   :  { %4283 = vmatprep.subr.mxu0 %v9920_v53  ;;  %4354 = vmatprep.subr.mxu1 %v9921_v56 }
 0xd15   :  { %4284 = vmatpush1.msra.mxu0 %v9922_v37  ;;  %4355 = vmatpush1.msra.mxu1 %v9923_v43 }
 0xd16   :  { %4285 = vmatprep.subr.mxu0 %v9924_v20  ;;  %4356 = vmatprep.subr.mxu1 %v9925_v27 }
 0xd17   :  { %4286 = vmatpush1.msra.mxu0 %v9926_v52  ;;  %4357 = vmatpush1.msra.mxu1 %v9927_v36 }
 0xd18   :  { %4287 = vmatprep.subr.mxu0 %v9928_v63  ;;  %4358 = vmatprep.subr.mxu1 %v9929_v17 }
 0xd19   :  { %4288 = vmatpush1.msra.mxu0 %v9930_v8  ;;  %4321 = vmatprep.mubr.f32.mxu0 %v9931_v44 }
 0xd1a   :  { %4359 = vmatpush1.msra.mxu1 %v9932_v16  ;;  %4392 = vmatprep.mubr.f32.mxu1 %v9931_v44 }
 0xdba   :  { %v4080_v4 = vpop.f32.mrf.mxu0  ;;  %v4151_v38 = vpop.f32.mrf.mxu1 }
 0xdbb   :  { %v4156_v12 = vadd.f32 %v4080_v4, %v2561_v26  ;;  %v4158_v5 = vadd.f32 %v4151_v38, %v2674_v29  ;;  %v5478_v38 = vld [vmem:[%s9477_s2 + $0x3d8] sm:$0xff]  ;;  %v5467_v29 = vld [vmem:[%s9477_s2 + $0x380] sm:$0xff] }
 0xdbc   :  { %v4082_v13 = vpop.f32.mrf.mxu0  ;;  %v4153_v34 = vpop.f32.mrf.mxu1 }
 0xdbd   :  { %v5349_v50 = vmul.f32 -1.442695, %v4156_v12  ;;  %v4157_v19 = vadd.f32 %v4082_v13, %v2563_v46  ;;  %v4159_v23 = vadd.f32 %v4153_v34, %v2676_v48  ;;  %v5479_v12 = vld [vmem:[%s9477_s2 + $0x3e0] sm:$0xff]  ;;  %v5482_v13 = vld [vmem:[%s9477_s2 + $0x3f8] sm:$0xff]  ;;  %v5477_v34 = vld [vmem:[%s9477_s2 + $0x3d0] sm:$0xff] }
 0xdbe   :  { %4571 = vmatprep.subr.mxu1 %v5482_v13  ;;  %v5474_v48 = vld [vmem:[%s9477_s2 + $0x3b8] sm:$0xff]  ;;  %v5448_v13 = vld [vmem:[%s9477_s2 + $0x2e8] sm:$0xff] }
 0xdbf   :  { %5768 = vpow2.f32 %v5349_v50  ;;  %v5350_v59 = vmul.f32 -1.442695, %v4157_v19  ;;  %v5351_v35 = vmul.f32 -1.442695, %v4159_v23  ;;  %v5476_v50 = vld [vmem:[%s9477_s2 + $0x3c8] sm:$0xff]  ;;  %v5475_v19 = vld [vmem:[%s9477_s2 + $0x3c0] sm:$0xff] }
 0xdc0   :  { %v5468_v23 = vld [vmem:[%s9477_s2 + $0x388] sm:$0xff] }
 0xdc1   :  { %5770 = vpow2.f32 %v5350_v59  ;;  %v5472_v59 = vld [vmem:[%s9477_s2 + $0x3a8] sm:$0xff] }
 0xdc2   :  { %5772 = vtanh.f32 %v4158_v5  ;;  %v5470_v5 = vld [vmem:[%s9477_s2 + $0x398] sm:$0xff] }
 0xdc3   :  { %5774 = vpow2.f32 %v5351_v35  ;;  %v5464_v35 = vld [vmem:[%s9477_s2 + $0x368] sm:$0xff] }
 0xdcc   :  { %v5769_v47 = vpop.eup %5768 }
 0xdcd   :  { %v4163_v60 = vadd.f32 1.0, %v5769_v47  ;;  %v5469_v47 = vld [vmem:[%s9477_s2 + $0x390] sm:$0xff] }
 0xdce   :  { %v5771_v54 = vpop.eup %5770 }
 0xdcf   :  { %5776 = vrcp.f32 %v4163_v60  ;;  %v4169_v33 = vadd.f32 1.0, %v5771_v54  ;;  %v5773_v0 = vpop.eup %5772  ;;  %v5463_v60 = vld [vmem:[%s9477_s2 + $0x360] sm:$0xff]  ;;  %v5466_v54 = vld [vmem:[%s9477_s2 + $0x378] sm:$0xff] }
 0xdd0   :  { %v5775_v2 = vpop.eup %5774 }
 0xdd1   :  { %5778 = vrcp.f32 %v4169_v33  ;;  %v4176_v1 = vadd.f32 1.0, %v5775_v2  ;;  %v5460_v33 = vld [vmem:[%s9477_s2 + $0x348] sm:$0xff]  ;;  %v5459_v2 = vld [vmem:[%s9477_s2 + $0x340] sm:$0xff] }
 0xdd3   :  { %5780 = vrcp.f32 %v4176_v1  ;;  %v5455_v1 = vld [vmem:[%s9477_s2 + $0x320] sm:$0xff] }
 0xddc   :  { %v5777_v14 = vpop.eup %5776 }
 0xddd   :  { %v4180_v28 = vmul.f32 %v5777_v14, %v5773_v0  ;;  %v5465_v0 = vld [vmem:[%s9477_s2 + $0x370] sm:$0xff]  ;;  %v5462_v14 = vld [vmem:[%s9477_s2 + $0x358] sm:$0xff] }
 0xdde   :  { %v5779_v32 = vpop.eup %5778 }
 0xddf   :  { %v4179_v39 = vmul.f32 %v5779_v32, %v9132_v31  ;;  %v5480_v31 = vld [vmem:[%s9477_s2 + $0x3e8] sm:$0xff]  ;;  %v5461_v32 = vld [vmem:[%s9477_s2 + $0x350] sm:$0xff] }
 0xde0   :  { %v5781_v4 = vpop.eup %5780  ;;  %4500 = vmatprep.subr.mxu0 %v5480_v31  ;;  %v5451_v31 = vld [vmem:[%s9477_s2 + $0x300] sm:$0xff] }
 0xde1   :  { %v9212_v26 = vadd.f32 %v4180_v28, %v4179_v39  ;;  %v5456_v28 = vld [vmem:[%s9477_s2 + $0x328] sm:$0xff]  ;;  %v5458_v39 = vld [vmem:[%s9477_s2 + $0x338] sm:$0xff] }
 0xde3   :  { %5782 = vtanh.f32 %v9212_v26 }
 0xdf0   :  { %v5783_v6 = vpop.eup %5782 }
 0xdf1   :  { %v9215_v46 = vmul.f32 %v5783_v6, %v5781_v4  ;;  %v5452_v4 = vld [vmem:[%s9477_s2 + $0x308] sm:$0xff]  ;;  %v5457_v6 = vld [vmem:[%s9477_s2 + $0x330] sm:$0xff] }
 0xdf3   :  { %4322 = vmatmul.mubr.f32.vlgmr.msra.gmra.mxu0 %v9215_v46  ;;  %4393 = vmatmul.mubr.f32.vlgmr.msra.gmra.mxu1 %v9215_v46 }
 0xdf4   :  { %4564 = vmatprep.mubr.f32.mxu0 %v9931_v44  ;;  %4635 = vmatprep.mubr.f32.mxu1 %v9931_v44  ;;  %v5481_v44 = vld [vmem:[%s9477_s2 + $0x3f0] sm:$0xff] }
 0xdf5   :  { %4501 = vmatpush1.msra.mxu0 %v5479_v12  ;;  %4572 = vmatpush1.msra.mxu1 %v5481_v44  ;;  %v5454_v12 = vld [vmem:[%s9477_s2 + $0x318] sm:$0xff]  ;;  %v5447_v44 = vld [vmem:[%s9477_s2 + $0x2e0] sm:$0xff] }
 0xdf6   :  { %4502 = vmatprep.subr.mxu0 %v5476_v50  ;;  %4573 = vmatprep.subr.mxu1 %v5478_v38  ;;  %v5453_v50 = vld [vmem:[%s9477_s2 + $0x310] sm:$0xff] }
 0xdf7   :  { %4503 = vmatpush1.msra.mxu0 %v5475_v19  ;;  %4574 = vmatpush1.msra.mxu1 %v5477_v34  ;;  %v5450_v19 = vld [vmem:[%s9477_s2 + $0x2f8] sm:$0xff]  ;;  %v5449_v38 = vld [vmem:[%s9477_s2 + $0x2f0] sm:$0xff] }
 0xdf8   :  { %4504 = vmatprep.subr.mxu0 %v5472_v59  ;;  %4575 = vmatprep.subr.mxu1 %v5474_v48 }
 0xdf9   :  { %4505 = vmatpush1.msra.mxu0 %v5471_v62  ;;  %4576 = vmatpush1.msra.mxu1 %v5473_v30 }
 0xdfa   :  { %4506 = vmatprep.subr.mxu0 %v5468_v23  ;;  %4577 = vmatprep.subr.mxu1 %v5470_v5  ;;  %v4701_v5 = vld [vmem:[%s9481_s6 + $0x70] sm:$0xff] }
 0xdfb   :  { %4507 = vmatpush1.msra.mxu0 %v5467_v29  ;;  %4578 = vmatpush1.msra.mxu1 %v5469_v47  ;;  %v4699_v47 = vld [vmem:[%s9481_s6 + $0x60] sm:$0xff] }
 0xdfc   :  { %4508 = vmatprep.subr.mxu0 %v5464_v35  ;;  %4579 = vmatprep.subr.mxu1 %v5466_v54  ;;  %v9942_v35 = vld [vmem:[#allocation61_spill] sm:$0xff]  ;;  %v4697_v54 = vld [vmem:[%s9481_s6 + $0x50] sm:$0xff] }
 0xdfd   :  { %4509 = vmatpush1.msra.mxu0 %v5463_v60  ;;  %4580 = vmatpush1.msra.mxu1 %v5465_v0  ;;  %v4698_v60 = vld [vmem:[%s9481_s6 + $0x58] sm:$0xff]  ;;  %v4695_v0 = vld [vmem:[%s9481_s6 + $0x40] sm:$0xff] }
 0xdfe   :  { %4510 = vmatprep.subr.mxu0 %v5460_v33  ;;  %4581 = vmatprep.subr.mxu1 %v5462_v14  ;;  %v4696_v33 = vld [vmem:[%s9481_s6 + $0x48] sm:$0xff]  ;;  %v4693_v14 = vld [vmem:[%s9481_s6 + $0x30] sm:$0xff] }
 0xdff   :  { %4511 = vmatpush1.msra.mxu0 %v5459_v2  ;;  %4582 = vmatpush1.msra.mxu1 %v5461_v32  ;;  %v4694_v2 = vld [vmem:[%s9481_s6 + $0x38] sm:$0xff]  ;;  %v4691_v32 = vld [vmem:[%s9481_s6 + $0x20] sm:$0xff] }
 0xe00   :  { %4512 = vmatprep.subr.mxu0 %v5456_v28  ;;  %4583 = vmatprep.subr.mxu1 %v5458_v39  ;;  %v4692_v28 = vld [vmem:[%s9481_s6 + $0x28] sm:$0xff]  ;;  %v4689_v39 = vld [vmem:[%s9481_s6 + $0x10] sm:$0xff] }
 0xe01   :  { %4513 = vmatpush1.msra.mxu0 %v5455_v1  ;;  %4584 = vmatpush1.msra.mxu1 %v5457_v6  ;;  %v4690_v1 = vld [vmem:[%s9481_s6 + $0x18] sm:$0xff]  ;;  %v4687_v6 = vld [vmem:[%s9481_s6] sm:$0xff] }
 0xe02   :  { %4514 = vmatprep.subr.mxu0 %v5452_v4  ;;  %4585 = vmatprep.subr.mxu1 %v5454_v12  ;;  %v4688_v4 = vld [vmem:[%s9481_s6 + $0x8] sm:$0xff] }
 0xe03   :  { %4515 = vmatpush1.msra.mxu0 %v5451_v31  ;;  %4586 = vmatpush1.msra.mxu1 %v5453_v50  ;;  %v9943_v31 = vld [vmem:[#allocation14_spill] sm:$0xff]  ;;  %v9944_v12 = vld [vmem:[#allocation37_spill] sm:$0xff] }
 0xe04   :  { %4516 = vmatprep.subr.mxu0 %v5448_v13  ;;  %4587 = vmatprep.subr.mxu1 %v5450_v19  ;;  %v9945_v13 = vld [vmem:[#allocation46_spill] sm:$0xff]  ;;  %v9946_v50 = vld [vmem:[#allocation57_spill] sm:$0xff] }
 0xe05   :  { %4517 = vmatpush1.msra.mxu0 %v5447_v44  ;;  %4588 = vmatpush1.msra.mxu1 %v5449_v38  ;;  %v2573_v44 = vadd.f32 %v9946_v50, %v9933_v24  ;;  %v9947_v38 = vld [vmem:[#allocation59_spill] sm:$0xff] }
 0xe06   :  { %4518 = vmatprep.subr.mxu0 %v8874_v7  ;;  %4589 = vmatprep.subr.mxu1 %v8879_v11  ;;  %v4702_v7 = vld [vmem:[%s9481_s6 + $0x78] sm:$0xff]  ;;  %v9938_v11 = vld [vmem:[#allocation44_spill] sm:$0xff] }
 0xe07   :  { %4519 = vmatpush1.msra.mxu0 %v8884_v57  ;;  %4590 = vmatpush1.msra.mxu1 %v8891_v9  ;;  %v2567_v57 = vadd.f32 %v9938_v11, %v9933_v24 }
 0xe08   :  { %4520 = vmatprep.subr.mxu0 %v8896_v58  ;;  %4591 = vmatprep.subr.mxu1 %v8901_v40  ;;  %v9939_v58 = vld [vmem:[#allocation55_spill] sm:$0xff] }
 0xe09   :  { %4521 = vmatpush1.msra.mxu0 %v8908_v42  ;;  %4592 = vmatpush1.msra.mxu1 %v9911_v15  ;;  %v2569_v40 = vadd.f32 %v9939_v58, %v8461_v55 }
 0xe0a   :  { %4522 = vmatprep.subr.mxu0 %v9912_v25  ;;  %4593 = vmatprep.subr.mxu1 %v9913_v41 }
 0xe0b   :  { %4523 = vmatpush1.msra.mxu0 %v9914_v51  ;;  %4594 = vmatpush1.msra.mxu1 %v9915_v18 }
 0xe0c   :  { %4524 = vmatprep.subr.mxu0 %v9916_v45  ;;  %4595 = vmatprep.subr.mxu1 %v9917_v22  ;;  %v9940_v22 = vld [vmem:[#allocation56_spill] sm:$0xff] }
 0xe0d   :  { %4525 = vmatpush1.msra.mxu0 %v9918_v49  ;;  %4596 = vmatpush1.msra.mxu1 %v9919_v3  ;;  %v2682_v49 = vadd.f32 %v9940_v22, %v8473_v61 }
 0xe0e   :  { %4526 = vmatprep.subr.mxu0 %v9920_v53  ;;  %4597 = vmatprep.subr.mxu1 %v9921_v56  ;;  %v9941_v53 = vld [vmem:[#allocation13_spill] sm:$0xff] }
 0xe0f   :  { %4527 = vmatpush1.msra.mxu0 %v9922_v37  ;;  %4598 = vmatpush1.msra.mxu1 %v9923_v43  ;;  %v2680_v56 = vadd.f32 %v9941_v53, %v8478_v10 }
 0xe10   :  { %4528 = vmatprep.subr.mxu0 %v9924_v20  ;;  %4599 = vmatprep.subr.mxu1 %v9925_v27 }
 0xe11   :  { %4529 = vmatpush1.msra.mxu0 %v9926_v52  ;;  %4600 = vmatpush1.msra.mxu1 %v9927_v36 }
 0xe12   :  { %4530 = vmatprep.subr.mxu0 %v9928_v63  ;;  %4601 = vmatprep.subr.mxu1 %v9929_v17 }
 0xe13   :  { %4531 = vmatpush1.msra.mxu0 %v9930_v8  ;;  %4602 = vmatpush1.msra.mxu1 %v9932_v16 }
 0xe14   :  { %5511 = vmatprep.subr.mxu0 %v4702_v7 }
 0xeb3   :  { %v4323_v9 = vpop.f32.mrf.mxu0  ;;  %v4394_v51 = vpop.f32.mrf.mxu1 }
 0xeb4   :  { %v4399_v42 = vadd.f32 %v4323_v9, %v2567_v57  ;;  %v4401_v37 = vadd.f32 %v4394_v51, %v2680_v56 }
 0xeb5   :  { %v4325_v15 = vpop.f32.mrf.mxu0  ;;  %v4396_v45 = vpop.f32.mrf.mxu1 }
 0xeb6   :  { %v5416_v25 = vmul.f32 -1.442695, %v4399_v42  ;;  %v4400_v41 = vadd.f32 %v4325_v15, %v2569_v40  ;;  %v4402_v3 = vadd.f32 %v4396_v45, %v2682_v49 }
 0xeb8   :  { %5784 = vpow2.f32 %v5416_v25  ;;  %v5417_v18 = vmul.f32 -1.442695, %v4400_v41  ;;  %v5418_v43 = vmul.f32 -1.442695, %v4402_v3  ;;  %v9949_v41 = vld [vmem:[#allocation58_spill] sm:$0xff] }
 0xeb9   :  { %v2686_v24 = vadd.f32 %v9949_v41, %v8478_v10  ;;  %v9434_v3 = vld [vmem:[%s9482_s7] ss:$0 sm:$0xff] }
 0xeba   :  { %5786 = vpow2.f32 %v5417_v18 }
 0xebb   :  { %5788 = vtanh.f32 %v4401_v37 }
 0xebc   :  { %5790 = vpow2.f32 %v5418_v43 }
 0xec5   :  { %v5785_v20 = vpop.eup %5784 }
 0xec6   :  { %v4406_v27 = vadd.f32 1.0, %v5785_v20 }
 0xec7   :  { %v5787_v52 = vpop.eup %5786 }
 0xec8   :  { %5792 = vrcp.f32 %v4406_v27  ;;  %v4412_v36 = vadd.f32 1.0, %v5787_v52  ;;  %v5789_v63 = vpop.eup %5788 }
 0xec9   :  { %v5791_v17 = vpop.eup %5790 }
 0xeca   :  { %5794 = vrcp.f32 %v4412_v36  ;;  %v4419_v34 = vadd.f32 1.0, %v5791_v17 }
 0xecc   :  { %5796 = vrcp.f32 %v4419_v34 }
 0xed5   :  { %v5793_v8 = vpop.eup %5792 }
 0xed6   :  { %v4423_v16 = vmul.f32 %v5793_v8, %v5789_v63 }
 0xed7   :  { %v5795_v59 = vpop.eup %5794 }
 0xed8   :  { %v4422_v62 = vmul.f32 %v5795_v59, %v9212_v26  ;;  %v4700_v26 = vld [vmem:[%s9481_s6 + $0x68] sm:$0xff] }
 0xed9   :  { %v5797_v23 = vpop.eup %5796 }
 0xeda   :  { %v9369_v48 = vadd.f32 %v4423_v16, %v4422_v62 }
 0xedc   :  { %5798 = vtanh.f32 %v9369_v48 }
 0xee9   :  { %v5799_v30 = vpop.eup %5798 }
 0xeea   :  { %v4426_v29 = vmul.f32 %v5799_v30, %v5797_v23 }
 0xeec   :  { %4565 = vmatmul.mubr.f32.vlgmr.msra.gmra.mxu0 %v4426_v29  ;;  %4636 = vmatmul.mubr.f32.vlgmr.msra.gmra.mxu1 %v4426_v29 }
 0xeed   :  { %5512 = vmatpush3.msra.mxu0 %v4702_v7  ;;  %5543 = vmatprep.mubr.f32.mxu0 %v9942_v35  ;;  %v2575_v7 = vadd.f32 %v9947_v38, %v8461_v55 }
 0xeee   :  { %5513 = vmatprep.subr.mxu0 %v4701_v5 }
 0xeef   :  { %5514 = vmatpush3.msra.mxu0 %v4701_v5 }
 0xef0   :  { %5515 = vmatprep.subr.mxu0 %v4700_v26 }
 0xef1   :  { %5516 = vmatpush3.msra.mxu0 %v4700_v26 }
 0xef2   :  { %5517 = vmatprep.subr.mxu0 %v4699_v47 }
 0xef3   :  { %5518 = vmatpush3.msra.mxu0 %v4699_v47 }
 0xef4   :  { %5519 = vmatprep.subr.mxu0 %v4698_v60 }
 0xef5   :  { %5520 = vmatpush3.msra.mxu0 %v4698_v60 }
 0xef6   :  { %5521 = vmatprep.subr.mxu0 %v4697_v54 }
 0xef7   :  { %5522 = vmatpush3.msra.mxu0 %v4697_v54 }
 0xef8   :  { %5523 = vmatprep.subr.mxu0 %v4696_v33 }
 0xef9   :  { %5524 = vmatpush3.msra.mxu0 %v4696_v33 }
 0xefa   :  { %5525 = vmatprep.subr.mxu0 %v4695_v0 }
 0xefb   :  { %5526 = vmatpush3.msra.mxu0 %v4695_v0 }
 0xefc   :  { %5527 = vmatprep.subr.mxu0 %v4694_v2 }
 0xefd   :  { %5528 = vmatpush3.msra.mxu0 %v4694_v2 }
 0xefe   :  { %5529 = vmatprep.subr.mxu0 %v4693_v14 }
 0xeff   :  { %5530 = vmatpush3.msra.mxu0 %v4693_v14 }
 0xf00   :  { %5531 = vmatprep.subr.mxu0 %v4692_v28 }
 0xf01   :  { %5532 = vmatpush3.msra.mxu0 %v4692_v28 }
 0xf02   :  { %5533 = vmatprep.subr.mxu0 %v4691_v32 }
 0xf03   :  { %5534 = vmatpush3.msra.mxu0 %v4691_v32 }
 0xf04   :  { %5535 = vmatprep.subr.mxu0 %v4690_v1 }
 0xf05   :  { %5536 = vmatpush3.msra.mxu0 %v4690_v1 }
 0xf06   :  { %5537 = vmatprep.subr.mxu0 %v4689_v39 }
 0xf07   :  { %5538 = vmatpush3.msra.mxu0 %v4689_v39 }
 0xf08   :  { %5539 = vmatprep.subr.mxu0 %v4688_v4 }
 0xf09   :  { %5540 = vmatpush3.msra.mxu0 %v4688_v4 }
 0xf0a   :  { %5541 = vmatprep.subr.mxu0 %v4687_v6 }
 0xf0b   :  { %5542 = vmatpush3.msra.mxu0 %v4687_v6 }
 0xf0c   :  { %5544 = vmatmul.mubr.f32.vlgmr.msra.gmra.mxu0 %v9943_v31 }
 0xf0d   :  { %5546 = vmatprep.mubr.f32.mxu0 %v9944_v12 }
 0xf10   :  { %5547 = vmatmul.mubr.f32.gmra.mxu0 %v9945_v13 }
 0xf11   :  { %5549 = vmatprep.mubr.f32.mxu0 %v9135_v21  ;;  %v9948_v21 = vld [vmem:[#allocation60_spill] sm:$0xff] }
 0xf14   :  { %5550 = vmatmul.mubr.f32.gmra.mxu0 %v9215_v46  ;;  %v2688_v46 = vadd.f32 %v9948_v21, %v8473_v61 }
 0xf15   :  { %5552 = vmatprep.mubr.f32.mxu0 %v4426_v29 }
 0xfac   :  { %v4566_v19 = vpop.f32.mrf.mxu0  ;;  %v4637_v40 = vpop.f32.mrf.mxu1 }
 0xfad   :  { %v4642_v11 = vadd.f32 %v4566_v19, %v2573_v44  ;;  %v4644_v51 = vadd.f32 %v4637_v40, %v2686_v24 }
 0xfae   :  { %v4568_v57 = vpop.f32.mrf.mxu0  ;;  %v4639_v15 = vpop.f32.mrf.mxu1 }
 0xfaf   :  { %v5483_v9 = vmul.f32 -1.442695, %v4642_v11  ;;  %v4643_v58 = vadd.f32 %v4568_v57, %v2575_v7  ;;  %v4645_v25 = vadd.f32 %v4639_v15, %v2688_v46 }
 0xfb1   :  { %5800 = vpow2.f32 %v5483_v9  ;;  %v5484_v42 = vmul.f32 -1.442695, %v4643_v58  ;;  %v5485_v18 = vmul.f32 -1.442695, %v4645_v25 }
 0xfb3   :  { %5802 = vpow2.f32 %v5484_v42 }
 0xfb4   :  { %5804 = vtanh.f32 %v4644_v51 }
 0xfb5   :  { %5806 = vpow2.f32 %v5485_v18 }
 0xfbe   :  { %v5801_v45 = vpop.eup %5800 }
 0xfbf   :  { %v4649_v55 = vadd.f32 1.0, %v5801_v45 }
 0xfc0   :  { %v5803_v22 = vpop.eup %5802 }
 0xfc1   :  { %5808 = vrcp.f32 %v4649_v55  ;;  %v4655_v49 = vadd.f32 1.0, %v5803_v22  ;;  %v5805_v61 = vpop.eup %5804 }
 0xfc2   :  { %v5807_v56 = vpop.eup %5806 }
 0xfc3   :  { %5810 = vrcp.f32 %v4655_v49  ;;  %v4662_v36 = vadd.f32 1.0, %v5807_v56 }
 0xfc5   :  { %5812 = vrcp.f32 %v4662_v36 }
 0xfcc   :  { %v5545_v53 = vpop.f32.mrf.mxu0 }
 0xfcd   :  { %v4782_v10 = vadd.f32 %v5545_v53, %v9434_v3 }
 0xfce   :  { %v5809_v37 = vpop.eup %5808  ;;  %v4776_v43 = vpop.f32.mrf.mxu0 }
 0xfcf   :  { %v4666_v20 = vmul.f32 %v5809_v37, %v5805_v61  ;;  %4816 = vst [vmem:[%s9483_s8 + $0x8] sm:$0xff] %v4782_v10  ;;  %v4777_v27 = vadd.f32 %v9434_v3, %v4776_v43 }
 0xfd0   :  { %v5811_v52 = vpop.eup %5810  ;;  %v5548_v63 = vpop.f32.mrf.mxu0 }
 0xfd1   :  { %v4665_v17 = vmul.f32 %v5811_v52, %v9369_v48  ;;  %4815 = vst [vmem:[%s9483_s8] sm:$0xff] %v4777_v27  ;;  %v4792_v8 = vadd.f32 %v5548_v63, %v9434_v3 }
 0xfd2   :  { %v4786_v16 = vpop.f32.mrf.mxu0  ;;  %v5813_v29 = vpop.eup %5812 }
 0xfd3   :  { %4818 = vst [vmem:[%s9483_s8 + $0x18] sm:$0xff] %v4792_v8  ;;  %v4787_v59 = vadd.f32 %v9434_v3, %v4786_v16  ;;  %v4667_v34 = vadd.f32 %v4666_v20, %v4665_v17 }
 0xfd4   :  { %v5551_v62 = vpop.f32.mrf.mxu0 }
 0xfd5   :  { %4817 = vst [vmem:[%s9483_s8 + $0x10] sm:$0xff] %v4787_v59  ;;  %v4802_v48 = vadd.f32 %v5551_v62, %v9434_v3  ;;  %5814 = vtanh.f32 %v4667_v34  ;;  %4678 = vst [vmem:[#allocation8 + $0x8] sm:$0xff] %v4667_v34 }
 0xfd6   :  { %v4796_v23 = vpop.f32.mrf.mxu0 }
 0xfd7   :  { %4820 = vst [vmem:[%s9483_s8 + $0x28] sm:$0xff] %v4802_v48  ;;  %v4797_v30 = vadd.f32 %v9434_v3, %v4796_v23 }
 0xfd9   :  { %4819 = vst [vmem:[%s9483_s8 + $0x20] sm:$0xff] %v4797_v30 }
 0xfe2   :  { %v5815_v5 = vpop.eup %5814 }
 0xfe3   :  { %v4669_v35 = vmul.f32 %v5815_v5, %v5813_v29 }
 0xfe5   :  { %5553 = vmatmul.mubr.f32.gmra.mxu0 %v4669_v35  ;;  %4675 = vst [vmem:[#allocation6 + $0x8] sm:$0xff] %v4669_v35 }
 0xfe6   :  { %5827 = shalt.err (!%p5824_p4)
}
 0xfe7   :  { %s5862_s11 = smov 128   ;;  %s5863_s4 = smov 8  }
 0xfe8   :  { %4836 = dma.vmem_to_hbm [thread:$0]  %s4831_s29, 256, %s9484_s9, [#allocation7], %s5862_s11, %s5862_s11, %s5863_s4  }
 0xfe9   :  { %s5864_s13 = smov [#allocation8]  }
 0xfea   :  { %s4842_s2 = sshll.u32 %s5864_s13, 4  ;;  %s4843_s2 = int_to_ptr.vmem [resolvable:$true] %s4842_s2 }
 0xfeb   :  { %s5836_s5 = scalar_lea.vmem %s4843_s2, 256  ;;  %p5841_p6 = scmp.lt.s32.totalorder %s4843_s2, %s4843_s2 }
 0xfec   :  { %p5837_p5 = scmp.ne.s32.totalorder %s4843_s2, %s5836_s5  ;;  %p5842_p7 = scmp.lt.s32.totalorder %s5836_s5, %s5836_s5 }
 0xfee   :  { %p5843_p8 = por %p5842_p7, %p5841_p6 }
 0xff0   :  { %p5844_p9 = pnand %p5843_p8, %p5837_p5 }
 0xff2   :  { %5847 = shalt.err (!%p5844_p9)
}
 0xff3   :  { %4848 = dma.vmem_to_hbm [thread:$0]  %s4843_s2, 256, %s9485_s10, [#allocation9], %s5862_s11, %s5862_s11, %s5863_s4  }
0x10a5   :  { %v5554_v26 = vpop.f32.mrf.mxu0 }
0x10a6   :  { %v4812_v47 = vadd.f32 %v5554_v26, %v9434_v3 }
0x10a7   :  { %v4806_v60 = vpop.f32.mrf.mxu0 }
0x10a8   :  { %4822 = vst [vmem:[%s9483_s8 + $0x38] sm:$0xff] %v4812_v47  ;;  %v4807_v54 = vadd.f32 %v9434_v3, %v4806_v60 }
0x10aa   :  { %4821 = vst [vmem:[%s9483_s8 + $0x30] sm:$0xff] %v4807_v54 }
0x10ab   :  { %5856 = dma.done.wait [#allocation7], 256  }
0x10ac   :  { %5857 = vsyncadd [#allocation7], 4294967040 }
0x10ad   :  { %5858 = dma.done.wait [#allocation9], 256  }
0x10ae   :  { %5859 = vsyncadd [#allocation9], 4294967040 }
0x10af   :  { %4857 = vsyncpa [#allocation7], 1 }
0x10b0   :  { %4858 = vsyncpa [#allocation9], 1 }

</bundles_post_ra>
